<compile_context>
chip_gen: v7x
topology: tpu7x:2x2x1
jax: 0.10.0
libtpu: 0.0.40
codegen_flags: <defaults>
</compile_context>

<pallas_src>
import math
import functools

import jax
import jax.numpy as jnp
from jax import lax
from jax.experimental import pallas as pl
from jax.experimental.pallas import tpu as pltpu  # noqa: F401  (TPU-specific tuning hooks)

# ---------------- model sizes (small, synthetic) ----------------
B = 2        # batch
S = 8        # sequence length (number of patches)
D = 32       # model dim (layer.size)
H = 4        # attention heads
DH = D // H  # per-head dim
DFF = 64     # feed-forward hidden dim
N_LAYERS = 4
EPS = 1e-5
BS = B * S


# ---------------- in-kernel helpers ----------------
def _layernorm(x, gamma, beta):
    mean = jnp.mean(x, axis=-1, keepdims=True)
    var = jnp.mean((x - mean) ** 2, axis=-1, keepdims=True)
    return (x - mean) * lax.rsqrt(var + EPS) * gamma + beta


# ---------------- fused encoder kernel ----------------
def encoder_kernel(x_ref, wqkv_ref, bqkv_ref, wo_ref, w1_ref, b1_ref, w2_ref,
                   dvec_ref, norm_ref, o_ref):
    """Whole InTraEncoder forward on one (B*S, D) activation block.

    wqkv_ref: (L, D, 3D)   fused Q/K/V projection
    bqkv_ref: (L, 1, 3D)
    wo_ref:   (L, D, D)
    w1_ref:   (L, D, DFF)   b1_ref: (L, 1, DFF)
    w2_ref:   (L, DFF, D)
    dvec_ref: (L, 6, D)     rows = [ln1_g, ln1_b, bo, ln2_g, ln2_b, b2]
    norm_ref: (2, D)        final LayerNorm gamma / beta
    """
    x = x_ref[...].astype(jnp.float32)                       # (BS, D)

    # Block-diagonal attention bias: a query row attends only to keys of its own batch
    # element. Batch id = row index >> log2(S) (S is a power of two here).
    row_idx = lax.broadcasted_iota(jnp.int32, (BS, BS), 0)
    col_idx = lax.broadcasted_iota(jnp.int32, (BS, BS), 1)
    if S & (S - 1) == 0:
        sh = S.bit_length() - 1
        row_b = lax.shift_right_logical(row_idx, sh)
        col_b = lax.shift_right_logical(col_idx, sh)
    else:
        row_b = row_idx // S
        col_b = col_idx // S
    attn_bias = jnp.where(row_b == col_b, 0.0, -1e30).astype(jnp.float32)

    scale = 1.0 / math.sqrt(DH)
    qkT = (((1,), (1,)), ((), ()))                            # contract last dims: q @ k^T

    saved = []
    for li in range(N_LAYERS):                                # static unroll over layers
        if li > N_LAYERS / 2:                                 # mid-stack skip connection
            x = x + saved[N_LAYERS - li]

        dv = dvec_ref[li]                                     # (6, D)
        ln1_g, ln1_b = dv[0:1], dv[1:2]
        bo = dv[2:3]
        ln2_g, ln2_b = dv[3:4], dv[4:5]
        b2 = dv[5:6]

        # ---- multi-head self-attention sublayer (pre-norm, fused residual) ----
        xn = _layernorm(x, ln1_g, ln1_b)
        qkv = jnp.dot(xn, wqkv_ref[li],
                      preferred_element_type=jnp.float32) + bqkv_ref[li]   # (BS, 3D)
        q = qkv[:, 0:D]
        k = qkv[:, D:2 * D]
        v = qkv[:, 2 * D:3 * D]
        wo_l = wo_ref[li]                                     # (D, D)

        attn = jnp.zeros((BS, D), jnp.float32)
        for h in range(H):                                    # static loop over heads
            sl = slice(h * DH, (h + 1) * DH)
            s = lax.dot_general(q[:, sl], k[:, sl], qkT,
                                preferred_element_type=jnp.float32) * scale
            s = s + attn_bias
            s = s - jnp.max(s, axis=-1, keepdims=True)
            p = jnp.exp(s)
            p = p / jnp.sum(p, axis=-1, keepdims=True)
            oh = jnp.dot(p, v[:, sl], preferred_element_type=jnp.float32)  # (BS, DH)
            # concat-free output projection: accumulate head slice of Wo
            attn = attn + jnp.dot(oh, wo_l[sl, :], preferred_element_type=jnp.float32)
        x = x + attn + bo

        # ---- position-wise feed-forward sublayer (pre-norm, fused residual) ----
        xn = _layernorm(x, ln2_g, ln2_b)
        hdn = jnp.dot(xn, w1_ref[li], preferred_element_type=jnp.float32) + b1_ref[li]
        hdn = jnp.maximum(hdn, 0.0)                           # ReLU
        x = x + jnp.dot(hdn, w2_ref[li], preferred_element_type=jnp.float32) + b2

        saved.append(x)

    # ---- final LayerNorm ----
    o_ref[...] = _layernorm(x, norm_ref[0:1], norm_ref[1:2]).astype(o_ref.dtype)


# ---------------- pallas_call wrapper ----------------
def _full_spec(shape):
    zeros = (0,) * len(shape)
    return pl.BlockSpec(shape, lambda z=zeros: z)


@jax.jit
def intra_encoder_forward(x, packed):
    x2 = x.reshape(BS, D)                                     # merge batch & seq rows
    out = pl.pallas_call(
        encoder_kernel,
        out_shape=jax.ShapeDtypeStruct((BS, D), x.dtype),
        in_specs=[_full_spec((BS, D)),
                  _full_spec((N_LAYERS, D, 3 * D)),
                  _full_spec((N_LAYERS, 1, 3 * D)),
                  _full_spec((N_LAYERS, D, D)),
                  _full_spec((N_LAYERS, D, DFF)),
                  _full_spec((N_LAYERS, 1, DFF)),
                  _full_spec((N_LAYERS, DFF, D)),
                  _full_spec((N_LAYERS, 6, D)),
                  _full_spec((2, D))],
        out_specs=_full_spec((BS, D)),
    )(x2, packed["wqkv"], packed["bqkv"], packed["wo"], packed["w1"],
      packed["b1"], packed["w2"], packed["dvec"], packed["norm"])
    return out.reshape(B, S, D)


# ---------------- parameter packing ----------------
def pack_params(params):
    L = params["layers"]
    wqkv = jnp.stack([jnp.concatenate([lp["wq"], lp["wk"], lp["wv"]], axis=1) for lp in L])
    bqkv = jnp.stack([jnp.concatenate([lp["bq"], lp["bk"], lp["bv"]], axis=1) for lp in L])
    wo = jnp.stack([lp["wo"] for lp in L])
    w1 = jnp.stack([lp["w1"] for lp in L])
    b1 = jnp.stack([lp["b1"] for lp in L])
    w2 = jnp.stack([lp["w2"] for lp in L])
    dvec = jnp.stack([jnp.concatenate([lp["ln1_g"], lp["ln1_b"], lp["bo"],
                                       lp["ln2_g"], lp["ln2_b"], lp["b2"]], axis=0)
                      for lp in L])
    norm = jnp.concatenate([params["norm_g"], params["norm_b"]], axis=0)   # (2, D)
    return dict(wqkv=wqkv, bqkv=bqkv, wo=wo, w1=w1, b1=b1, w2=w2, dvec=dvec, norm=norm)


# ---------------- pure-JAX reference (silent sanity check) ----------------
def _ref_layer(x, p):
    hp = functools.partial(jnp.matmul, precision="highest")
    xn = _layernorm(x, p["ln1_g"][0], p["ln1_b"][0])
    q = hp(xn, p["wq"]) + p["bq"][0]
    k = hp(xn, p["wk"]) + p["bk"][0]
    v = hp(xn, p["wv"]) + p["bv"][0]
    qh = q.reshape(B, S, H, DH).transpose(0, 2, 1, 3)
    kh = k.reshape(B, S, H, DH).transpose(0, 2, 1, 3)
    vh = v.reshape(B, S, H, DH).transpose(0, 2, 1, 3)
    s = jnp.einsum("bhqd,bhkd->bhqk", qh, kh, precision="highest") / math.sqrt(DH)
    pattn = jax.nn.softmax(s, axis=-1)
    o = jnp.einsum("bhqk,bhkd->bhqd", pattn, vh, precision="highest")
    o = o.transpose(0, 2, 1, 3).reshape(B, S, D)
    x = x + hp(o, p["wo"]) + p["bo"][0]
    xn = _layernorm(x, p["ln2_g"][0], p["ln2_b"][0])
    h = jnp.maximum(hp(xn, p["w1"]) + p["b1"][0], 0.0)
    return x + hp(h, p["w2"]) + p["b2"][0]


def _ref_forward(x, params):
    saved = []
    n = len(params["layers"])
    for i, lp in enumerate(params["layers"]):
        if i > n / 2:
            x = x + saved[n - i]
        x = _ref_layer(x, lp)
        saved.append(x)
    return _layernorm(x, params["norm_g"][0], params["norm_b"][0])


# ---------------- deterministic parameter init ----------------
def init_params(key):
    layers = []
    for _ in range(N_LAYERS):
        key, *ks = jax.random.split(key, 13)
        sc = 1.0 / math.sqrt(D)
        lp = {
            "wq": jax.random.normal(ks[0], (D, D), jnp.float32) * sc,
            "wk": jax.random.normal(ks[1], (D, D), jnp.float32) * sc,
            "wv": jax.random.normal(ks[2], (D, D), jnp.float32) * sc,
            "wo": jax.random.normal(ks[3], (D, D), jnp.float32) * sc,
            "bq": jax.random.normal(ks[4], (1, D), jnp.float32) * 0.02,
            "bk": jax.random.normal(ks[5], (1, D), jnp.float32) * 0.02,
            "bv": jax.random.normal(ks[6], (1, D), jnp.float32) * 0.02,
            "bo": jax.random.normal(ks[7], (1, D), jnp.float32) * 0.02,
            "w1": jax.random.normal(ks[8], (D, DFF), jnp.float32) * sc,
            "b1": jax.random.normal(ks[9], (1, DFF), jnp.float32) * 0.02,
            "w2": jax.random.normal(ks[10], (DFF, D), jnp.float32) / math.sqrt(DFF),
            "b2": jax.random.normal(ks[11], (1, D), jnp.float32) * 0.02,
            "ln1_g": jnp.ones((1, D), jnp.float32),
            "ln1_b": jnp.zeros((1, D), jnp.float32),
            "ln2_g": jnp.ones((1, D), jnp.float32),
            "ln2_b": jnp.zeros((1, D), jnp.float32),
        }
        layers.append(lp)
    return {
        "layers": layers,
        "norm_g": jnp.ones((1, D), jnp.float32),
        "norm_b": jnp.zeros((1, D), jnp.float32),
    }


if __name__ == "__main__":
    key = jax.random.PRNGKey(0)
    kx, kp = jax.random.split(key)
    x = jax.random.normal(kx, (B, S, D), jnp.float32)
    params = init_params(kp)
    packed = pack_params(params)

    out = jax.block_until_ready(intra_encoder_forward(x, packed))
    ref = jax.block_until_ready(_ref_forward(x, params))
    assert out.shape == (B, S, D)
    assert jnp.allclose(out, ref, atol=2e-2, rtol=2e-2), float(jnp.max(jnp.abs(out - ref)))

    print("KERNEL_OK")
</pallas_src>

<mosaic_0001>
module attributes {stable_mosaic.version = 11 : i64} {
  func.func @encoder_kernel(%arg0: memref<16x32xf32, #tpu.memory_space<vmem>>, %arg1: memref<4x32x96xf32, #tpu.memory_space<vmem>>, %arg2: memref<4x1x96xf32, #tpu.memory_space<vmem>>, %arg3: memref<4x32x32xf32, #tpu.memory_space<vmem>>, %arg4: memref<4x32x64xf32, #tpu.memory_space<vmem>>, %arg5: memref<4x1x64xf32, #tpu.memory_space<vmem>>, %arg6: memref<4x64x32xf32, #tpu.memory_space<vmem>>, %arg7: memref<4x6x32xf32, #tpu.memory_space<vmem>>, %arg8: memref<2x32xf32, #tpu.memory_space<vmem>>, %arg9: memref<16x32xf32, #tpu.memory_space<vmem>>) attributes {dimension_semantics = [], scalar_prefetch = 0 : i64, scratch_operands = 0 : i64, tpu.core_type = #tpu.core_type<tc>} {
    %c0 = arith.constant 0 : index
    %c0_0 = arith.constant 0 : index
    %0 = vector.load %arg0[%c0, %c0_0] : memref<16x32xf32, #tpu.memory_space<vmem>>, vector<16x32xf32>
    %1 = tpu.iota {dimensions = array<i32: 0>} : vector<16x16xi32>
    %2 = tpu.iota {dimensions = array<i32: 1>} : vector<16x16xi32>
    %c3_i32 = arith.constant 3 : i32
    %3 = vector.broadcast %c3_i32 : i32 to vector<16x16xi32>
    %4 = arith.shrui %1, %3 : vector<16x16xi32>
    %c3_i32_1 = arith.constant 3 : i32
    %5 = vector.broadcast %c3_i32_1 : i32 to vector<16x16xi32>
    %6 = arith.shrui %2, %5 : vector<16x16xi32>
    %7 = arith.cmpi eq, %4, %6 : vector<16x16xi32>
    %cst = arith.constant 0.000000e+00 : f32
    %cst_2 = arith.constant -1.000000e+30 : f32
    %8 = vector.broadcast %cst : f32 to vector<16x16xf32>
    %9 = vector.broadcast %cst_2 : f32 to vector<16x16xf32>
    %10 = arith.select %7, %8, %9 : vector<16x16xi1>, vector<16x16xf32>
    %c0_3 = arith.constant 0 : index
    %c0_4 = arith.constant 0 : index
    %c0_5 = arith.constant 0 : index
    %11 = vector.load %arg7[%c0_3, %c0_4, %c0_5] : memref<4x6x32xf32, #tpu.memory_space<vmem>>, vector<1x6x32xf32>
    %12 = vector.shape_cast %11 : vector<1x6x32xf32> to vector<6x32xf32>
    %13 = vector.extract_strided_slice %12 {offsets = [0, 0], sizes = [1, 32], strides = [1, 1]} : vector<6x32xf32> to vector<1x32xf32>
    %14 = vector.extract_strided_slice %12 {offsets = [1, 0], sizes = [1, 32], strides = [1, 1]} : vector<6x32xf32> to vector<1x32xf32>
    %15 = vector.extract_strided_slice %12 {offsets = [2, 0], sizes = [1, 32], strides = [1, 1]} : vector<6x32xf32> to vector<1x32xf32>
    %16 = vector.extract_strided_slice %12 {offsets = [3, 0], sizes = [1, 32], strides = [1, 1]} : vector<6x32xf32> to vector<1x32xf32>
    %17 = vector.extract_strided_slice %12 {offsets = [4, 0], sizes = [1, 32], strides = [1, 1]} : vector<6x32xf32> to vector<1x32xf32>
    %18 = vector.extract_strided_slice %12 {offsets = [5, 0], sizes = [1, 32], strides = [1, 1]} : vector<6x32xf32> to vector<1x32xf32>
    %cst_6 = arith.constant dense<0.000000e+00> : vector<16xf32>
    %19 = vector.multi_reduction <add>, %0, %cst_6 [1] : vector<16x32xf32> to vector<16xf32>
    %20 = vector.shape_cast %19 : vector<16xf32> to vector<16x1xf32>
    %cst_7 = arith.constant 3.200000e+01 : f32
    %21 = vector.broadcast %cst_7 : f32 to vector<16x1xf32>
    %22 = arith.divf %20, %21 : vector<16x1xf32>
    %23 = vector.broadcast %22 : vector<16x1xf32> to vector<16x32xf32>
    %24 = arith.subf %0, %23 : vector<16x32xf32>
    %25 = arith.mulf %24, %24 : vector<16x32xf32>
    %cst_8 = arith.constant dense<0.000000e+00> : vector<16xf32>
    %26 = vector.multi_reduction <add>, %25, %cst_8 [1] : vector<16x32xf32> to vector<16xf32>
    %27 = vector.shape_cast %26 : vector<16xf32> to vector<16x1xf32>
    %cst_9 = arith.constant 3.200000e+01 : f32
    %28 = vector.broadcast %cst_9 : f32 to vector<16x1xf32>
    %29 = arith.divf %27, %28 : vector<16x1xf32>
    %30 = vector.broadcast %22 : vector<16x1xf32> to vector<16x32xf32>
    %31 = arith.subf %0, %30 : vector<16x32xf32>
    %cst_10 = arith.constant 9.99999974E-6 : f32
    %32 = vector.broadcast %cst_10 : f32 to vector<16x1xf32>
    %33 = arith.addf %29, %32 : vector<16x1xf32>
    %34 = math.rsqrt %33 : vector<16x1xf32>
    %35 = vector.broadcast %34 : vector<16x1xf32> to vector<16x32xf32>
    %36 = arith.mulf %31, %35 : vector<16x32xf32>
    %37 = vector.broadcast %13 : vector<1x32xf32> to vector<16x32xf32>
    %38 = arith.mulf %36, %37 : vector<16x32xf32>
    %39 = vector.broadcast %14 : vector<1x32xf32> to vector<16x32xf32>
    %40 = arith.addf %38, %39 : vector<16x32xf32>
    %c0_11 = arith.constant 0 : index
    %c0_12 = arith.constant 0 : index
    %c0_13 = arith.constant 0 : index
    %41 = vector.load %arg1[%c0_11, %c0_12, %c0_13] : memref<4x32x96xf32, #tpu.memory_space<vmem>>, vector<1x32x96xf32>
    %42 = vector.shape_cast %41 : vector<1x32x96xf32> to vector<32x96xf32>
    %cst_14 = arith.constant dense<0.000000e+00> : vector<16x96xf32>
    %43 = tpu.matmul %40, %42, %cst_14 {dimension_numbers = #tpu.dot_dimension_numbers<[1], [0], [0], [1], [0, 0, 1, 1], [], []>} : vector<16x32xf32>, vector<32x96xf32>, vector<16x96xf32> -> vector<16x96xf32>
    %c0_15 = arith.constant 0 : index
    %c0_16 = arith.constant 0 : index
    %c0_17 = arith.constant 0 : index
    %44 = vector.load %arg2[%c0_15, %c0_16, %c0_17] : memref<4x1x96xf32, #tpu.memory_space<vmem>>, vector<1x1x96xf32>
    %45 = vector.shape_cast %44 : vector<1x1x96xf32> to vector<1x96xf32>
    %46 = vector.broadcast %45 : vector<1x96xf32> to vector<16x96xf32>
    %47 = arith.addf %43, %46 : vector<16x96xf32>
    %48 = vector.extract_strided_slice %47 {offsets = [0, 0], sizes = [16, 32], strides = [1, 1]} : vector<16x96xf32> to vector<16x32xf32>
    %49 = vector.extract_strided_slice %47 {offsets = [0, 32], sizes = [16, 32], strides = [1, 1]} : vector<16x96xf32> to vector<16x32xf32>
    %50 = vector.extract_strided_slice %47 {offsets = [0, 64], sizes = [16, 32], strides = [1, 1]} : vector<16x96xf32> to vector<16x32xf32>
    %c0_18 = arith.constant 0 : index
    %c0_19 = arith.constant 0 : index
    %c0_20 = arith.constant 0 : index
    %51 = vector.load %arg3[%c0_18, %c0_19, %c0_20] : memref<4x32x32xf32, #tpu.memory_space<vmem>>, vector<1x32x32xf32>
    %52 = vector.shape_cast %51 : vector<1x32x32xf32> to vector<32x32xf32>
    %cst_21 = arith.constant 0.000000e+00 : f32
    %53 = vector.broadcast %cst_21 : f32 to vector<16x32xf32>
    %54 = vector.extract_strided_slice %48 {offsets = [0, 0], sizes = [16, 8], strides = [1, 1]} : vector<16x32xf32> to vector<16x8xf32>
    %55 = vector.extract_strided_slice %49 {offsets = [0, 0], sizes = [16, 8], strides = [1, 1]} : vector<16x32xf32> to vector<16x8xf32>
    %cst_22 = arith.constant dense<0.000000e+00> : vector<16x16xf32>
    %56 = tpu.matmul %54, %55, %cst_22 {dimension_numbers = #tpu.dot_dimension_numbers<[1], [1], [0], [0], [0, 0, 1, 0], [], []>} : vector<16x8xf32>, vector<16x8xf32>, vector<16x16xf32> -> vector<16x16xf32>
    %cst_23 = arith.constant 0.353553385 : f32
    %57 = vector.broadcast %cst_23 : f32 to vector<16x16xf32>
    %58 = arith.mulf %56, %57 : vector<16x16xf32>
    %59 = arith.addf %58, %10 : vector<16x16xf32>
    %cst_24 = arith.constant dense<0xFF800000> : vector<16xf32>
    %60 = vector.multi_reduction <maximumf>, %59, %cst_24 [1] : vector<16x16xf32> to vector<16xf32>
    %61 = vector.shape_cast %60 : vector<16xf32> to vector<16x1xf32>
    %62 = vector.broadcast %61 : vector<16x1xf32> to vector<16x16xf32>
    %63 = arith.subf %59, %62 : vector<16x16xf32>
    %64 = math.exp %63 : vector<16x16xf32>
    %cst_25 = arith.constant dense<0.000000e+00> : vector<16xf32>
    %65 = vector.multi_reduction <add>, %64, %cst_25 [1] : vector<16x16xf32> to vector<16xf32>
    %66 = vector.shape_cast %65 : vector<16xf32> to vector<16x1xf32>
    %67 = vector.broadcast %66 : vector<16x1xf32> to vector<16x16xf32>
    %68 = arith.divf %64, %67 : vector<16x16xf32>
    %69 = vector.extract_strided_slice %50 {offsets = [0, 0], sizes = [16, 8], strides = [1, 1]} : vector<16x32xf32> to vector<16x8xf32>
    %cst_26 = arith.constant dense<0.000000e+00> : vector<16x8xf32>
    %70 = tpu.matmul %68, %69, %cst_26 {dimension_numbers = #tpu.dot_dimension_numbers<[1], [0], [0], [1], [0, 0, 1, 1], [], []>} : vector<16x16xf32>, vector<16x8xf32>, vector<16x8xf32> -> vector<16x8xf32>
    %71 = vector.extract_strided_slice %52 {offsets = [0, 0], sizes = [8, 32], strides = [1, 1]} : vector<32x32xf32> to vector<8x32xf32>
    %cst_27 = arith.constant dense<0.000000e+00> : vector<16x32xf32>
    %72 = tpu.matmul %70, %71, %cst_27 {dimension_numbers = #tpu.dot_dimension_numbers<[1], [0], [0], [1], [0, 0, 1, 1], [], []>} : vector<16x8xf32>, vector<8x32xf32>, vector<16x32xf32> -> vector<16x32xf32>
    %73 = arith.addf %53, %72 : vector<16x32xf32>
    %74 = vector.extract_strided_slice %48 {offsets = [0, 8], sizes = [16, 8], strides = [1, 1]} : vector<16x32xf32> to vector<16x8xf32>
    %75 = vector.extract_strided_slice %49 {offsets = [0, 8], sizes = [16, 8], strides = [1, 1]} : vector<16x32xf32> to vector<16x8xf32>
    %cst_28 = arith.constant dense<0.000000e+00> : vector<16x16xf32>
    %76 = tpu.matmul %74, %75, %cst_28 {dimension_numbers = #tpu.dot_dimension_numbers<[1], [1], [0], [0], [0, 0, 1, 0], [], []>} : vector<16x8xf32>, vector<16x8xf32>, vector<16x16xf32> -> vector<16x16xf32>
    %cst_29 = arith.constant 0.353553385 : f32
    %77 = vector.broadcast %cst_29 : f32 to vector<16x16xf32>
    %78 = arith.mulf %76, %77 : vector<16x16xf32>
    %79 = arith.addf %78, %10 : vector<16x16xf32>
    %cst_30 = arith.constant dense<0xFF800000> : vector<16xf32>
    %80 = vector.multi_reduction <maximumf>, %79, %cst_30 [1] : vector<16x16xf32> to vector<16xf32>
    %81 = vector.shape_cast %80 : vector<16xf32> to vector<16x1xf32>
    %82 = vector.broadcast %81 : vector<16x1xf32> to vector<16x16xf32>
    %83 = arith.subf %79, %82 : vector<16x16xf32>
    %84 = math.exp %83 : vector<16x16xf32>
    %cst_31 = arith.constant dense<0.000000e+00> : vector<16xf32>
    %85 = vector.multi_reduction <add>, %84, %cst_31 [1] : vector<16x16xf32> to vector<16xf32>
    %86 = vector.shape_cast %85 : vector<16xf32> to vector<16x1xf32>
    %87 = vector.broadcast %86 : vector<16x1xf32> to vector<16x16xf32>
    %88 = arith.divf %84, %87 : vector<16x16xf32>
    %89 = vector.extract_strided_slice %50 {offsets = [0, 8], sizes = [16, 8], strides = [1, 1]} : vector<16x32xf32> to vector<16x8xf32>
    %cst_32 = arith.constant dense<0.000000e+00> : vector<16x8xf32>
    %90 = tpu.matmul %88, %89, %cst_32 {dimension_numbers = #tpu.dot_dimension_numbers<[1], [0], [0], [1], [0, 0, 1, 1], [], []>} : vector<16x16xf32>, vector<16x8xf32>, vector<16x8xf32> -> vector<16x8xf32>
    %91 = vector.extract_strided_slice %52 {offsets = [8, 0], sizes = [8, 32], strides = [1, 1]} : vector<32x32xf32> to vector<8x32xf32>
    %cst_33 = arith.constant dense<0.000000e+00> : vector<16x32xf32>
    %92 = tpu.matmul %90, %91, %cst_33 {dimension_numbers = #tpu.dot_dimension_numbers<[1], [0], [0], [1], [0, 0, 1, 1], [], []>} : vector<16x8xf32>, vector<8x32xf32>, vector<16x32xf32> -> vector<16x32xf32>
    %93 = arith.addf %73, %92 : vector<16x32xf32>
    %94 = vector.extract_strided_slice %48 {offsets = [0, 16], sizes = [16, 8], strides = [1, 1]} : vector<16x32xf32> to vector<16x8xf32>
    %95 = vector.extract_strided_slice %49 {offsets = [0, 16], sizes = [16, 8], strides = [1, 1]} : vector<16x32xf32> to vector<16x8xf32>
    %cst_34 = arith.constant dense<0.000000e+00> : vector<16x16xf32>
    %96 = tpu.matmul %94, %95, %cst_34 {dimension_numbers = #tpu.dot_dimension_numbers<[1], [1], [0], [0], [0, 0, 1, 0], [], []>} : vector<16x8xf32>, vector<16x8xf32>, vector<16x16xf32> -> vector<16x16xf32>
    %cst_35 = arith.constant 0.353553385 : f32
    %97 = vector.broadcast %cst_35 : f32 to vector<16x16xf32>
    %98 = arith.mulf %96, %97 : vector<16x16xf32>
    %99 = arith.addf %98, %10 : vector<16x16xf32>
    %cst_36 = arith.constant dense<0xFF800000> : vector<16xf32>
    %100 = vector.multi_reduction <maximumf>, %99, %cst_36 [1] : vector<16x16xf32> to vector<16xf32>
    %101 = vector.shape_cast %100 : vector<16xf32> to vector<16x1xf32>
    %102 = vector.broadcast %101 : vector<16x1xf32> to vector<16x16xf32>
    %103 = arith.subf %99, %102 : vector<16x16xf32>
    %104 = math.exp %103 : vector<16x16xf32>
    %cst_37 = arith.constant dense<0.000000e+00> : vector<16xf32>
    %105 = vector.multi_reduction <add>, %104, %cst_37 [1] : vector<16x16xf32> to vector<16xf32>
    %106 = vector.shape_cast %105 : vector<16xf32> to vector<16x1xf32>
    %107 = vector.broadcast %106 : vector<16x1xf32> to vector<16x16xf32>
    %108 = arith.divf %104, %107 : vector<16x16xf32>
    %109 = vector.extract_strided_slice %50 {offsets = [0, 16], sizes = [16, 8], strides = [1, 1]} : vector<16x32xf32> to vector<16x8xf32>
    %cst_38 = arith.constant dense<0.000000e+00> : vector<16x8xf32>
    %110 = tpu.matmul %108, %109, %cst_38 {dimension_numbers = #tpu.dot_dimension_numbers<[1], [0], [0], [1], [0, 0, 1, 1], [], []>} : vector<16x16xf32>, vector<16x8xf32>, vector<16x8xf32> -> vector<16x8xf32>
    %111 = vector.extract_strided_slice %52 {offsets = [16, 0], sizes = [8, 32], strides = [1, 1]} : vector<32x32xf32> to vector<8x32xf32>
    %cst_39 = arith.constant dense<0.000000e+00> : vector<16x32xf32>
    %112 = tpu.matmul %110, %111, %cst_39 {dimension_numbers = #tpu.dot_dimension_numbers<[1], [0], [0], [1], [0, 0, 1, 1], [], []>} : vector<16x8xf32>, vector<8x32xf32>, vector<16x32xf32> -> vector<16x32xf32>
    %113 = arith.addf %93, %112 : vector<16x32xf32>
    %114 = vector.extract_strided_slice %48 {offsets = [0, 24], sizes = [16, 8], strides = [1, 1]} : vector<16x32xf32> to vector<16x8xf32>
    %115 = vector.extract_strided_slice %49 {offsets = [0, 24], sizes = [16, 8], strides = [1, 1]} : vector<16x32xf32> to vector<16x8xf32>
    %cst_40 = arith.constant dense<0.000000e+00> : vector<16x16xf32>
    %116 = tpu.matmul %114, %115, %cst_40 {dimension_numbers = #tpu.dot_dimension_numbers<[1], [1], [0], [0], [0, 0, 1, 0], [], []>} : vector<16x8xf32>, vector<16x8xf32>, vector<16x16xf32> -> vector<16x16xf32>
    %cst_41 = arith.constant 0.353553385 : f32
    %117 = vector.broadcast %cst_41 : f32 to vector<16x16xf32>
    %118 = arith.mulf %116, %117 : vector<16x16xf32>
    %119 = arith.addf %118, %10 : vector<16x16xf32>
    %cst_42 = arith.constant dense<0xFF800000> : vector<16xf32>
    %120 = vector.multi_reduction <maximumf>, %119, %cst_42 [1] : vector<16x16xf32> to vector<16xf32>
    %121 = vector.shape_cast %120 : vector<16xf32> to vector<16x1xf32>
    %122 = vector.broadcast %121 : vector<16x1xf32> to vector<16x16xf32>
    %123 = arith.subf %119, %122 : vector<16x16xf32>
    %124 = math.exp %123 : vector<16x16xf32>
    %cst_43 = arith.constant dense<0.000000e+00> : vector<16xf32>
    %125 = vector.multi_reduction <add>, %124, %cst_43 [1] : vector<16x16xf32> to vector<16xf32>
    %126 = vector.shape_cast %125 : vector<16xf32> to vector<16x1xf32>
    %127 = vector.broadcast %126 : vector<16x1xf32> to vector<16x16xf32>
    %128 = arith.divf %124, %127 : vector<16x16xf32>
    %129 = vector.extract_strided_slice %50 {offsets = [0, 24], sizes = [16, 8], strides = [1, 1]} : vector<16x32xf32> to vector<16x8xf32>
    %cst_44 = arith.constant dense<0.000000e+00> : vector<16x8xf32>
    %130 = tpu.matmul %128, %129, %cst_44 {dimension_numbers = #tpu.dot_dimension_numbers<[1], [0], [0], [1], [0, 0, 1, 1], [], []>} : vector<16x16xf32>, vector<16x8xf32>, vector<16x8xf32> -> vector<16x8xf32>
    %131 = vector.extract_strided_slice %52 {offsets = [24, 0], sizes = [8, 32], strides = [1, 1]} : vector<32x32xf32> to vector<8x32xf32>
    %cst_45 = arith.constant dense<0.000000e+00> : vector<16x32xf32>
    %132 = tpu.matmul %130, %131, %cst_45 {dimension_numbers = #tpu.dot_dimension_numbers<[1], [0], [0], [1], [0, 0, 1, 1], [], []>} : vector<16x8xf32>, vector<8x32xf32>, vector<16x32xf32> -> vector<16x32xf32>
    %133 = arith.addf %113, %132 : vector<16x32xf32>
    %134 = arith.addf %0, %133 : vector<16x32xf32>
    %135 = vector.broadcast %15 : vector<1x32xf32> to vector<16x32xf32>
    %136 = arith.addf %134, %135 : vector<16x32xf32>
    %cst_46 = arith.constant dense<0.000000e+00> : vector<16xf32>
    %137 = vector.multi_reduction <add>, %136, %cst_46 [1] : vector<16x32xf32> to vector<16xf32>
    %138 = vector.shape_cast %137 : vector<16xf32> to vector<16x1xf32>
    %cst_47 = arith.constant 3.200000e+01 : f32
    %139 = vector.broadcast %cst_47 : f32 to vector<16x1xf32>
    %140 = arith.divf %138, %139 : vector<16x1xf32>
    %141 = vector.broadcast %140 : vector<16x1xf32> to vector<16x32xf32>
    %142 = arith.subf %136, %141 : vector<16x32xf32>
    %143 = arith.mulf %142, %142 : vector<16x32xf32>
    %cst_48 = arith.constant dense<0.000000e+00> : vector<16xf32>
    %144 = vector.multi_reduction <add>, %143, %cst_48 [1] : vector<16x32xf32> to vector<16xf32>
    %145 = vector.shape_cast %144 : vector<16xf32> to vector<16x1xf32>
    %cst_49 = arith.constant 3.200000e+01 : f32
    %146 = vector.broadcast %cst_49 : f32 to vector<16x1xf32>
    %147 = arith.divf %145, %146 : vector<16x1xf32>
    %148 = vector.broadcast %140 : vector<16x1xf32> to vector<16x32xf32>
    %149 = arith.subf %136, %148 : vector<16x32xf32>
    %cst_50 = arith.constant 9.99999974E-6 : f32
    %150 = vector.broadcast %cst_50 : f32 to vector<16x1xf32>
    %151 = arith.addf %147, %150 : vector<16x1xf32>
    %152 = math.rsqrt %151 : vector<16x1xf32>
    %153 = vector.broadcast %152 : vector<16x1xf32> to vector<16x32xf32>
    %154 = arith.mulf %149, %153 : vector<16x32xf32>
    %155 = vector.broadcast %16 : vector<1x32xf32> to vector<16x32xf32>
    %156 = arith.mulf %154, %155 : vector<16x32xf32>
    %157 = vector.broadcast %17 : vector<1x32xf32> to vector<16x32xf32>
    %158 = arith.addf %156, %157 : vector<16x32xf32>
    %c0_51 = arith.constant 0 : index
    %c0_52 = arith.constant 0 : index
    %c0_53 = arith.constant 0 : index
    %159 = vector.load %arg4[%c0_51, %c0_52, %c0_53] : memref<4x32x64xf32, #tpu.memory_space<vmem>>, vector<1x32x64xf32>
    %160 = vector.shape_cast %159 : vector<1x32x64xf32> to vector<32x64xf32>
    %cst_54 = arith.constant dense<0.000000e+00> : vector<16x64xf32>
    %161 = tpu.matmul %158, %160, %cst_54 {dimension_numbers = #tpu.dot_dimension_numbers<[1], [0], [0], [1], [0, 0, 1, 1], [], []>} : vector<16x32xf32>, vector<32x64xf32>, vector<16x64xf32> -> vector<16x64xf32>
    %c0_55 = arith.constant 0 : index
    %c0_56 = arith.constant 0 : index
    %c0_57 = arith.constant 0 : index
    %162 = vector.load %arg5[%c0_55, %c0_56, %c0_57] : memref<4x1x64xf32, #tpu.memory_space<vmem>>, vector<1x1x64xf32>
    %163 = vector.shape_cast %162 : vector<1x1x64xf32> to vector<1x64xf32>
    %164 = vector.broadcast %163 : vector<1x64xf32> to vector<16x64xf32>
    %165 = arith.addf %161, %164 : vector<16x64xf32>
    %cst_58 = arith.constant 0.000000e+00 : f32
    %166 = vector.broadcast %cst_58 : f32 to vector<16x64xf32>
    %167 = arith.maximumf %165, %166 : vector<16x64xf32>
    %c0_59 = arith.constant 0 : index
    %c0_60 = arith.constant 0 : index
    %c0_61 = arith.constant 0 : index
    %168 = vector.load %arg6[%c0_59, %c0_60, %c0_61] : memref<4x64x32xf32, #tpu.memory_space<vmem>>, vector<1x64x32xf32>
    %169 = vector.shape_cast %168 : vector<1x64x32xf32> to vector<64x32xf32>
    %cst_62 = arith.constant dense<0.000000e+00> : vector<16x32xf32>
    %170 = tpu.matmul %167, %169, %cst_62 {dimension_numbers = #tpu.dot_dimension_numbers<[1], [0], [0], [1], [0, 0, 1, 1], [], []>} : vector<16x64xf32>, vector<64x32xf32>, vector<16x32xf32> -> vector<16x32xf32>
    %171 = arith.addf %136, %170 : vector<16x32xf32>
    %172 = vector.broadcast %18 : vector<1x32xf32> to vector<16x32xf32>
    %173 = arith.addf %171, %172 : vector<16x32xf32>
    %c1 = arith.constant 1 : index
    %c0_63 = arith.constant 0 : index
    %c0_64 = arith.constant 0 : index
    %174 = vector.load %arg7[%c1, %c0_63, %c0_64] : memref<4x6x32xf32, #tpu.memory_space<vmem>>, vector<1x6x32xf32>
    %175 = vector.shape_cast %174 : vector<1x6x32xf32> to vector<6x32xf32>
    %176 = vector.extract_strided_slice %175 {offsets = [0, 0], sizes = [1, 32], strides = [1, 1]} : vector<6x32xf32> to vector<1x32xf32>
    %177 = vector.extract_strided_slice %175 {offsets = [1, 0], sizes = [1, 32], strides = [1, 1]} : vector<6x32xf32> to vector<1x32xf32>
    %178 = vector.extract_strided_slice %175 {offsets = [2, 0], sizes = [1, 32], strides = [1, 1]} : vector<6x32xf32> to vector<1x32xf32>
    %179 = vector.extract_strided_slice %175 {offsets = [3, 0], sizes = [1, 32], strides = [1, 1]} : vector<6x32xf32> to vector<1x32xf32>
    %180 = vector.extract_strided_slice %175 {offsets = [4, 0], sizes = [1, 32], strides = [1, 1]} : vector<6x32xf32> to vector<1x32xf32>
    %181 = vector.extract_strided_slice %175 {offsets = [5, 0], sizes = [1, 32], strides = [1, 1]} : vector<6x32xf32> to vector<1x32xf32>
    %cst_65 = arith.constant dense<0.000000e+00> : vector<16xf32>
    %182 = vector.multi_reduction <add>, %173, %cst_65 [1] : vector<16x32xf32> to vector<16xf32>
    %183 = vector.shape_cast %182 : vector<16xf32> to vector<16x1xf32>
    %cst_66 = arith.constant 3.200000e+01 : f32
    %184 = vector.broadcast %cst_66 : f32 to vector<16x1xf32>
    %185 = arith.divf %183, %184 : vector<16x1xf32>
    %186 = vector.broadcast %185 : vector<16x1xf32> to vector<16x32xf32>
    %187 = arith.subf %173, %186 : vector<16x32xf32>
    %188 = arith.mulf %187, %187 : vector<16x32xf32>
    %cst_67 = arith.constant dense<0.000000e+00> : vector<16xf32>
    %189 = vector.multi_reduction <add>, %188, %cst_67 [1] : vector<16x32xf32> to vector<16xf32>
    %190 = vector.shape_cast %189 : vector<16xf32> to vector<16x1xf32>
    %cst_68 = arith.constant 3.200000e+01 : f32
    %191 = vector.broadcast %cst_68 : f32 to vector<16x1xf32>
    %192 = arith.divf %190, %191 : vector<16x1xf32>
    %193 = vector.broadcast %185 : vector<16x1xf32> to vector<16x32xf32>
    %194 = arith.subf %173, %193 : vector<16x32xf32>
    %cst_69 = arith.constant 9.99999974E-6 : f32
    %195 = vector.broadcast %cst_69 : f32 to vector<16x1xf32>
    %196 = arith.addf %192, %195 : vector<16x1xf32>
    %197 = math.rsqrt %196 : vector<16x1xf32>
    %198 = vector.broadcast %197 : vector<16x1xf32> to vector<16x32xf32>
    %199 = arith.mulf %194, %198 : vector<16x32xf32>
    %200 = vector.broadcast %176 : vector<1x32xf32> to vector<16x32xf32>
    %201 = arith.mulf %199, %200 : vector<16x32xf32>
    %202 = vector.broadcast %177 : vector<1x32xf32> to vector<16x32xf32>
    %203 = arith.addf %201, %202 : vector<16x32xf32>
    %c1_70 = arith.constant 1 : index
    %c0_71 = arith.constant 0 : index
    %c0_72 = arith.constant 0 : index
    %204 = vector.load %arg1[%c1_70, %c0_71, %c0_72] : memref<4x32x96xf32, #tpu.memory_space<vmem>>, vector<1x32x96xf32>
    %205 = vector.shape_cast %204 : vector<1x32x96xf32> to vector<32x96xf32>
    %cst_73 = arith.constant dense<0.000000e+00> : vector<16x96xf32>
    %206 = tpu.matmul %203, %205, %cst_73 {dimension_numbers = #tpu.dot_dimension_numbers<[1], [0], [0], [1], [0, 0, 1, 1], [], []>} : vector<16x32xf32>, vector<32x96xf32>, vector<16x96xf32> -> vector<16x96xf32>
    %c1_74 = arith.constant 1 : index
    %c0_75 = arith.constant 0 : index
    %c0_76 = arith.constant 0 : index
    %207 = vector.load %arg2[%c1_74, %c0_75, %c0_76] : memref<4x1x96xf32, #tpu.memory_space<vmem>>, vector<1x1x96xf32>
    %208 = vector.shape_cast %207 : vector<1x1x96xf32> to vector<1x96xf32>
    %209 = vector.broadcast %208 : vector<1x96xf32> to vector<16x96xf32>
    %210 = arith.addf %206, %209 : vector<16x96xf32>
    %211 = vector.extract_strided_slice %210 {offsets = [0, 0], sizes = [16, 32], strides = [1, 1]} : vector<16x96xf32> to vector<16x32xf32>
    %212 = vector.extract_strided_slice %210 {offsets = [0, 32], sizes = [16, 32], strides = [1, 1]} : vector<16x96xf32> to vector<16x32xf32>
    %213 = vector.extract_strided_slice %210 {offsets = [0, 64], sizes = [16, 32], strides = [1, 1]} : vector<16x96xf32> to vector<16x32xf32>
    %c1_77 = arith.constant 1 : index
    %c0_78 = arith.constant 0 : index
    %c0_79 = arith.constant 0 : index
    %214 = vector.load %arg3[%c1_77, %c0_78, %c0_79] : memref<4x32x32xf32, #tpu.memory_space<vmem>>, vector<1x32x32xf32>
    %215 = vector.shape_cast %214 : vector<1x32x32xf32> to vector<32x32xf32>
    %cst_80 = arith.constant 0.000000e+00 : f32
    %216 = vector.broadcast %cst_80 : f32 to vector<16x32xf32>
    %217 = vector.extract_strided_slice %211 {offsets = [0, 0], sizes = [16, 8], strides = [1, 1]} : vector<16x32xf32> to vector<16x8xf32>
    %218 = vector.extract_strided_slice %212 {offsets = [0, 0], sizes = [16, 8], strides = [1, 1]} : vector<16x32xf32> to vector<16x8xf32>
    %cst_81 = arith.constant dense<0.000000e+00> : vector<16x16xf32>
    %219 = tpu.matmul %217, %218, %cst_81 {dimension_numbers = #tpu.dot_dimension_numbers<[1], [1], [0], [0], [0, 0, 1, 0], [], []>} : vector<16x8xf32>, vector<16x8xf32>, vector<16x16xf32> -> vector<16x16xf32>
    %cst_82 = arith.constant 0.353553385 : f32
    %220 = vector.broadcast %cst_82 : f32 to vector<16x16xf32>
    %221 = arith.mulf %219, %220 : vector<16x16xf32>
    %222 = arith.addf %221, %10 : vector<16x16xf32>
    %cst_83 = arith.constant dense<0xFF800000> : vector<16xf32>
    %223 = vector.multi_reduction <maximumf>, %222, %cst_83 [1] : vector<16x16xf32> to vector<16xf32>
    %224 = vector.shape_cast %223 : vector<16xf32> to vector<16x1xf32>
    %225 = vector.broadcast %224 : vector<16x1xf32> to vector<16x16xf32>
    %226 = arith.subf %222, %225 : vector<16x16xf32>
    %227 = math.exp %226 : vector<16x16xf32>
    %cst_84 = arith.constant dense<0.000000e+00> : vector<16xf32>
    %228 = vector.multi_reduction <add>, %227, %cst_84 [1] : vector<16x16xf32> to vector<16xf32>
    %229 = vector.shape_cast %228 : vector<16xf32> to vector<16x1xf32>
    %230 = vector.broadcast %229 : vector<16x1xf32> to vector<16x16xf32>
    %231 = arith.divf %227, %230 : vector<16x16xf32>
    %232 = vector.extract_strided_slice %213 {offsets = [0, 0], sizes = [16, 8], strides = [1, 1]} : vector<16x32xf32> to vector<16x8xf32>
    %cst_85 = arith.constant dense<0.000000e+00> : vector<16x8xf32>
    %233 = tpu.matmul %231, %232, %cst_85 {dimension_numbers = #tpu.dot_dimension_numbers<[1], [0], [0], [1], [0, 0, 1, 1], [], []>} : vector<16x16xf32>, vector<16x8xf32>, vector<16x8xf32> -> vector<16x8xf32>
    %234 = vector.extract_strided_slice %215 {offsets = [0, 0], sizes = [8, 32], strides = [1, 1]} : vector<32x32xf32> to vector<8x32xf32>
    %cst_86 = arith.constant dense<0.000000e+00> : vector<16x32xf32>
    %235 = tpu.matmul %233, %234, %cst_86 {dimension_numbers = #tpu.dot_dimension_numbers<[1], [0], [0], [1], [0, 0, 1, 1], [], []>} : vector<16x8xf32>, vector<8x32xf32>, vector<16x32xf32> -> vector<16x32xf32>
    %236 = arith.addf %216, %235 : vector<16x32xf32>
    %237 = vector.extract_strided_slice %211 {offsets = [0, 8], sizes = [16, 8], strides = [1, 1]} : vector<16x32xf32> to vector<16x8xf32>
    %238 = vector.extract_strided_slice %212 {offsets = [0, 8], sizes = [16, 8], strides = [1, 1]} : vector<16x32xf32> to vector<16x8xf32>
    %cst_87 = arith.constant dense<0.000000e+00> : vector<16x16xf32>
    %239 = tpu.matmul %237, %238, %cst_87 {dimension_numbers = #tpu.dot_dimension_numbers<[1], [1], [0], [0], [0, 0, 1, 0], [], []>} : vector<16x8xf32>, vector<16x8xf32>, vector<16x16xf32> -> vector<16x16xf32>
    %cst_88 = arith.constant 0.353553385 : f32
    %240 = vector.broadcast %cst_88 : f32 to vector<16x16xf32>
    %241 = arith.mulf %239, %240 : vector<16x16xf32>
    %242 = arith.addf %241, %10 : vector<16x16xf32>
    %cst_89 = arith.constant dense<0xFF800000> : vector<16xf32>
    %243 = vector.multi_reduction <maximumf>, %242, %cst_89 [1] : vector<16x16xf32> to vector<16xf32>
    %244 = vector.shape_cast %243 : vector<16xf32> to vector<16x1xf32>
    %245 = vector.broadcast %244 : vector<16x1xf32> to vector<16x16xf32>
    %246 = arith.subf %242, %245 : vector<16x16xf32>
    %247 = math.exp %246 : vector<16x16xf32>
    %cst_90 = arith.constant dense<0.000000e+00> : vector<16xf32>
    %248 = vector.multi_reduction <add>, %247, %cst_90 [1] : vector<16x16xf32> to vector<16xf32>
    %249 = vector.shape_cast %248 : vector<16xf32> to vector<16x1xf32>
    %250 = vector.broadcast %249 : vector<16x1xf32> to vector<16x16xf32>
    %251 = arith.divf %247, %250 : vector<16x16xf32>
    %252 = vector.extract_strided_slice %213 {offsets = [0, 8], sizes = [16, 8], strides = [1, 1]} : vector<16x32xf32> to vector<16x8xf32>
    %cst_91 = arith.constant dense<0.000000e+00> : vector<16x8xf32>
    %253 = tpu.matmul %251, %252, %cst_91 {dimension_numbers = #tpu.dot_dimension_numbers<[1], [0], [0], [1], [0, 0, 1, 1], [], []>} : vector<16x16xf32>, vector<16x8xf32>, vector<16x8xf32> -> vector<16x8xf32>
    %254 = vector.extract_strided_slice %215 {offsets = [8, 0], sizes = [8, 32], strides = [1, 1]} : vector<32x32xf32> to vector<8x32xf32>
    %cst_92 = arith.constant dense<0.000000e+00> : vector<16x32xf32>
    %255 = tpu.matmul %253, %254, %cst_92 {dimension_numbers = #tpu.dot_dimension_numbers<[1], [0], [0], [1], [0, 0, 1, 1], [], []>} : vector<16x8xf32>, vector<8x32xf32>, vector<16x32xf32> -> vector<16x32xf32>
    %256 = arith.addf %236, %255 : vector<16x32xf32>
    %257 = vector.extract_strided_slice %211 {offsets = [0, 16], sizes = [16, 8], strides = [1, 1]} : vector<16x32xf32> to vector<16x8xf32>
    %258 = vector.extract_strided_slice %212 {offsets = [0, 16], sizes = [16, 8], strides = [1, 1]} : vector<16x32xf32> to vector<16x8xf32>
    %cst_93 = arith.constant dense<0.000000e+00> : vector<16x16xf32>
    %259 = tpu.matmul %257, %258, %cst_93 {dimension_numbers = #tpu.dot_dimension_numbers<[1], [1], [0], [0], [0, 0, 1, 0], [], []>} : vector<16x8xf32>, vector<16x8xf32>, vector<16x16xf32> -> vector<16x16xf32>
    %cst_94 = arith.constant 0.353553385 : f32
    %260 = vector.broadcast %cst_94 : f32 to vector<16x16xf32>
    %261 = arith.mulf %259, %260 : vector<16x16xf32>
    %262 = arith.addf %261, %10 : vector<16x16xf32>
    %cst_95 = arith.constant dense<0xFF800000> : vector<16xf32>
    %263 = vector.multi_reduction <maximumf>, %262, %cst_95 [1] : vector<16x16xf32> to vector<16xf32>
    %264 = vector.shape_cast %263 : vector<16xf32> to vector<16x1xf32>
    %265 = vector.broadcast %264 : vector<16x1xf32> to vector<16x16xf32>
    %266 = arith.subf %262, %265 : vector<16x16xf32>
    %267 = math.exp %266 : vector<16x16xf32>
    %cst_96 = arith.constant dense<0.000000e+00> : vector<16xf32>
    %268 = vector.multi_reduction <add>, %267, %cst_96 [1] : vector<16x16xf32> to vector<16xf32>
    %269 = vector.shape_cast %268 : vector<16xf32> to vector<16x1xf32>
    %270 = vector.broadcast %269 : vector<16x1xf32> to vector<16x16xf32>
    %271 = arith.divf %267, %270 : vector<16x16xf32>
    %272 = vector.extract_strided_slice %213 {offsets = [0, 16], sizes = [16, 8], strides = [1, 1]} : vector<16x32xf32> to vector<16x8xf32>
    %cst_97 = arith.constant dense<0.000000e+00> : vector<16x8xf32>
    %273 = tpu.matmul %271, %272, %cst_97 {dimension_numbers = #tpu.dot_dimension_numbers<[1], [0], [0], [1], [0, 0, 1, 1], [], []>} : vector<16x16xf32>, vector<16x8xf32>, vector<16x8xf32> -> vector<16x8xf32>
    %274 = vector.extract_strided_slice %215 {offsets = [16, 0], sizes = [8, 32], strides = [1, 1]} : vector<32x32xf32> to vector<8x32xf32>
    %cst_98 = arith.constant dense<0.000000e+00> : vector<16x32xf32>
    %275 = tpu.matmul %273, %274, %cst_98 {dimension_numbers = #tpu.dot_dimension_numbers<[1], [0], [0], [1], [0, 0, 1, 1], [], []>} : vector<16x8xf32>, vector<8x32xf32>, vector<16x32xf32> -> vector<16x32xf32>
    %276 = arith.addf %256, %275 : vector<16x32xf32>
    %277 = vector.extract_strided_slice %211 {offsets = [0, 24], sizes = [16, 8], strides = [1, 1]} : vector<16x32xf32> to vector<16x8xf32>
    %278 = vector.extract_strided_slice %212 {offsets = [0, 24], sizes = [16, 8], strides = [1, 1]} : vector<16x32xf32> to vector<16x8xf32>
    %cst_99 = arith.constant dense<0.000000e+00> : vector<16x16xf32>
    %279 = tpu.matmul %277, %278, %cst_99 {dimension_numbers = #tpu.dot_dimension_numbers<[1], [1], [0], [0], [0, 0, 1, 0], [], []>} : vector<16x8xf32>, vector<16x8xf32>, vector<16x16xf32> -> vector<16x16xf32>
    %cst_100 = arith.constant 0.353553385 : f32
    %280 = vector.broadcast %cst_100 : f32 to vector<16x16xf32>
    %281 = arith.mulf %279, %280 : vector<16x16xf32>
    %282 = arith.addf %281, %10 : vector<16x16xf32>
    %cst_101 = arith.constant dense<0xFF800000> : vector<16xf32>
    %283 = vector.multi_reduction <maximumf>, %282, %cst_101 [1] : vector<16x16xf32> to vector<16xf32>
    %284 = vector.shape_cast %283 : vector<16xf32> to vector<16x1xf32>
    %285 = vector.broadcast %284 : vector<16x1xf32> to vector<16x16xf32>
    %286 = arith.subf %282, %285 : vector<16x16xf32>
    %287 = math.exp %286 : vector<16x16xf32>
    %cst_102 = arith.constant dense<0.000000e+00> : vector<16xf32>
    %288 = vector.multi_reduction <add>, %287, %cst_102 [1] : vector<16x16xf32> to vector<16xf32>
    %289 = vector.shape_cast %288 : vector<16xf32> to vector<16x1xf32>
    %290 = vector.broadcast %289 : vector<16x1xf32> to vector<16x16xf32>
    %291 = arith.divf %287, %290 : vector<16x16xf32>
    %292 = vector.extract_strided_slice %213 {offsets = [0, 24], sizes = [16, 8], strides = [1, 1]} : vector<16x32xf32> to vector<16x8xf32>
    %cst_103 = arith.constant dense<0.000000e+00> : vector<16x8xf32>
    %293 = tpu.matmul %291, %292, %cst_103 {dimension_numbers = #tpu.dot_dimension_numbers<[1], [0], [0], [1], [0, 0, 1, 1], [], []>} : vector<16x16xf32>, vector<16x8xf32>, vector<16x8xf32> -> vector<16x8xf32>
    %294 = vector.extract_strided_slice %215 {offsets = [24, 0], sizes = [8, 32], strides = [1, 1]} : vector<32x32xf32> to vector<8x32xf32>
    %cst_104 = arith.constant dense<0.000000e+00> : vector<16x32xf32>
    %295 = tpu.matmul %293, %294, %cst_104 {dimension_numbers = #tpu.dot_dimension_numbers<[1], [0], [0], [1], [0, 0, 1, 1], [], []>} : vector<16x8xf32>, vector<8x32xf32>, vector<16x32xf32> -> vector<16x32xf32>
    %296 = arith.addf %276, %295 : vector<16x32xf32>
    %297 = arith.addf %173, %296 : vector<16x32xf32>
    %298 = vector.broadcast %178 : vector<1x32xf32> to vector<16x32xf32>
    %299 = arith.addf %297, %298 : vector<16x32xf32>
    %cst_105 = arith.constant dense<0.000000e+00> : vector<16xf32>
    %300 = vector.multi_reduction <add>, %299, %cst_105 [1] : vector<16x32xf32> to vector<16xf32>
    %301 = vector.shape_cast %300 : vector<16xf32> to vector<16x1xf32>
    %cst_106 = arith.constant 3.200000e+01 : f32
    %302 = vector.broadcast %cst_106 : f32 to vector<16x1xf32>
    %303 = arith.divf %301, %302 : vector<16x1xf32>
    %304 = vector.broadcast %303 : vector<16x1xf32> to vector<16x32xf32>
    %305 = arith.subf %299, %304 : vector<16x32xf32>
    %306 = arith.mulf %305, %305 : vector<16x32xf32>
    %cst_107 = arith.constant dense<0.000000e+00> : vector<16xf32>
    %307 = vector.multi_reduction <add>, %306, %cst_107 [1] : vector<16x32xf32> to vector<16xf32>
    %308 = vector.shape_cast %307 : vector<16xf32> to vector<16x1xf32>
    %cst_108 = arith.constant 3.200000e+01 : f32
    %309 = vector.broadcast %cst_108 : f32 to vector<16x1xf32>
    %310 = arith.divf %308, %309 : vector<16x1xf32>
    %311 = vector.broadcast %303 : vector<16x1xf32> to vector<16x32xf32>
    %312 = arith.subf %299, %311 : vector<16x32xf32>
    %cst_109 = arith.constant 9.99999974E-6 : f32
    %313 = vector.broadcast %cst_109 : f32 to vector<16x1xf32>
    %314 = arith.addf %310, %313 : vector<16x1xf32>
    %315 = math.rsqrt %314 : vector<16x1xf32>
    %316 = vector.broadcast %315 : vector<16x1xf32> to vector<16x32xf32>
    %317 = arith.mulf %312, %316 : vector<16x32xf32>
    %318 = vector.broadcast %179 : vector<1x32xf32> to vector<16x32xf32>
    %319 = arith.mulf %317, %318 : vector<16x32xf32>
    %320 = vector.broadcast %180 : vector<1x32xf32> to vector<16x32xf32>
    %321 = arith.addf %319, %320 : vector<16x32xf32>
    %c1_110 = arith.constant 1 : index
    %c0_111 = arith.constant 0 : index
    %c0_112 = arith.constant 0 : index
    %322 = vector.load %arg4[%c1_110, %c0_111, %c0_112] : memref<4x32x64xf32, #tpu.memory_space<vmem>>, vector<1x32x64xf32>
    %323 = vector.shape_cast %322 : vector<1x32x64xf32> to vector<32x64xf32>
    %cst_113 = arith.constant dense<0.000000e+00> : vector<16x64xf32>
    %324 = tpu.matmul %321, %323, %cst_113 {dimension_numbers = #tpu.dot_dimension_numbers<[1], [0], [0], [1], [0, 0, 1, 1], [], []>} : vector<16x32xf32>, vector<32x64xf32>, vector<16x64xf32> -> vector<16x64xf32>
    %c1_114 = arith.constant 1 : index
    %c0_115 = arith.constant 0 : index
    %c0_116 = arith.constant 0 : index
    %325 = vector.load %arg5[%c1_114, %c0_115, %c0_116] : memref<4x1x64xf32, #tpu.memory_space<vmem>>, vector<1x1x64xf32>
    %326 = vector.shape_cast %325 : vector<1x1x64xf32> to vector<1x64xf32>
    %327 = vector.broadcast %326 : vector<1x64xf32> to vector<16x64xf32>
    %328 = arith.addf %324, %327 : vector<16x64xf32>
    %cst_117 = arith.constant 0.000000e+00 : f32
    %329 = vector.broadcast %cst_117 : f32 to vector<16x64xf32>
    %330 = arith.maximumf %328, %329 : vector<16x64xf32>
    %c1_118 = arith.constant 1 : index
    %c0_119 = arith.constant 0 : index
    %c0_120 = arith.constant 0 : index
    %331 = vector.load %arg6[%c1_118, %c0_119, %c0_120] : memref<4x64x32xf32, #tpu.memory_space<vmem>>, vector<1x64x32xf32>
    %332 = vector.shape_cast %331 : vector<1x64x32xf32> to vector<64x32xf32>
    %cst_121 = arith.constant dense<0.000000e+00> : vector<16x32xf32>
    %333 = tpu.matmul %330, %332, %cst_121 {dimension_numbers = #tpu.dot_dimension_numbers<[1], [0], [0], [1], [0, 0, 1, 1], [], []>} : vector<16x64xf32>, vector<64x32xf32>, vector<16x32xf32> -> vector<16x32xf32>
    %334 = arith.addf %299, %333 : vector<16x32xf32>
    %335 = vector.broadcast %181 : vector<1x32xf32> to vector<16x32xf32>
    %336 = arith.addf %334, %335 : vector<16x32xf32>
    %c2 = arith.constant 2 : index
    %c0_122 = arith.constant 0 : index
    %c0_123 = arith.constant 0 : index
    %337 = vector.load %arg7[%c2, %c0_122, %c0_123] : memref<4x6x32xf32, #tpu.memory_space<vmem>>, vector<1x6x32xf32>
    %338 = vector.shape_cast %337 : vector<1x6x32xf32> to vector<6x32xf32>
    %339 = vector.extract_strided_slice %338 {offsets = [0, 0], sizes = [1, 32], strides = [1, 1]} : vector<6x32xf32> to vector<1x32xf32>
    %340 = vector.extract_strided_slice %338 {offsets = [1, 0], sizes = [1, 32], strides = [1, 1]} : vector<6x32xf32> to vector<1x32xf32>
    %341 = vector.extract_strided_slice %338 {offsets = [2, 0], sizes = [1, 32], strides = [1, 1]} : vector<6x32xf32> to vector<1x32xf32>
    %342 = vector.extract_strided_slice %338 {offsets = [3, 0], sizes = [1, 32], strides = [1, 1]} : vector<6x32xf32> to vector<1x32xf32>
    %343 = vector.extract_strided_slice %338 {offsets = [4, 0], sizes = [1, 32], strides = [1, 1]} : vector<6x32xf32> to vector<1x32xf32>
    %344 = vector.extract_strided_slice %338 {offsets = [5, 0], sizes = [1, 32], strides = [1, 1]} : vector<6x32xf32> to vector<1x32xf32>
    %cst_124 = arith.constant dense<0.000000e+00> : vector<16xf32>
    %345 = vector.multi_reduction <add>, %336, %cst_124 [1] : vector<16x32xf32> to vector<16xf32>
    %346 = vector.shape_cast %345 : vector<16xf32> to vector<16x1xf32>
    %cst_125 = arith.constant 3.200000e+01 : f32
    %347 = vector.broadcast %cst_125 : f32 to vector<16x1xf32>
    %348 = arith.divf %346, %347 : vector<16x1xf32>
    %349 = vector.broadcast %348 : vector<16x1xf32> to vector<16x32xf32>
    %350 = arith.subf %336, %349 : vector<16x32xf32>
    %351 = arith.mulf %350, %350 : vector<16x32xf32>
    %cst_126 = arith.constant dense<0.000000e+00> : vector<16xf32>
    %352 = vector.multi_reduction <add>, %351, %cst_126 [1] : vector<16x32xf32> to vector<16xf32>
    %353 = vector.shape_cast %352 : vector<16xf32> to vector<16x1xf32>
    %cst_127 = arith.constant 3.200000e+01 : f32
    %354 = vector.broadcast %cst_127 : f32 to vector<16x1xf32>
    %355 = arith.divf %353, %354 : vector<16x1xf32>
    %356 = vector.broadcast %348 : vector<16x1xf32> to vector<16x32xf32>
    %357 = arith.subf %336, %356 : vector<16x32xf32>
    %cst_128 = arith.constant 9.99999974E-6 : f32
    %358 = vector.broadcast %cst_128 : f32 to vector<16x1xf32>
    %359 = arith.addf %355, %358 : vector<16x1xf32>
    %360 = math.rsqrt %359 : vector<16x1xf32>
    %361 = vector.broadcast %360 : vector<16x1xf32> to vector<16x32xf32>
    %362 = arith.mulf %357, %361 : vector<16x32xf32>
    %363 = vector.broadcast %339 : vector<1x32xf32> to vector<16x32xf32>
    %364 = arith.mulf %362, %363 : vector<16x32xf32>
    %365 = vector.broadcast %340 : vector<1x32xf32> to vector<16x32xf32>
    %366 = arith.addf %364, %365 : vector<16x32xf32>
    %c2_129 = arith.constant 2 : index
    %c0_130 = arith.constant 0 : index
    %c0_131 = arith.constant 0 : index
    %367 = vector.load %arg1[%c2_129, %c0_130, %c0_131] : memref<4x32x96xf32, #tpu.memory_space<vmem>>, vector<1x32x96xf32>
    %368 = vector.shape_cast %367 : vector<1x32x96xf32> to vector<32x96xf32>
    %cst_132 = arith.constant dense<0.000000e+00> : vector<16x96xf32>
    %369 = tpu.matmul %366, %368, %cst_132 {dimension_numbers = #tpu.dot_dimension_numbers<[1], [0], [0], [1], [0, 0, 1, 1], [], []>} : vector<16x32xf32>, vector<32x96xf32>, vector<16x96xf32> -> vector<16x96xf32>
    %c2_133 = arith.constant 2 : index
    %c0_134 = arith.constant 0 : index
    %c0_135 = arith.constant 0 : index
    %370 = vector.load %arg2[%c2_133, %c0_134, %c0_135] : memref<4x1x96xf32, #tpu.memory_space<vmem>>, vector<1x1x96xf32>
    %371 = vector.shape_cast %370 : vector<1x1x96xf32> to vector<1x96xf32>
    %372 = vector.broadcast %371 : vector<1x96xf32> to vector<16x96xf32>
    %373 = arith.addf %369, %372 : vector<16x96xf32>
    %374 = vector.extract_strided_slice %373 {offsets = [0, 0], sizes = [16, 32], strides = [1, 1]} : vector<16x96xf32> to vector<16x32xf32>
    %375 = vector.extract_strided_slice %373 {offsets = [0, 32], sizes = [16, 32], strides = [1, 1]} : vector<16x96xf32> to vector<16x32xf32>
    %376 = vector.extract_strided_slice %373 {offsets = [0, 64], sizes = [16, 32], strides = [1, 1]} : vector<16x96xf32> to vector<16x32xf32>
    %c2_136 = arith.constant 2 : index
    %c0_137 = arith.constant 0 : index
    %c0_138 = arith.constant 0 : index
    %377 = vector.load %arg3[%c2_136, %c0_137, %c0_138] : memref<4x32x32xf32, #tpu.memory_space<vmem>>, vector<1x32x32xf32>
    %378 = vector.shape_cast %377 : vector<1x32x32xf32> to vector<32x32xf32>
    %cst_139 = arith.constant 0.000000e+00 : f32
    %379 = vector.broadcast %cst_139 : f32 to vector<16x32xf32>
    %380 = vector.extract_strided_slice %374 {offsets = [0, 0], sizes = [16, 8], strides = [1, 1]} : vector<16x32xf32> to vector<16x8xf32>
    %381 = vector.extract_strided_slice %375 {offsets = [0, 0], sizes = [16, 8], strides = [1, 1]} : vector<16x32xf32> to vector<16x8xf32>
    %cst_140 = arith.constant dense<0.000000e+00> : vector<16x16xf32>
    %382 = tpu.matmul %380, %381, %cst_140 {dimension_numbers = #tpu.dot_dimension_numbers<[1], [1], [0], [0], [0, 0, 1, 0], [], []>} : vector<16x8xf32>, vector<16x8xf32>, vector<16x16xf32> -> vector<16x16xf32>
    %cst_141 = arith.constant 0.353553385 : f32
    %383 = vector.broadcast %cst_141 : f32 to vector<16x16xf32>
    %384 = arith.mulf %382, %383 : vector<16x16xf32>
    %385 = arith.addf %384, %10 : vector<16x16xf32>
    %cst_142 = arith.constant dense<0xFF800000> : vector<16xf32>
    %386 = vector.multi_reduction <maximumf>, %385, %cst_142 [1] : vector<16x16xf32> to vector<16xf32>
    %387 = vector.shape_cast %386 : vector<16xf32> to vector<16x1xf32>
    %388 = vector.broadcast %387 : vector<16x1xf32> to vector<16x16xf32>
    %389 = arith.subf %385, %388 : vector<16x16xf32>
    %390 = math.exp %389 : vector<16x16xf32>
    %cst_143 = arith.constant dense<0.000000e+00> : vector<16xf32>
    %391 = vector.multi_reduction <add>, %390, %cst_143 [1] : vector<16x16xf32> to vector<16xf32>
    %392 = vector.shape_cast %391 : vector<16xf32> to vector<16x1xf32>
    %393 = vector.broadcast %392 : vector<16x1xf32> to vector<16x16xf32>
    %394 = arith.divf %390, %393 : vector<16x16xf32>
    %395 = vector.extract_strided_slice %376 {offsets = [0, 0], sizes = [16, 8], strides = [1, 1]} : vector<16x32xf32> to vector<16x8xf32>
    %cst_144 = arith.constant dense<0.000000e+00> : vector<16x8xf32>
    %396 = tpu.matmul %394, %395, %cst_144 {dimension_numbers = #tpu.dot_dimension_numbers<[1], [0], [0], [1], [0, 0, 1, 1], [], []>} : vector<16x16xf32>, vector<16x8xf32>, vector<16x8xf32> -> vector<16x8xf32>
    %397 = vector.extract_strided_slice %378 {offsets = [0, 0], sizes = [8, 32], strides = [1, 1]} : vector<32x32xf32> to vector<8x32xf32>
    %cst_145 = arith.constant dense<0.000000e+00> : vector<16x32xf32>
    %398 = tpu.matmul %396, %397, %cst_145 {dimension_numbers = #tpu.dot_dimension_numbers<[1], [0], [0], [1], [0, 0, 1, 1], [], []>} : vector<16x8xf32>, vector<8x32xf32>, vector<16x32xf32> -> vector<16x32xf32>
    %399 = arith.addf %379, %398 : vector<16x32xf32>
    %400 = vector.extract_strided_slice %374 {offsets = [0, 8], sizes = [16, 8], strides = [1, 1]} : vector<16x32xf32> to vector<16x8xf32>
    %401 = vector.extract_strided_slice %375 {offsets = [0, 8], sizes = [16, 8], strides = [1, 1]} : vector<16x32xf32> to vector<16x8xf32>
    %cst_146 = arith.constant dense<0.000000e+00> : vector<16x16xf32>
    %402 = tpu.matmul %400, %401, %cst_146 {dimension_numbers = #tpu.dot_dimension_numbers<[1], [1], [0], [0], [0, 0, 1, 0], [], []>} : vector<16x8xf32>, vector<16x8xf32>, vector<16x16xf32> -> vector<16x16xf32>
    %cst_147 = arith.constant 0.353553385 : f32
    %403 = vector.broadcast %cst_147 : f32 to vector<16x16xf32>
    %404 = arith.mulf %402, %403 : vector<16x16xf32>
    %405 = arith.addf %404, %10 : vector<16x16xf32>
    %cst_148 = arith.constant dense<0xFF800000> : vector<16xf32>
    %406 = vector.multi_reduction <maximumf>, %405, %cst_148 [1] : vector<16x16xf32> to vector<16xf32>
    %407 = vector.shape_cast %406 : vector<16xf32> to vector<16x1xf32>
    %408 = vector.broadcast %407 : vector<16x1xf32> to vector<16x16xf32>
    %409 = arith.subf %405, %408 : vector<16x16xf32>
    %410 = math.exp %409 : vector<16x16xf32>
    %cst_149 = arith.constant dense<0.000000e+00> : vector<16xf32>
    %411 = vector.multi_reduction <add>, %410, %cst_149 [1] : vector<16x16xf32> to vector<16xf32>
    %412 = vector.shape_cast %411 : vector<16xf32> to vector<16x1xf32>
    %413 = vector.broadcast %412 : vector<16x1xf32> to vector<16x16xf32>
    %414 = arith.divf %410, %413 : vector<16x16xf32>
    %415 = vector.extract_strided_slice %376 {offsets = [0, 8], sizes = [16, 8], strides = [1, 1]} : vector<16x32xf32> to vector<16x8xf32>
    %cst_150 = arith.constant dense<0.000000e+00> : vector<16x8xf32>
    %416 = tpu.matmul %414, %415, %cst_150 {dimension_numbers = #tpu.dot_dimension_numbers<[1], [0], [0], [1], [0, 0, 1, 1], [], []>} : vector<16x16xf32>, vector<16x8xf32>, vector<16x8xf32> -> vector<16x8xf32>
    %417 = vector.extract_strided_slice %378 {offsets = [8, 0], sizes = [8, 32], strides = [1, 1]} : vector<32x32xf32> to vector<8x32xf32>
    %cst_151 = arith.constant dense<0.000000e+00> : vector<16x32xf32>
    %418 = tpu.matmul %416, %417, %cst_151 {dimension_numbers = #tpu.dot_dimension_numbers<[1], [0], [0], [1], [0, 0, 1, 1], [], []>} : vector<16x8xf32>, vector<8x32xf32>, vector<16x32xf32> -> vector<16x32xf32>
    %419 = arith.addf %399, %418 : vector<16x32xf32>
    %420 = vector.extract_strided_slice %374 {offsets = [0, 16], sizes = [16, 8], strides = [1, 1]} : vector<16x32xf32> to vector<16x8xf32>
    %421 = vector.extract_strided_slice %375 {offsets = [0, 16], sizes = [16, 8], strides = [1, 1]} : vector<16x32xf32> to vector<16x8xf32>
    %cst_152 = arith.constant dense<0.000000e+00> : vector<16x16xf32>
    %422 = tpu.matmul %420, %421, %cst_152 {dimension_numbers = #tpu.dot_dimension_numbers<[1], [1], [0], [0], [0, 0, 1, 0], [], []>} : vector<16x8xf32>, vector<16x8xf32>, vector<16x16xf32> -> vector<16x16xf32>
    %cst_153 = arith.constant 0.353553385 : f32
    %423 = vector.broadcast %cst_153 : f32 to vector<16x16xf32>
    %424 = arith.mulf %422, %423 : vector<16x16xf32>
    %425 = arith.addf %424, %10 : vector<16x16xf32>
    %cst_154 = arith.constant dense<0xFF800000> : vector<16xf32>
    %426 = vector.multi_reduction <maximumf>, %425, %cst_154 [1] : vector<16x16xf32> to vector<16xf32>
    %427 = vector.shape_cast %426 : vector<16xf32> to vector<16x1xf32>
    %428 = vector.broadcast %427 : vector<16x1xf32> to vector<16x16xf32>
    %429 = arith.subf %425, %428 : vector<16x16xf32>
    %430 = math.exp %429 : vector<16x16xf32>
    %cst_155 = arith.constant dense<0.000000e+00> : vector<16xf32>
    %431 = vector.multi_reduction <add>, %430, %cst_155 [1] : vector<16x16xf32> to vector<16xf32>
    %432 = vector.shape_cast %431 : vector<16xf32> to vector<16x1xf32>
    %433 = vector.broadcast %432 : vector<16x1xf32> to vector<16x16xf32>
    %434 = arith.divf %430, %433 : vector<16x16xf32>
    %435 = vector.extract_strided_slice %376 {offsets = [0, 16], sizes = [16, 8], strides = [1, 1]} : vector<16x32xf32> to vector<16x8xf32>
    %cst_156 = arith.constant dense<0.000000e+00> : vector<16x8xf32>
    %436 = tpu.matmul %434, %435, %cst_156 {dimension_numbers = #tpu.dot_dimension_numbers<[1], [0], [0], [1], [0, 0, 1, 1], [], []>} : vector<16x16xf32>, vector<16x8xf32>, vector<16x8xf32> -> vector<16x8xf32>
    %437 = vector.extract_strided_slice %378 {offsets = [16, 0], sizes = [8, 32], strides = [1, 1]} : vector<32x32xf32> to vector<8x32xf32>
    %cst_157 = arith.constant dense<0.000000e+00> : vector<16x32xf32>
    %438 = tpu.matmul %436, %437, %cst_157 {dimension_numbers = #tpu.dot_dimension_numbers<[1], [0], [0], [1], [0, 0, 1, 1], [], []>} : vector<16x8xf32>, vector<8x32xf32>, vector<16x32xf32> -> vector<16x32xf32>
    %439 = arith.addf %419, %438 : vector<16x32xf32>
    %440 = vector.extract_strided_slice %374 {offsets = [0, 24], sizes = [16, 8], strides = [1, 1]} : vector<16x32xf32> to vector<16x8xf32>
    %441 = vector.extract_strided_slice %375 {offsets = [0, 24], sizes = [16, 8], strides = [1, 1]} : vector<16x32xf32> to vector<16x8xf32>
    %cst_158 = arith.constant dense<0.000000e+00> : vector<16x16xf32>
    %442 = tpu.matmul %440, %441, %cst_158 {dimension_numbers = #tpu.dot_dimension_numbers<[1], [1], [0], [0], [0, 0, 1, 0], [], []>} : vector<16x8xf32>, vector<16x8xf32>, vector<16x16xf32> -> vector<16x16xf32>
    %cst_159 = arith.constant 0.353553385 : f32
    %443 = vector.broadcast %cst_159 : f32 to vector<16x16xf32>
    %444 = arith.mulf %442, %443 : vector<16x16xf32>
    %445 = arith.addf %444, %10 : vector<16x16xf32>
    %cst_160 = arith.constant dense<0xFF800000> : vector<16xf32>
    %446 = vector.multi_reduction <maximumf>, %445, %cst_160 [1] : vector<16x16xf32> to vector<16xf32>
    %447 = vector.shape_cast %446 : vector<16xf32> to vector<16x1xf32>
    %448 = vector.broadcast %447 : vector<16x1xf32> to vector<16x16xf32>
    %449 = arith.subf %445, %448 : vector<16x16xf32>
    %450 = math.exp %449 : vector<16x16xf32>
    %cst_161 = arith.constant dense<0.000000e+00> : vector<16xf32>
    %451 = vector.multi_reduction <add>, %450, %cst_161 [1] : vector<16x16xf32> to vector<16xf32>
    %452 = vector.shape_cast %451 : vector<16xf32> to vector<16x1xf32>
    %453 = vector.broadcast %452 : vector<16x1xf32> to vector<16x16xf32>
    %454 = arith.divf %450, %453 : vector<16x16xf32>
    %455 = vector.extract_strided_slice %376 {offsets = [0, 24], sizes = [16, 8], strides = [1, 1]} : vector<16x32xf32> to vector<16x8xf32>
    %cst_162 = arith.constant dense<0.000000e+00> : vector<16x8xf32>
    %456 = tpu.matmul %454, %455, %cst_162 {dimension_numbers = #tpu.dot_dimension_numbers<[1], [0], [0], [1], [0, 0, 1, 1], [], []>} : vector<16x16xf32>, vector<16x8xf32>, vector<16x8xf32> -> vector<16x8xf32>
    %457 = vector.extract_strided_slice %378 {offsets = [24, 0], sizes = [8, 32], strides = [1, 1]} : vector<32x32xf32> to vector<8x32xf32>
    %cst_163 = arith.constant dense<0.000000e+00> : vector<16x32xf32>
    %458 = tpu.matmul %456, %457, %cst_163 {dimension_numbers = #tpu.dot_dimension_numbers<[1], [0], [0], [1], [0, 0, 1, 1], [], []>} : vector<16x8xf32>, vector<8x32xf32>, vector<16x32xf32> -> vector<16x32xf32>
    %459 = arith.addf %439, %458 : vector<16x32xf32>
    %460 = arith.addf %336, %459 : vector<16x32xf32>
    %461 = vector.broadcast %341 : vector<1x32xf32> to vector<16x32xf32>
    %462 = arith.addf %460, %461 : vector<16x32xf32>
    %cst_164 = arith.constant dense<0.000000e+00> : vector<16xf32>
    %463 = vector.multi_reduction <add>, %462, %cst_164 [1] : vector<16x32xf32> to vector<16xf32>
    %464 = vector.shape_cast %463 : vector<16xf32> to vector<16x1xf32>
    %cst_165 = arith.constant 3.200000e+01 : f32
    %465 = vector.broadcast %cst_165 : f32 to vector<16x1xf32>
    %466 = arith.divf %464, %465 : vector<16x1xf32>
    %467 = vector.broadcast %466 : vector<16x1xf32> to vector<16x32xf32>
    %468 = arith.subf %462, %467 : vector<16x32xf32>
    %469 = arith.mulf %468, %468 : vector<16x32xf32>
    %cst_166 = arith.constant dense<0.000000e+00> : vector<16xf32>
    %470 = vector.multi_reduction <add>, %469, %cst_166 [1] : vector<16x32xf32> to vector<16xf32>
    %471 = vector.shape_cast %470 : vector<16xf32> to vector<16x1xf32>
    %cst_167 = arith.constant 3.200000e+01 : f32
    %472 = vector.broadcast %cst_167 : f32 to vector<16x1xf32>
    %473 = arith.divf %471, %472 : vector<16x1xf32>
    %474 = vector.broadcast %466 : vector<16x1xf32> to vector<16x32xf32>
    %475 = arith.subf %462, %474 : vector<16x32xf32>
    %cst_168 = arith.constant 9.99999974E-6 : f32
    %476 = vector.broadcast %cst_168 : f32 to vector<16x1xf32>
    %477 = arith.addf %473, %476 : vector<16x1xf32>
    %478 = math.rsqrt %477 : vector<16x1xf32>
    %479 = vector.broadcast %478 : vector<16x1xf32> to vector<16x32xf32>
    %480 = arith.mulf %475, %479 : vector<16x32xf32>
    %481 = vector.broadcast %342 : vector<1x32xf32> to vector<16x32xf32>
    %482 = arith.mulf %480, %481 : vector<16x32xf32>
    %483 = vector.broadcast %343 : vector<1x32xf32> to vector<16x32xf32>
    %484 = arith.addf %482, %483 : vector<16x32xf32>
    %c2_169 = arith.constant 2 : index
    %c0_170 = arith.constant 0 : index
    %c0_171 = arith.constant 0 : index
    %485 = vector.load %arg4[%c2_169, %c0_170, %c0_171] : memref<4x32x64xf32, #tpu.memory_space<vmem>>, vector<1x32x64xf32>
    %486 = vector.shape_cast %485 : vector<1x32x64xf32> to vector<32x64xf32>
    %cst_172 = arith.constant dense<0.000000e+00> : vector<16x64xf32>
    %487 = tpu.matmul %484, %486, %cst_172 {dimension_numbers = #tpu.dot_dimension_numbers<[1], [0], [0], [1], [0, 0, 1, 1], [], []>} : vector<16x32xf32>, vector<32x64xf32>, vector<16x64xf32> -> vector<16x64xf32>
    %c2_173 = arith.constant 2 : index
    %c0_174 = arith.constant 0 : index
    %c0_175 = arith.constant 0 : index
    %488 = vector.load %arg5[%c2_173, %c0_174, %c0_175] : memref<4x1x64xf32, #tpu.memory_space<vmem>>, vector<1x1x64xf32>
    %489 = vector.shape_cast %488 : vector<1x1x64xf32> to vector<1x64xf32>
    %490 = vector.broadcast %489 : vector<1x64xf32> to vector<16x64xf32>
    %491 = arith.addf %487, %490 : vector<16x64xf32>
    %cst_176 = arith.constant 0.000000e+00 : f32
    %492 = vector.broadcast %cst_176 : f32 to vector<16x64xf32>
    %493 = arith.maximumf %491, %492 : vector<16x64xf32>
    %c2_177 = arith.constant 2 : index
    %c0_178 = arith.constant 0 : index
    %c0_179 = arith.constant 0 : index
    %494 = vector.load %arg6[%c2_177, %c0_178, %c0_179] : memref<4x64x32xf32, #tpu.memory_space<vmem>>, vector<1x64x32xf32>
    %495 = vector.shape_cast %494 : vector<1x64x32xf32> to vector<64x32xf32>
    %cst_180 = arith.constant dense<0.000000e+00> : vector<16x32xf32>
    %496 = tpu.matmul %493, %495, %cst_180 {dimension_numbers = #tpu.dot_dimension_numbers<[1], [0], [0], [1], [0, 0, 1, 1], [], []>} : vector<16x64xf32>, vector<64x32xf32>, vector<16x32xf32> -> vector<16x32xf32>
    %497 = arith.addf %462, %496 : vector<16x32xf32>
    %498 = vector.broadcast %344 : vector<1x32xf32> to vector<16x32xf32>
    %499 = arith.addf %497, %498 : vector<16x32xf32>
    %500 = arith.addf %499, %336 : vector<16x32xf32>
    %c3 = arith.constant 3 : index
    %c0_181 = arith.constant 0 : index
    %c0_182 = arith.constant 0 : index
    %501 = vector.load %arg7[%c3, %c0_181, %c0_182] : memref<4x6x32xf32, #tpu.memory_space<vmem>>, vector<1x6x32xf32>
    %502 = vector.shape_cast %501 : vector<1x6x32xf32> to vector<6x32xf32>
    %503 = vector.extract_strided_slice %502 {offsets = [0, 0], sizes = [1, 32], strides = [1, 1]} : vector<6x32xf32> to vector<1x32xf32>
    %504 = vector.extract_strided_slice %502 {offsets = [1, 0], sizes = [1, 32], strides = [1, 1]} : vector<6x32xf32> to vector<1x32xf32>
    %505 = vector.extract_strided_slice %502 {offsets = [2, 0], sizes = [1, 32], strides = [1, 1]} : vector<6x32xf32> to vector<1x32xf32>
    %506 = vector.extract_strided_slice %502 {offsets = [3, 0], sizes = [1, 32], strides = [1, 1]} : vector<6x32xf32> to vector<1x32xf32>
    %507 = vector.extract_strided_slice %502 {offsets = [4, 0], sizes = [1, 32], strides = [1, 1]} : vector<6x32xf32> to vector<1x32xf32>
    %508 = vector.extract_strided_slice %502 {offsets = [5, 0], sizes = [1, 32], strides = [1, 1]} : vector<6x32xf32> to vector<1x32xf32>
    %cst_183 = arith.constant dense<0.000000e+00> : vector<16xf32>
    %509 = vector.multi_reduction <add>, %500, %cst_183 [1] : vector<16x32xf32> to vector<16xf32>
    %510 = vector.shape_cast %509 : vector<16xf32> to vector<16x1xf32>
    %cst_184 = arith.constant 3.200000e+01 : f32
    %511 = vector.broadcast %cst_184 : f32 to vector<16x1xf32>
    %512 = arith.divf %510, %511 : vector<16x1xf32>
    %513 = vector.broadcast %512 : vector<16x1xf32> to vector<16x32xf32>
    %514 = arith.subf %500, %513 : vector<16x32xf32>
    %515 = arith.mulf %514, %514 : vector<16x32xf32>
    %cst_185 = arith.constant dense<0.000000e+00> : vector<16xf32>
    %516 = vector.multi_reduction <add>, %515, %cst_185 [1] : vector<16x32xf32> to vector<16xf32>
    %517 = vector.shape_cast %516 : vector<16xf32> to vector<16x1xf32>
    %cst_186 = arith.constant 3.200000e+01 : f32
    %518 = vector.broadcast %cst_186 : f32 to vector<16x1xf32>
    %519 = arith.divf %517, %518 : vector<16x1xf32>
    %520 = vector.broadcast %512 : vector<16x1xf32> to vector<16x32xf32>
    %521 = arith.subf %500, %520 : vector<16x32xf32>
    %cst_187 = arith.constant 9.99999974E-6 : f32
    %522 = vector.broadcast %cst_187 : f32 to vector<16x1xf32>
    %523 = arith.addf %519, %522 : vector<16x1xf32>
    %524 = math.rsqrt %523 : vector<16x1xf32>
    %525 = vector.broadcast %524 : vector<16x1xf32> to vector<16x32xf32>
    %526 = arith.mulf %521, %525 : vector<16x32xf32>
    %527 = vector.broadcast %503 : vector<1x32xf32> to vector<16x32xf32>
    %528 = arith.mulf %526, %527 : vector<16x32xf32>
    %529 = vector.broadcast %504 : vector<1x32xf32> to vector<16x32xf32>
    %530 = arith.addf %528, %529 : vector<16x32xf32>
    %c3_188 = arith.constant 3 : index
    %c0_189 = arith.constant 0 : index
    %c0_190 = arith.constant 0 : index
    %531 = vector.load %arg1[%c3_188, %c0_189, %c0_190] : memref<4x32x96xf32, #tpu.memory_space<vmem>>, vector<1x32x96xf32>
    %532 = vector.shape_cast %531 : vector<1x32x96xf32> to vector<32x96xf32>
    %cst_191 = arith.constant dense<0.000000e+00> : vector<16x96xf32>
    %533 = tpu.matmul %530, %532, %cst_191 {dimension_numbers = #tpu.dot_dimension_numbers<[1], [0], [0], [1], [0, 0, 1, 1], [], []>} : vector<16x32xf32>, vector<32x96xf32>, vector<16x96xf32> -> vector<16x96xf32>
    %c3_192 = arith.constant 3 : index
    %c0_193 = arith.constant 0 : index
    %c0_194 = arith.constant 0 : index
    %534 = vector.load %arg2[%c3_192, %c0_193, %c0_194] : memref<4x1x96xf32, #tpu.memory_space<vmem>>, vector<1x1x96xf32>
    %535 = vector.shape_cast %534 : vector<1x1x96xf32> to vector<1x96xf32>
    %536 = vector.broadcast %535 : vector<1x96xf32> to vector<16x96xf32>
    %537 = arith.addf %533, %536 : vector<16x96xf32>
    %538 = vector.extract_strided_slice %537 {offsets = [0, 0], sizes = [16, 32], strides = [1, 1]} : vector<16x96xf32> to vector<16x32xf32>
    %539 = vector.extract_strided_slice %537 {offsets = [0, 32], sizes = [16, 32], strides = [1, 1]} : vector<16x96xf32> to vector<16x32xf32>
    %540 = vector.extract_strided_slice %537 {offsets = [0, 64], sizes = [16, 32], strides = [1, 1]} : vector<16x96xf32> to vector<16x32xf32>
    %c3_195 = arith.constant 3 : index
    %c0_196 = arith.constant 0 : index
    %c0_197 = arith.constant 0 : index
    %541 = vector.load %arg3[%c3_195, %c0_196, %c0_197] : memref<4x32x32xf32, #tpu.memory_space<vmem>>, vector<1x32x32xf32>
    %542 = vector.shape_cast %541 : vector<1x32x32xf32> to vector<32x32xf32>
    %cst_198 = arith.constant 0.000000e+00 : f32
    %543 = vector.broadcast %cst_198 : f32 to vector<16x32xf32>
    %544 = vector.extract_strided_slice %538 {offsets = [0, 0], sizes = [16, 8], strides = [1, 1]} : vector<16x32xf32> to vector<16x8xf32>
    %545 = vector.extract_strided_slice %539 {offsets = [0, 0], sizes = [16, 8], strides = [1, 1]} : vector<16x32xf32> to vector<16x8xf32>
    %cst_199 = arith.constant dense<0.000000e+00> : vector<16x16xf32>
    %546 = tpu.matmul %544, %545, %cst_199 {dimension_numbers = #tpu.dot_dimension_numbers<[1], [1], [0], [0], [0, 0, 1, 0], [], []>} : vector<16x8xf32>, vector<16x8xf32>, vector<16x16xf32> -> vector<16x16xf32>
    %cst_200 = arith.constant 0.353553385 : f32
    %547 = vector.broadcast %cst_200 : f32 to vector<16x16xf32>
    %548 = arith.mulf %546, %547 : vector<16x16xf32>
    %549 = arith.addf %548, %10 : vector<16x16xf32>
    %cst_201 = arith.constant dense<0xFF800000> : vector<16xf32>
    %550 = vector.multi_reduction <maximumf>, %549, %cst_201 [1] : vector<16x16xf32> to vector<16xf32>
    %551 = vector.shape_cast %550 : vector<16xf32> to vector<16x1xf32>
    %552 = vector.broadcast %551 : vector<16x1xf32> to vector<16x16xf32>
    %553 = arith.subf %549, %552 : vector<16x16xf32>
    %554 = math.exp %553 : vector<16x16xf32>
    %cst_202 = arith.constant dense<0.000000e+00> : vector<16xf32>
    %555 = vector.multi_reduction <add>, %554, %cst_202 [1] : vector<16x16xf32> to vector<16xf32>
    %556 = vector.shape_cast %555 : vector<16xf32> to vector<16x1xf32>
    %557 = vector.broadcast %556 : vector<16x1xf32> to vector<16x16xf32>
    %558 = arith.divf %554, %557 : vector<16x16xf32>
    %559 = vector.extract_strided_slice %540 {offsets = [0, 0], sizes = [16, 8], strides = [1, 1]} : vector<16x32xf32> to vector<16x8xf32>
    %cst_203 = arith.constant dense<0.000000e+00> : vector<16x8xf32>
    %560 = tpu.matmul %558, %559, %cst_203 {dimension_numbers = #tpu.dot_dimension_numbers<[1], [0], [0], [1], [0, 0, 1, 1], [], []>} : vector<16x16xf32>, vector<16x8xf32>, vector<16x8xf32> -> vector<16x8xf32>
    %561 = vector.extract_strided_slice %542 {offsets = [0, 0], sizes = [8, 32], strides = [1, 1]} : vector<32x32xf32> to vector<8x32xf32>
    %cst_204 = arith.constant dense<0.000000e+00> : vector<16x32xf32>
    %562 = tpu.matmul %560, %561, %cst_204 {dimension_numbers = #tpu.dot_dimension_numbers<[1], [0], [0], [1], [0, 0, 1, 1], [], []>} : vector<16x8xf32>, vector<8x32xf32>, vector<16x32xf32> -> vector<16x32xf32>
    %563 = arith.addf %543, %562 : vector<16x32xf32>
    %564 = vector.extract_strided_slice %538 {offsets = [0, 8], sizes = [16, 8], strides = [1, 1]} : vector<16x32xf32> to vector<16x8xf32>
    %565 = vector.extract_strided_slice %539 {offsets = [0, 8], sizes = [16, 8], strides = [1, 1]} : vector<16x32xf32> to vector<16x8xf32>
    %cst_205 = arith.constant dense<0.000000e+00> : vector<16x16xf32>
    %566 = tpu.matmul %564, %565, %cst_205 {dimension_numbers = #tpu.dot_dimension_numbers<[1], [1], [0], [0], [0, 0, 1, 0], [], []>} : vector<16x8xf32>, vector<16x8xf32>, vector<16x16xf32> -> vector<16x16xf32>
    %cst_206 = arith.constant 0.353553385 : f32
    %567 = vector.broadcast %cst_206 : f32 to vector<16x16xf32>
    %568 = arith.mulf %566, %567 : vector<16x16xf32>
    %569 = arith.addf %568, %10 : vector<16x16xf32>
    %cst_207 = arith.constant dense<0xFF800000> : vector<16xf32>
    %570 = vector.multi_reduction <maximumf>, %569, %cst_207 [1] : vector<16x16xf32> to vector<16xf32>
    %571 = vector.shape_cast %570 : vector<16xf32> to vector<16x1xf32>
    %572 = vector.broadcast %571 : vector<16x1xf32> to vector<16x16xf32>
    %573 = arith.subf %569, %572 : vector<16x16xf32>
    %574 = math.exp %573 : vector<16x16xf32>
    %cst_208 = arith.constant dense<0.000000e+00> : vector<16xf32>
    %575 = vector.multi_reduction <add>, %574, %cst_208 [1] : vector<16x16xf32> to vector<16xf32>
    %576 = vector.shape_cast %575 : vector<16xf32> to vector<16x1xf32>
    %577 = vector.broadcast %576 : vector<16x1xf32> to vector<16x16xf32>
    %578 = arith.divf %574, %577 : vector<16x16xf32>
    %579 = vector.extract_strided_slice %540 {offsets = [0, 8], sizes = [16, 8], strides = [1, 1]} : vector<16x32xf32> to vector<16x8xf32>
    %cst_209 = arith.constant dense<0.000000e+00> : vector<16x8xf32>
    %580 = tpu.matmul %578, %579, %cst_209 {dimension_numbers = #tpu.dot_dimension_numbers<[1], [0], [0], [1], [0, 0, 1, 1], [], []>} : vector<16x16xf32>, vector<16x8xf32>, vector<16x8xf32> -> vector<16x8xf32>
    %581 = vector.extract_strided_slice %542 {offsets = [8, 0], sizes = [8, 32], strides = [1, 1]} : vector<32x32xf32> to vector<8x32xf32>
    %cst_210 = arith.constant dense<0.000000e+00> : vector<16x32xf32>
    %582 = tpu.matmul %580, %581, %cst_210 {dimension_numbers = #tpu.dot_dimension_numbers<[1], [0], [0], [1], [0, 0, 1, 1], [], []>} : vector<16x8xf32>, vector<8x32xf32>, vector<16x32xf32> -> vector<16x32xf32>
    %583 = arith.addf %563, %582 : vector<16x32xf32>
    %584 = vector.extract_strided_slice %538 {offsets = [0, 16], sizes = [16, 8], strides = [1, 1]} : vector<16x32xf32> to vector<16x8xf32>
    %585 = vector.extract_strided_slice %539 {offsets = [0, 16], sizes = [16, 8], strides = [1, 1]} : vector<16x32xf32> to vector<16x8xf32>
    %cst_211 = arith.constant dense<0.000000e+00> : vector<16x16xf32>
    %586 = tpu.matmul %584, %585, %cst_211 {dimension_numbers = #tpu.dot_dimension_numbers<[1], [1], [0], [0], [0, 0, 1, 0], [], []>} : vector<16x8xf32>, vector<16x8xf32>, vector<16x16xf32> -> vector<16x16xf32>
    %cst_212 = arith.constant 0.353553385 : f32
    %587 = vector.broadcast %cst_212 : f32 to vector<16x16xf32>
    %588 = arith.mulf %586, %587 : vector<16x16xf32>
    %589 = arith.addf %588, %10 : vector<16x16xf32>
    %cst_213 = arith.constant dense<0xFF800000> : vector<16xf32>
    %590 = vector.multi_reduction <maximumf>, %589, %cst_213 [1] : vector<16x16xf32> to vector<16xf32>
    %591 = vector.shape_cast %590 : vector<16xf32> to vector<16x1xf32>
    %592 = vector.broadcast %591 : vector<16x1xf32> to vector<16x16xf32>
    %593 = arith.subf %589, %592 : vector<16x16xf32>
    %594 = math.exp %593 : vector<16x16xf32>
    %cst_214 = arith.constant dense<0.000000e+00> : vector<16xf32>
    %595 = vector.multi_reduction <add>, %594, %cst_214 [1] : vector<16x16xf32> to vector<16xf32>
    %596 = vector.shape_cast %595 : vector<16xf32> to vector<16x1xf32>
    %597 = vector.broadcast %596 : vector<16x1xf32> to vector<16x16xf32>
    %598 = arith.divf %594, %597 : vector<16x16xf32>
    %599 = vector.extract_strided_slice %540 {offsets = [0, 16], sizes = [16, 8], strides = [1, 1]} : vector<16x32xf32> to vector<16x8xf32>
    %cst_215 = arith.constant dense<0.000000e+00> : vector<16x8xf32>
    %600 = tpu.matmul %598, %599, %cst_215 {dimension_numbers = #tpu.dot_dimension_numbers<[1], [0], [0], [1], [0, 0, 1, 1], [], []>} : vector<16x16xf32>, vector<16x8xf32>, vector<16x8xf32> -> vector<16x8xf32>
    %601 = vector.extract_strided_slice %542 {offsets = [16, 0], sizes = [8, 32], strides = [1, 1]} : vector<32x32xf32> to vector<8x32xf32>
    %cst_216 = arith.constant dense<0.000000e+00> : vector<16x32xf32>
    %602 = tpu.matmul %600, %601, %cst_216 {dimension_numbers = #tpu.dot_dimension_numbers<[1], [0], [0], [1], [0, 0, 1, 1], [], []>} : vector<16x8xf32>, vector<8x32xf32>, vector<16x32xf32> -> vector<16x32xf32>
    %603 = arith.addf %583, %602 : vector<16x32xf32>
    %604 = vector.extract_strided_slice %538 {offsets = [0, 24], sizes = [16, 8], strides = [1, 1]} : vector<16x32xf32> to vector<16x8xf32>
    %605 = vector.extract_strided_slice %539 {offsets = [0, 24], sizes = [16, 8], strides = [1, 1]} : vector<16x32xf32> to vector<16x8xf32>
    %cst_217 = arith.constant dense<0.000000e+00> : vector<16x16xf32>
    %606 = tpu.matmul %604, %605, %cst_217 {dimension_numbers = #tpu.dot_dimension_numbers<[1], [1], [0], [0], [0, 0, 1, 0], [], []>} : vector<16x8xf32>, vector<16x8xf32>, vector<16x16xf32> -> vector<16x16xf32>
    %cst_218 = arith.constant 0.353553385 : f32
    %607 = vector.broadcast %cst_218 : f32 to vector<16x16xf32>
    %608 = arith.mulf %606, %607 : vector<16x16xf32>
    %609 = arith.addf %608, %10 : vector<16x16xf32>
    %cst_219 = arith.constant dense<0xFF800000> : vector<16xf32>
    %610 = vector.multi_reduction <maximumf>, %609, %cst_219 [1] : vector<16x16xf32> to vector<16xf32>
    %611 = vector.shape_cast %610 : vector<16xf32> to vector<16x1xf32>
    %612 = vector.broadcast %611 : vector<16x1xf32> to vector<16x16xf32>
    %613 = arith.subf %609, %612 : vector<16x16xf32>
    %614 = math.exp %613 : vector<16x16xf32>
    %cst_220 = arith.constant dense<0.000000e+00> : vector<16xf32>
    %615 = vector.multi_reduction <add>, %614, %cst_220 [1] : vector<16x16xf32> to vector<16xf32>
    %616 = vector.shape_cast %615 : vector<16xf32> to vector<16x1xf32>
    %617 = vector.broadcast %616 : vector<16x1xf32> to vector<16x16xf32>
    %618 = arith.divf %614, %617 : vector<16x16xf32>
    %619 = vector.extract_strided_slice %540 {offsets = [0, 24], sizes = [16, 8], strides = [1, 1]} : vector<16x32xf32> to vector<16x8xf32>
    %cst_221 = arith.constant dense<0.000000e+00> : vector<16x8xf32>
    %620 = tpu.matmul %618, %619, %cst_221 {dimension_numbers = #tpu.dot_dimension_numbers<[1], [0], [0], [1], [0, 0, 1, 1], [], []>} : vector<16x16xf32>, vector<16x8xf32>, vector<16x8xf32> -> vector<16x8xf32>
    %621 = vector.extract_strided_slice %542 {offsets = [24, 0], sizes = [8, 32], strides = [1, 1]} : vector<32x32xf32> to vector<8x32xf32>
    %cst_222 = arith.constant dense<0.000000e+00> : vector<16x32xf32>
    %622 = tpu.matmul %620, %621, %cst_222 {dimension_numbers = #tpu.dot_dimension_numbers<[1], [0], [0], [1], [0, 0, 1, 1], [], []>} : vector<16x8xf32>, vector<8x32xf32>, vector<16x32xf32> -> vector<16x32xf32>
    %623 = arith.addf %603, %622 : vector<16x32xf32>
    %624 = arith.addf %500, %623 : vector<16x32xf32>
    %625 = vector.broadcast %505 : vector<1x32xf32> to vector<16x32xf32>
    %626 = arith.addf %624, %625 : vector<16x32xf32>
    %cst_223 = arith.constant dense<0.000000e+00> : vector<16xf32>
    %627 = vector.multi_reduction <add>, %626, %cst_223 [1] : vector<16x32xf32> to vector<16xf32>
    %628 = vector.shape_cast %627 : vector<16xf32> to vector<16x1xf32>
    %cst_224 = arith.constant 3.200000e+01 : f32
    %629 = vector.broadcast %cst_224 : f32 to vector<16x1xf32>
    %630 = arith.divf %628, %629 : vector<16x1xf32>
    %631 = vector.broadcast %630 : vector<16x1xf32> to vector<16x32xf32>
    %632 = arith.subf %626, %631 : vector<16x32xf32>
    %633 = arith.mulf %632, %632 : vector<16x32xf32>
    %cst_225 = arith.constant dense<0.000000e+00> : vector<16xf32>
    %634 = vector.multi_reduction <add>, %633, %cst_225 [1] : vector<16x32xf32> to vector<16xf32>
    %635 = vector.shape_cast %634 : vector<16xf32> to vector<16x1xf32>
    %cst_226 = arith.constant 3.200000e+01 : f32
    %636 = vector.broadcast %cst_226 : f32 to vector<16x1xf32>
    %637 = arith.divf %635, %636 : vector<16x1xf32>
    %638 = vector.broadcast %630 : vector<16x1xf32> to vector<16x32xf32>
    %639 = arith.subf %626, %638 : vector<16x32xf32>
    %cst_227 = arith.constant 9.99999974E-6 : f32
    %640 = vector.broadcast %cst_227 : f32 to vector<16x1xf32>
    %641 = arith.addf %637, %640 : vector<16x1xf32>
    %642 = math.rsqrt %641 : vector<16x1xf32>
    %643 = vector.broadcast %642 : vector<16x1xf32> to vector<16x32xf32>
    %644 = arith.mulf %639, %643 : vector<16x32xf32>
    %645 = vector.broadcast %506 : vector<1x32xf32> to vector<16x32xf32>
    %646 = arith.mulf %644, %645 : vector<16x32xf32>
    %647 = vector.broadcast %507 : vector<1x32xf32> to vector<16x32xf32>
    %648 = arith.addf %646, %647 : vector<16x32xf32>
    %c3_228 = arith.constant 3 : index
    %c0_229 = arith.constant 0 : index
    %c0_230 = arith.constant 0 : index
    %649 = vector.load %arg4[%c3_228, %c0_229, %c0_230] : memref<4x32x64xf32, #tpu.memory_space<vmem>>, vector<1x32x64xf32>
    %650 = vector.shape_cast %649 : vector<1x32x64xf32> to vector<32x64xf32>
    %cst_231 = arith.constant dense<0.000000e+00> : vector<16x64xf32>
    %651 = tpu.matmul %648, %650, %cst_231 {dimension_numbers = #tpu.dot_dimension_numbers<[1], [0], [0], [1], [0, 0, 1, 1], [], []>} : vector<16x32xf32>, vector<32x64xf32>, vector<16x64xf32> -> vector<16x64xf32>
    %c3_232 = arith.constant 3 : index
    %c0_233 = arith.constant 0 : index
    %c0_234 = arith.constant 0 : index
    %652 = vector.load %arg5[%c3_232, %c0_233, %c0_234] : memref<4x1x64xf32, #tpu.memory_space<vmem>>, vector<1x1x64xf32>
    %653 = vector.shape_cast %652 : vector<1x1x64xf32> to vector<1x64xf32>
    %654 = vector.broadcast %653 : vector<1x64xf32> to vector<16x64xf32>
    %655 = arith.addf %651, %654 : vector<16x64xf32>
    %cst_235 = arith.constant 0.000000e+00 : f32
    %656 = vector.broadcast %cst_235 : f32 to vector<16x64xf32>
    %657 = arith.maximumf %655, %656 : vector<16x64xf32>
    %c3_236 = arith.constant 3 : index
    %c0_237 = arith.constant 0 : index
    %c0_238 = arith.constant 0 : index
    %658 = vector.load %arg6[%c3_236, %c0_237, %c0_238] : memref<4x64x32xf32, #tpu.memory_space<vmem>>, vector<1x64x32xf32>
    %659 = vector.shape_cast %658 : vector<1x64x32xf32> to vector<64x32xf32>
    %cst_239 = arith.constant dense<0.000000e+00> : vector<16x32xf32>
    %660 = tpu.matmul %657, %659, %cst_239 {dimension_numbers = #tpu.dot_dimension_numbers<[1], [0], [0], [1], [0, 0, 1, 1], [], []>} : vector<16x64xf32>, vector<64x32xf32>, vector<16x32xf32> -> vector<16x32xf32>
    %661 = arith.addf %626, %660 : vector<16x32xf32>
    %662 = vector.broadcast %508 : vector<1x32xf32> to vector<16x32xf32>
    %663 = arith.addf %661, %662 : vector<16x32xf32>
    %c0_240 = arith.constant 0 : index
    %c0_241 = arith.constant 0 : index
    %664 = vector.load %arg8[%c0_240, %c0_241] : memref<2x32xf32, #tpu.memory_space<vmem>>, vector<1x32xf32>
    %c1_242 = arith.constant 1 : index
    %c0_243 = arith.constant 0 : index
    %665 = vector.load %arg8[%c1_242, %c0_243] : memref<2x32xf32, #tpu.memory_space<vmem>>, vector<1x32xf32>
    %cst_244 = arith.constant dense<0.000000e+00> : vector<16xf32>
    %666 = vector.multi_reduction <add>, %663, %cst_244 [1] : vector<16x32xf32> to vector<16xf32>
    %667 = vector.shape_cast %666 : vector<16xf32> to vector<16x1xf32>
    %cst_245 = arith.constant 3.200000e+01 : f32
    %668 = vector.broadcast %cst_245 : f32 to vector<16x1xf32>
    %669 = arith.divf %667, %668 : vector<16x1xf32>
    %670 = vector.broadcast %669 : vector<16x1xf32> to vector<16x32xf32>
    %671 = arith.subf %663, %670 : vector<16x32xf32>
    %672 = arith.mulf %671, %671 : vector<16x32xf32>
    %cst_246 = arith.constant dense<0.000000e+00> : vector<16xf32>
    %673 = vector.multi_reduction <add>, %672, %cst_246 [1] : vector<16x32xf32> to vector<16xf32>
    %674 = vector.shape_cast %673 : vector<16xf32> to vector<16x1xf32>
    %cst_247 = arith.constant 3.200000e+01 : f32
    %675 = vector.broadcast %cst_247 : f32 to vector<16x1xf32>
    %676 = arith.divf %674, %675 : vector<16x1xf32>
    %677 = vector.broadcast %669 : vector<16x1xf32> to vector<16x32xf32>
    %678 = arith.subf %663, %677 : vector<16x32xf32>
    %cst_248 = arith.constant 9.99999974E-6 : f32
    %679 = vector.broadcast %cst_248 : f32 to vector<16x1xf32>
    %680 = arith.addf %676, %679 : vector<16x1xf32>
    %681 = math.rsqrt %680 : vector<16x1xf32>
    %682 = vector.broadcast %681 : vector<16x1xf32> to vector<16x32xf32>
    %683 = arith.mulf %678, %682 : vector<16x32xf32>
    %684 = vector.broadcast %664 : vector<1x32xf32> to vector<16x32xf32>
    %685 = arith.mulf %683, %684 : vector<16x32xf32>
    %686 = vector.broadcast %665 : vector<1x32xf32> to vector<16x32xf32>
    %687 = arith.addf %685, %686 : vector<16x32xf32>
    %c0_249 = arith.constant 0 : index
    %c0_250 = arith.constant 0 : index
    %688 = vector.load %arg9[%c0_249, %c0_250] : memref<16x32xf32, #tpu.memory_space<vmem>>, vector<16x32xf32>
    tpu.vector_store %arg9[%c0_249, %c0_250], %687 {strides = array<i32>} : memref<16x32xf32, #tpu.memory_space<vmem>>, vector<16x32xf32>,
    return
  }
}

</mosaic_0001>

<bundles_post_ra>
// kernel: intra_encoder_forward.1
= control target key start
LH: loop header
LB: loop body
LE: loop exit
PB: predicated region body
PF: predicated region fallthrough
CT: control target
= control target key end

     0   :  { %vm48_vm0 = vcmask 261120   ;;  %s8834_s0 = inlined_call_operand.vmem [shape: f32[16,32], index: 0, kind: input, shape index: {}]   ;;  %s8835_s1 = inlined_call_operand.vmem [shape: f32[4,32,96], index: 1, kind: input, shape index: {}]   ;;  %s8836_s2 = inlined_call_operand.vmem [shape: f32[4,1,96], index: 2, kind: input, shape index: {}]   ;;  %s8837_s3 = inlined_call_operand.vmem [shape: f32[4,32,32], index: 3, kind: input, shape index: {}]   ;;  %s8838_s4 = inlined_call_operand.vmem [shape: f32[4,32,64], index: 4, kind: input, shape index: {}]   ;;  %s8839_s5 = inlined_call_operand.vmem [shape: f32[4,1,64], index: 5, kind: input, shape index: {}]   ;;  %s8840_s6 = inlined_call_operand.vmem [shape: f32[4,64,32], index: 6, kind: input, shape index: {}]   ;;  %s8841_s7 = inlined_call_operand.vmem [shape: f32[4,6,32], index: 7, kind: input, shape index: {}]   ;;  %s8842_s8 = inlined_call_operand.vmem [shape: f32[2,32], index: 8, kind: input, shape index: {}]   ;;  %s8843_s9 = inlined_call_operand.hbm [shape: f32[16,32], index: 9, kind: output, shape index: {}]  }
   0x1   :  { %v7895_v0 = vld [vmem:[%s8834_s0] sm:$0xff]  ;;  %v7900_v1 = vld [vmem:[%s8834_s0 + $0x8] sm:$0xff] }
   0x2   :  { %14 = vsyncpa [#allocation3], 0  ;;  %v49_v2 = vsel %vm48_vm0, %v7895_v0, 0.0  ;;  %v52_v3 = vsel %vm48_vm0, %v7900_v1, 0.0  ;;  %v88_v14 = vld [vmem:[%s8835_s1] sm:$0xff]  ;;  %v89_v15 = vld [vmem:[%s8835_s1 + $0x8] sm:$0xff]  ;;  %v35_v22 = vlaneseq }
   0x3   :  { %50 = vadd.xlane.f32.xlu0 %v49_v2  ;;  %v90_v16 = vld [vmem:[%s8835_s1 + $0x10] sm:$0xff]  ;;  %v7152_v17 = vpack.c.bf16 %v89_v15, %v88_v14  ;;  %v91_v18 = vld [vmem:[%s8835_s1 + $0x18] sm:$0xff]  ;;  %v7931_v29 = vld [vmem:[%s8841_s7] sm:$0x3f]  ;;  %vm190_vm1 = vcmask 64512   ;;  %s7827_s24 = smov 88  }
   0x4   :  { %v7156_v19 = vpack.c.bf16 %v91_v18, %v90_v16  ;;  %v7923_v26 = vshrl.u32 %v35_v22, 7  ;;  %v6189_v41 = vld [vmem:[%s8836_s2] ss:$0 sm:$0xff]  ;;  %s7828_s25 = smov 96   ;;  %s7829_s26 = smov 120   ;;  %vm7971_vm2 = vmpackc.low %vm190_vm1, %vm190_vm1  ;;  %vm278_vm5 = vcmask 130048  }
   0x5   :  { %7153 = vmatprep.subr.bf16.mxu1 %v7152_v17  ;;  %s7830_s27 = smov 80   ;;  %s7831_s28 = smov 112   ;;  %vm1476_vm6 = vcmask 523264  }
   0x6   :  { %7155 = vmatpush3.bf16.msra.mxu1 %v7152_v17  ;;  %v7926_v28 = vsub.s32 0, %v7923_v26  ;;  %v7934_v30 = vsub.s32 1, %v7923_v26  ;;  %v37_v2 = vadd.s32 8, %v7923_v26  ;;  %s7833_s29 = smov 64   ;;  %s7834_s30 = smov 72  }
   0x7   :  { %53 = vadd.xlane.f32.xlu0 %v52_v3  ;;  %7157 = vmatprep.subr.bf16.mxu1 %v7156_v19  ;;  %v39_v3 = vand.u32 127, %v35_v22  ;;  %s7835_s10 = smov 104   ;;  %s7836_s11 = smov 56  }
   0x8   :  { %v79_v31 = vrot.slane %v7931_v29, %v7926_v28  ;;  %v85_v34 = vrot.slane %v7931_v29, %v7934_v30  ;;  %s7837_s15 = smov 48   ;;  %s7838_s18 = smov 40  }
   0xa   :  { %7159 = vmatpush3.bf16.msra.mxu1 %v7156_v19 }
  0x90   :  { %v51_v4 = vpop.xlane.xlu0 %50 }
  0x91   :  { %v56_v5 = vmul.f32 0.03125, %v51_v4  ;;  %v41_v4 = vshrl.u32 %v37_v2, 3 }
  0x93   :  { %v58_v6 = vsub.f32 %v7895_v0, %v56_v5  ;;  %v42_v5 = vshrl.u32 %v39_v3, 3 }
  0x94   :  { %v54_v7 = vpop.xlane.xlu0 %53 }
  0x95   :  { %v57_v8 = vmul.f32 0.03125, %v54_v7  ;;  %v60_v9 = vmul.f32 %v58_v6, %v58_v6  ;;  %vm44_vm3 = vcmp.eq.s32.totalorder %v41_v4, %v42_v5  ;;  %v7832_v7 = vmov -1e+30  }
  0x97   :  { %v59_v10 = vsub.f32 %v7900_v1, %v57_v8  ;;  %v62_v11 = vsel %vm48_vm0, %v60_v9, 0.0  ;;  %v7996_v8 = vsel %vm44_vm3, 0.0, %v7832_v7 }
  0x98   :  { %63 = vadd.xlane.f32.xlu1 %v62_v11 }
  0x99   :  { %v61_v12 = vmul.f32 %v59_v10, %v59_v10 }
  0x9b   :  { %v65_v13 = vsel %vm48_vm0, %v61_v12, 0.0 }
  0x9c   :  { %66 = vadd.xlane.f32.xlu1 %v65_v13 }
 0x125   :  { %v64_v20 = vpop.xlane.xlu1 %63 }
 0x126   :  { %v68_v21 = vmul.f32 0.03125, %v64_v20 }
 0x128   :  { %v70_v23 = vadd.f32 1e-05, %v68_v21 }
 0x129   :  { %v67_v24 = vpop.xlane.xlu1 %66 }
 0x12a   :  { %7639 = vrsqrt.f32 %v70_v23  ;;  %v69_v25 = vmul.f32 0.03125, %v67_v24 }
 0x12c   :  { %v71_v27 = vadd.f32 1e-05, %v69_v25 }
 0x12e   :  { %7641 = vrsqrt.f32 %v71_v27 }
 0x134   :  { %v7640_v32 = vpop.eup %7639 }
 0x135   :  { %v74_v33 = vmul.f32 %v7640_v32, %v58_v6  ;;  %v40_v6 = vshrl.u32 %v7923_v26, 3 }
 0x137   :  { %v80_v35 = vmul.f32 %v79_v31, %v74_v33  ;;  %vm43_vm4 = vcmp.eq.s32.totalorder %v40_v6, %v42_v5 }
 0x138   :  { %v7642_v36 = vpop.eup %7641 }
 0x139   :  { %v75_v37 = vmul.f32 %v7642_v36, %v59_v10  ;;  %v86_v38 = vadd.f32 %v85_v34, %v80_v35  ;;  %v7998_v10 = vsel %vm43_vm4, 0.0, %v7832_v7 }
 0x13b   :  { %v81_v39 = vmul.f32 %v79_v31, %v75_v37  ;;  %6692 = vmatprep.mubr.msk.f32.mxu1 %vm48_vm0, %v86_v38 }
 0x13d   :  { %v87_v40 = vadd.f32 %v85_v34, %v81_v39 }
 0x13f   :  { %6693 = vmatmul.mubr.msk.f32.vlgmr.msra.gmra.mrb[0].mxu1 %vm48_vm0, %v87_v40 }
 0x212   :  { %v6694_v42 = vpop.f32.mrb[0].mxu1 }
 0x213   :  { %v7945_v43 = vadd.f32 %v6694_v42, %v6189_v41  ;;  %v171_v44 = vpop.f32.mrb[1].mxu1 }
 0x214   :  { %v7947_v45 = vadd.f32 %v6189_v41, %v171_v44 }
 0x216   :  { %6699 = vmatprep.mubr.msk.f32.mxu1 %vm190_vm1, %v7947_v45  ;;  %v7953_v46 = vpack.i.bf16 %v7945_v43, %v7947_v45 }
 0x218   :  { %7485 = vrot.lane.b32.xlu1 %v7953_v46, %s7827_s24  ;;  %7480 = vrot.lane.b32.xlu0 %v7953_v46, %s7828_s25 }
 0x21c   :  { %388 = vrot.lane.b32.xlu1 %v7947_v45, %s7829_s26  ;;  %7490 = vrot.lane.b32.xlu0 %v7953_v46, %s7830_s27 }
 0x220   :  { %390 = vrot.lane.b32.xlu1 %v7945_v43, %s7829_s26  ;;  %756 = vrot.lane.b32.xlu0 %v7945_v43, %s7831_s28 }
 0x224   :  { %754 = vrot.lane.b32.xlu1 %v7947_v45, %s7831_s28 }
 0x28a   :  { %v7486_v47 = vpop.permute.xlu1 %7485  ;;  %v7481_v48 = vpop.permute.xlu0 %7480 }
 0x28b   :  { %v7488_v49 = vunpack.i.h.bf16 %v7486_v47  ;;  %v7487_v50 = vunpack.i.l.bf16 %v7486_v47  ;;  %v7483_v51 = vunpack.i.h.bf16 %v7481_v48  ;;  %v7482_v52 = vunpack.i.l.bf16 %v7481_v48 }
 0x28d   :  { %v7160_v54 = vpack.c.bf16 %v7483_v51, %v7482_v52  ;;  %v7170_v55 = vpack.c.bf16 %v7488_v49, %v7487_v50 }
 0x28e   :  { %v7491_v56 = vpop.permute.xlu0 %7490  ;;  %v389_v57 = vpop.permute.xlu1 %388 }
 0x28f   :  { %7162 = vmatprep.subr.msk.bf16.mxu1 %vm7971_vm2, %v7160_v54  ;;  %v7493_v58 = vunpack.i.h.bf16 %v7491_v56  ;;  %v7492_v59 = vunpack.i.l.bf16 %v7491_v56 }
 0x290   :  { %7165 = vmatpush3.bf16.xpose.msk.msra.mxu1 %vm7971_vm2, %v7160_v54 }
 0x291   :  { %7172 = vmatprep.subr.msk.bf16.mxu1 %vm7971_vm2, %v7170_v55  ;;  %v7180_v60 = vpack.c.bf16 %v7493_v58, %v7492_v59 }
 0x292   :  { %v391_v61 = vpop.permute.xlu1 %390  ;;  %v757_v63 = vpop.permute.xlu0 %756 }
 0x296   :  { %v755_v62 = vpop.permute.xlu1 %754 }
 0x297   :  { %6700 = vmatmul.mubr.msk.f32.vlgmr.msra.gmra.mrb[2].mxu1 %vm190_vm1, %v7945_v43 }
 0x298   :  { %7175 = vmatpush3.bf16.xpose.msk.msra.mxu1 %vm7971_vm2, %v7170_v55  ;;  %6713 = vmatprep.mubr.msk.f32.mxu1 %vm190_vm1, %v389_v57 }
 0x299   :  { %7182 = vmatprep.subr.msk.bf16.mxu1 %vm7971_vm2, %v7180_v60 }
 0x29f   :  { %6714 = vmatmul.mubr.msk.f32.vlgmr.msra.gmra.mrb[4].mxu1 %vm190_vm1, %v391_v61 }
 0x2a0   :  { %7185 = vmatpush3.bf16.xpose.msk.msra.mxu1 %vm7971_vm2, %v7180_v60  ;;  %6737 = vmatprep.mubr.msk.f32.mxu1 %vm190_vm1, %v755_v62 }
 0x2a7   :  { %6738 = vmatmul.mubr.msk.f32.vlgmr.msra.gmra.mrb[6].mxu1 %vm190_vm1, %v757_v63 }
 0x36a   :  { %v6701_v9 = vpop.f32.mrb[2].mxu1 }
 0x36b   :  { %v275_v11 = vmul.f32 0.35355338, %v6701_v9  ;;  %v265_v12 = vpop.f32.mrb[3].mxu1 }
 0x36c   :  { %v274_v13 = vmul.f32 0.35355338, %v265_v12 }
 0x36d   :  { %v277_v14 = vadd.f32 %v275_v11, %v7996_v8 }
 0x36e   :  { %v276_v15 = vadd.f32 %v274_v13, %v7998_v10 }
 0x36f   :  { %v282_v16 = vsel %vm278_vm5, %v277_v14, -inf }
 0x370   :  { %283 = vmax.xlane.f32.xlu0 %v282_v16  ;;  %v279_v17 = vsel %vm278_vm5, %v276_v15, -inf }
 0x371   :  { %280 = vmax.xlane.f32.xlu1 %v279_v17 }
 0x372   :  { %v6715_v18 = vpop.f32.mrb[4].mxu1 }
 0x373   :  { %v470_v19 = vpop.f32.mrb[5].mxu1  ;;  %v480_v20 = vmul.f32 0.35355338, %v6715_v18 }
 0x374   :  { %v479_v21 = vmul.f32 0.35355338, %v470_v19 }
 0x375   :  { %v482_v24 = vadd.f32 %v480_v20, %v7996_v8 }
 0x376   :  { %v481_v22 = vadd.f32 %v479_v21, %v7998_v10 }
 0x377   :  { %v486_v31 = vsel %vm278_vm5, %v482_v24, -inf }
 0x378   :  { %v483_v23 = vsel %vm278_vm5, %v481_v22, -inf }
 0x379   :  { %484 = vmax.xlane.f32.xlu0 %v483_v23 }
 0x37a   :  { %v6739_v25 = vpop.f32.mrb[6].mxu1 }
 0x37b   :  { %v836_v27 = vpop.f32.mrb[7].mxu1  ;;  %v846_v58 = vmul.f32 0.35355338, %v6739_v25 }
 0x37c   :  { %v845_v56 = vmul.f32 0.35355338, %v836_v27 }
 0x37d   :  { %487 = vmax.xlane.f32.xlu0 %v486_v31  ;;  %v848_v60 = vadd.f32 %v846_v58, %v7996_v8 }
 0x37e   :  { %v847_v57 = vadd.f32 %v845_v56, %v7998_v10 }
 0x37f   :  { %v852_v61 = vsel %vm278_vm5, %v848_v60, -inf }
 0x380   :  { %v849_v59 = vsel %vm278_vm5, %v847_v57, -inf }
 0x3fd   :  { %v284_v32 = vpop.xlane.xlu0 %283 }
 0x3fe   :  { %v286_v33 = vsub.f32 %v277_v14, %v284_v32  ;;  %v281_v34 = vpop.xlane.xlu1 %280 }
 0x3ff   :  { %v285_v35 = vsub.f32 %v276_v15, %v281_v34 }
 0x400   :  { %v289_v36 = vmul.f32 1.442695, %v286_v33 }
 0x401   :  { %v287_v37 = vmul.f32 1.442695, %v285_v35 }
 0x402   :  { %7643 = vpow2.f32 %v289_v36 }
 0x403   :  { %7645 = vpow2.f32 %v287_v37 }
 0x406   :  { %v485_v38 = vpop.xlane.xlu0 %484 }
 0x407   :  { %v489_v39 = vsub.f32 %v481_v22, %v485_v38 }
 0x409   :  { %v491_v40 = vmul.f32 1.442695, %v489_v39 }
 0x40a   :  { %v488_v41 = vpop.xlane.xlu0 %487 }
 0x40b   :  { %7647 = vpow2.f32 %v491_v40  ;;  %v490_v42 = vsub.f32 %v482_v24, %v488_v41  ;;  %v181_v40 = vld [vmem:[%s8837_s3 + $0x8] sm:$0xff]  ;;  %v180_v41 = vld [vmem:[%s8837_s3] sm:$0xff] }
 0x40c   :  { %v7644_v44 = vpop.eup %7643 }
 0x40d   :  { %v7646_v47 = vpop.eup %7645  ;;  %v493_v48 = vmul.f32 1.442695, %v490_v42  ;;  %v294_v49 = vsel %vm278_vm5, %v7644_v44, 0.0 }
 0x40e   :  { %295 = vadd.xlane.f32.xlu0 %v294_v49  ;;  %v291_v50 = vsel %vm278_vm5, %v7646_v47, 0.0 }
 0x40f   :  { %7649 = vpow2.f32 %v493_v48  ;;  %292 = vadd.xlane.f32.xlu1 %v291_v50 }
 0x415   :  { %v7648_v51 = vpop.eup %7647 }
 0x416   :  { %v495_v52 = vsel %vm278_vm5, %v7648_v51, 0.0 }
 0x417   :  { %496 = vadd.xlane.f32.xlu1 %v495_v52 }
 0x419   :  { %v7650_v54 = vpop.eup %7649 }
 0x41a   :  { %v498_v55 = vsel %vm278_vm5, %v7650_v54, 0.0 }
 0x41b   :  { %499 = vadd.xlane.f32.xlu0 %v498_v55 }
 0x428   :  { %7495 = vrot.lane.b32.xlu1 %v7953_v46, %s7833_s29 }
 0x42c   :  { %7505 = vrot.lane.b32.xlu1 %v7953_v46, %s7834_s30 }
 0x430   :  { %1041 = vrot.lane.b32.xlu1 %v7947_v45, %s7835_s10 }
 0x431   :  { %7500 = vrot.lane.b32.xlu0 %v7953_v46, %s7836_s11 }
 0x434   :  { %1043 = vrot.lane.b32.xlu1 %v7945_v43, %s7835_s10 }
 0x450   :  { %850 = vmax.xlane.f32.xlu0 %v849_v59 }
 0x458   :  { %853 = vmax.xlane.f32.xlu1 %v852_v61 }
 0x49b   :  { %v296_v62 = vpop.xlane.xlu0 %295 }
 0x49c   :  { %v293_v45 = vpop.xlane.xlu1 %292 }
 0x49d   :  { %7651 = vrcp.f32 %v293_v45 }
 0x49e   :  { %7653 = vrcp.f32 %v296_v62 }
 0x4a4   :  { %v497_v63 = vpop.xlane.xlu1 %496 }
 0x4a5   :  { %7655 = vrcp.f32 %v497_v63 }
 0x4a7   :  { %v7652_v2 = vpop.eup %7651 }
 0x4a8   :  { %v500_v43 = vpop.xlane.xlu0 %499  ;;  %v7496_v3 = vpop.permute.xlu1 %7495  ;;  %v298_v4 = vmul.f32 %v7652_v2, %v7646_v47 }
 0x4a9   :  { %7657 = vrcp.f32 %v500_v43  ;;  %v7498_v5 = vunpack.i.h.bf16 %v7496_v3  ;;  %v7497_v6 = vunpack.i.l.bf16 %v7496_v3  ;;  %v7654_v9 = vpop.eup %7653 }
 0x4aa   :  { %6706 = vmatprep.mubr.msk.f32.mxu0 %vm278_vm5, %v298_v4  ;;  %v300_v19 = vmul.f32 %v7654_v9, %v7644_v44  ;;  %v182_v4 = vld [vmem:[%s8837_s3 + $0x10] sm:$0xff] }
 0x4ab   :  { %v7166_v7 = vpack.c.bf16 %v7498_v5, %v7497_v6 }
 0x4ac   :  { %v7501_v11 = vpop.permute.xlu0 %7500  ;;  %v7506_v12 = vpop.permute.xlu1 %7505 }
 0x4ad   :  { %v7503_v13 = vunpack.i.h.bf16 %v7501_v11  ;;  %v7502_v14 = vunpack.i.l.bf16 %v7501_v11  ;;  %v7508_v15 = vunpack.i.h.bf16 %v7506_v12  ;;  %v7507_v16 = vunpack.i.l.bf16 %v7506_v12  ;;  %7167 = vmatprep.subr.bf16.mxu0 %v7166_v7 }
 0x4ae   :  { %7169 = vmatpush3.bf16.msra.mxu0 %v7166_v7 }
 0x4af   :  { %v7656_v17 = vpop.eup %7655  ;;  %v7190_v18 = vpack.c.bf16 %v7508_v15, %v7507_v16  ;;  %v7176_v20 = vpack.c.bf16 %v7503_v13, %v7502_v14 }
 0x4b0   :  { %v1042_v21 = vpop.permute.xlu1 %1041  ;;  %v502_v22 = vmul.f32 %v7656_v17, %v7648_v51 }
 0x4b1   :  { %6707 = vmatmul.mubr.msk.f32.vlgmr.msra.gmra.mrb[0].mxu0 %vm278_vm5, %v300_v19  ;;  %7177 = vmatprep.subr.bf16.mxu0 %v7176_v20 }
 0x4b2   :  { %7192 = vmatprep.subr.msk.bf16.mxu1 %vm7971_vm2, %v7190_v18  ;;  %6756 = vmatprep.mubr.msk.f32.mxu1 %vm190_vm1, %v1042_v21 }
 0x4b3   :  { %v7658_v23 = vpop.eup %7657  ;;  %7179 = vmatpush3.bf16.msra.mxu0 %v7176_v20  ;;  %6720 = vmatprep.mubr.msk.f32.mxu0 %vm278_vm5, %v502_v22 }
 0x4b4   :  { %7195 = vmatpush3.bf16.xpose.msk.msra.mxu1 %vm7971_vm2, %v7190_v18  ;;  %v504_v24 = vmul.f32 %v7658_v23, %v7650_v54  ;;  %v1044_v25 = vpop.permute.xlu1 %1043  ;;  %6723 = vmatprep.subr.mxu0 %v181_v40 }
 0x4b6   :  { %6721 = vmatmul.mubr.msk.f32.vlgmr.msra.gmra.mrb[2].mxu0 %vm278_vm5, %v504_v24 }
 0x4b7   :  { %6724 = vmatpush3.msra.mxu0 %v181_v40 }
 0x4b8   :  { %6728 = vmatprep.subr.mxu0 %v180_v41 }
 0x4bb   :  { %6757 = vmatmul.mubr.msk.f32.vlgmr.msra.gmra.mrb[8].mxu1 %vm190_vm1, %v1044_v25  ;;  %v183_v25 = vld [vmem:[%s8837_s3 + $0x18] sm:$0xff] }
 0x4dd   :  { %v851_v27 = vpop.xlane.xlu0 %850 }
 0x4de   :  { %v855_v31 = vsub.f32 %v847_v57, %v851_v27 }
 0x4e0   :  { %v857_v34 = vmul.f32 1.442695, %v855_v31 }
 0x4e5   :  { %v854_v32 = vpop.xlane.xlu1 %853 }
 0x4e6   :  { %v856_v33 = vsub.f32 %v848_v60, %v854_v32 }
 0x4e8   :  { %v859_v35 = vmul.f32 1.442695, %v856_v33 }
 0x4ea   :  { %7659 = vpow2.f32 %v859_v35  ;;  %v8073_v35 = vsub.s32 2, %v7923_v26 }
 0x4eb   :  { %7661 = vpow2.f32 %v857_v34 }
 0x4f4   :  { %v7660_v36 = vpop.eup %7659 }
 0x4f5   :  { %v864_v37 = vsel %vm278_vm5, %v7660_v36, 0.0  ;;  %v7662_v38 = vpop.eup %7661 }
 0x4f6   :  { %865 = vadd.xlane.f32.xlu0 %v864_v37  ;;  %v861_v39 = vsel %vm278_vm5, %v7662_v38, 0.0 }
 0x4fa   :  { %862 = vadd.xlane.f32.xlu0 %v861_v39 }
 0x510   :  { %7510 = vrot.lane.b32.xlu0 %v7953_v46, %s7837_s15 }
 0x583   :  { %v866_v42 = vpop.xlane.xlu0 %865 }
 0x584   :  { %v6708_v44 = vpop.f32.mrb[0].mxu0 }
 0x585   :  { %v379_v47 = vpop.f32.mrb[1].mxu0 }
 0x587   :  { %v863_v48 = vpop.xlane.xlu0 %862 }
 0x588   :  { %7663 = vrcp.f32 %v863_v48 }
 0x589   :  { %7665 = vrcp.f32 %v866_v42  ;;  %v6722_v49 = vpop.f32.mrb[2].mxu0 }
 0x58a   :  { %v583_v50 = vpop.f32.mrb[3].mxu0 }
 0x58b   :  { %v7511_v51 = vpop.permute.xlu0 %7510  ;;  %6725 = vmatprep.mubr.msk.f32.mxu0 %vm190_vm1, %v583_v50 }
 0x58c   :  { %v7513_v52 = vunpack.i.h.bf16 %v7511_v51  ;;  %v7512_v54 = vunpack.i.l.bf16 %v7511_v51  ;;  %6726 = vmatmul.mubr.msk.f32.vlgmr.msra.gmra.mrb[4].mxu0 %vm190_vm1, %v6722_v49 }
 0x58d   :  { %6730 = vmatprep.mubr.msk.f32.mxu0 %vm190_vm1, %v379_v47  ;;  %6729 = vmatpush3.msra.mxu0 %v180_v41 }
 0x58e   :  { %v6758_v55 = vpop.f32.mrb[8].mxu1  ;;  %v7186_v56 = vpack.c.bf16 %v7513_v52, %v7512_v54 }
 0x58f   :  { %v1123_v57 = vpop.f32.mrb[9].mxu1  ;;  %v1133_v58 = vmul.f32 0.35355338, %v6758_v55 }
 0x590   :  { %v1132_v59 = vmul.f32 0.35355338, %v1123_v57  ;;  %7187 = vmatprep.subr.bf16.mxu0 %v7186_v56  ;;  %v1374_v57 = vld [vmem:[%s8838_s4] sm:$0xff] }
 0x591   :  { %v1135_v2 = vadd.f32 %v1133_v58, %v7996_v8  ;;  %v1375_v58 = vld [vmem:[%s8838_s4 + $0x8] sm:$0xff] }
 0x592   :  { %v7664_v60 = vpop.eup %7663  ;;  %v1134_v61 = vadd.f32 %v1132_v59, %v7998_v10  ;;  %v7200_v59 = vpack.c.bf16 %v1375_v58, %v1374_v57 }
 0x593   :  { %v7666_v45 = vpop.eup %7665  ;;  %v868_v62 = vmul.f32 %v7664_v60, %v7662_v38  ;;  %v1139_v3 = vsel %vm278_vm5, %v1135_v2, -inf  ;;  %v1376_v60 = vld [vmem:[%s8838_s4 + $0x10] sm:$0xff] }
 0x594   :  { %v1136_v63 = vsel %vm278_vm5, %v1134_v61, -inf  ;;  %6731 = vmatmul.mubr.msk.f32.vlgmr.msra.gmra.mrb[4].mxu0 %vm190_vm1, %v6708_v44  ;;  %v870_v43 = vmul.f32 %v7666_v45, %v7660_v36  ;;  %v1333_v36 = vrot.slane %v7931_v29, %v8073_v35  ;;  %7201 = vmatprep.subr.bf16.mxu1 %v7200_v59 }
 0x595   :  { %1137 = vmax.xlane.f32.xlu1 %v1136_v63  ;;  %7189 = vmatpush3.bf16.msra.mxu0 %v7186_v56  ;;  %v1469_v63 = vld [vmem:[%s8840_s6 + $0x8] sm:$0xff] }
 0x596   :  { %6744 = vmatprep.mubr.msk.f32.mxu0 %vm278_vm5, %v868_v62  ;;  %6747 = vmatprep.subr.mxu0 %v182_v4  ;;  %v1468_v62 = vld [vmem:[%s8840_s6] sm:$0xff] }
 0x597   :  { %7203 = vmatpush3.bf16.msra.mxu1 %v7200_v59 }
 0x598   :  { %6745 = vmatmul.mubr.msk.f32.vlgmr.msra.gmra.mrb[6].mxu0 %vm278_vm5, %v870_v43  ;;  %v7208_v43 = vpack.c.bf16 %v1469_v63, %v1468_v62  ;;  %v6231_v62 = vld [vmem:[%s8835_s1 + $0x28] sm:$0xff] }
 0x599   :  { %1140 = vmax.xlane.f32.xlu1 %v1139_v3  ;;  %6748 = vmatpush3.msra.mxu0 %v182_v4  ;;  %v1471_v3 = vld [vmem:[%s8840_s6 + $0x18] sm:$0xff] }
 0x622   :  { %v1138_v5 = vpop.xlane.xlu1 %1137 }
 0x623   :  { %v1142_v6 = vsub.f32 %v1134_v61, %v1138_v5  ;;  %v1377_v61 = vld [vmem:[%s8838_s4 + $0x18] sm:$0xff]  ;;  %v1472_v5 = vld [vmem:[%s8840_s6 + $0x20] sm:$0xff] }
 0x624   :  { %v7204_v45 = vpack.c.bf16 %v1377_v61, %v1376_v60 }
 0x625   :  { %v1144_v11 = vmul.f32 1.442695, %v1142_v6  ;;  %v1473_v6 = vld [vmem:[%s8840_s6 + $0x28] sm:$0xff] }
 0x626   :  { %v1141_v7 = vpop.xlane.xlu1 %1140  ;;  %7205 = vmatprep.subr.bf16.mxu1 %v7204_v45 }
 0x627   :  { %v1143_v9 = vsub.f32 %v1135_v2, %v1141_v7  ;;  %7207 = vmatpush3.bf16.msra.mxu1 %v7204_v45  ;;  %v1470_v2 = vld [vmem:[%s8840_s6 + $0x10] sm:$0xff]  ;;  %v7216_v7 = vpack.c.bf16 %v1473_v6, %v1472_v5  ;;  %v6230_v45 = vld [vmem:[%s8835_s1 + $0x20] sm:$0xff] }
 0x628   :  { %v7212_v4 = vpack.c.bf16 %v1471_v3, %v1470_v2  ;;  %v7224_v63 = vpack.c.bf16 %v6231_v62, %v6230_v45  ;;  %v6232_v2 = vld [vmem:[%s8835_s1 + $0x30] sm:$0xff] }
 0x629   :  { %v1146_v12 = vmul.f32 1.442695, %v1143_v9 }
 0x62a   :  { %7225 = vmatprep.subr.bf16.mxu1 %v7224_v63 }
 0x62b   :  { %7667 = vpow2.f32 %v1146_v12 }
 0x62c   :  { %7669 = vpow2.f32 %v1144_v11 }
 0x635   :  { %v7668_v13 = vpop.eup %7667 }
 0x636   :  { %v1151_v14 = vsel %vm278_vm5, %v7668_v13, 0.0  ;;  %v7670_v15 = vpop.eup %7669 }
 0x637   :  { %1152 = vadd.xlane.f32.xlu1 %v1151_v14  ;;  %v1148_v16 = vsel %vm278_vm5, %v7670_v15, 0.0 }
 0x63b   :  { %1149 = vadd.xlane.f32.xlu1 %v1148_v16  ;;  %v8122_v16 = vsub.s32 3, %v7923_v26 }
 0x64c   :  { %7515 = vrot.lane.b32.xlu1 %v7953_v46, %s7838_s18 }
 0x66b   :  { %v6746_v17 = vpop.f32.mrb[6].mxu0 }
 0x66c   :  { %v949_v18 = vpop.f32.mrb[7].mxu0 }
 0x66d   :  { %6749 = vmatprep.mubr.msk.f32.mxu0 %vm190_vm1, %v949_v18  ;;  %v1365_v18 = vrot.slane %v7931_v29, %v8122_v16 }
 0x66e   :  { %6750 = vmatmul.mubr.msk.f32.vlgmr.msra.gmra.mrb[4].mxu0 %vm190_vm1, %v6746_v17  ;;  %v8125_v17 = vsub.s32 4, %v7923_v26 }
 0x6c4   :  { %v1153_v19 = vpop.xlane.xlu1 %1152 }
 0x6c5   :  { %7671 = vrcp.f32 %v1153_v19 }
 0x6c8   :  { %v1150_v20 = vpop.xlane.xlu1 %1149 }
 0x6c9   :  { %7673 = vrcp.f32 %v1150_v20 }
 0x6cc   :  { %v7516_v21 = vpop.permute.xlu1 %7515 }
 0x6cd   :  { %v7518_v22 = vunpack.i.h.bf16 %v7516_v21  ;;  %v7517_v23 = vunpack.i.l.bf16 %v7516_v21  ;;  %v1371_v21 = vrot.slane %v7931_v29, %v8125_v17 }
 0x6cf   :  { %v7196_v24 = vpack.c.bf16 %v7518_v22, %v7517_v23  ;;  %v7672_v46 = vpop.eup %7671 }
 0x6d0   :  { %v1157_v32 = vmul.f32 %v7672_v46, %v7668_v13 }
 0x6d1   :  { %7197 = vmatprep.subr.bf16.mxu0 %v7196_v24 }
 0x6d2   :  { %7199 = vmatpush3.bf16.msra.mxu0 %v7196_v24 }
 0x6d3   :  { %v7674_v27 = vpop.eup %7673  ;;  %6766 = vmatprep.subr.mxu0 %v183_v25 }
 0x6d4   :  { %v1155_v31 = vmul.f32 %v7674_v27, %v7670_v15 }
 0x6d6   :  { %6763 = vmatprep.mubr.msk.f32.mxu0 %vm278_vm5, %v1155_v31  ;;  %v1474_v31 = vld [vmem:[%s8840_s6 + $0x30] sm:$0xff] }
 0x6d7   :  { %6764 = vmatmul.mubr.msk.f32.vlgmr.msra.gmra.mrb[8].mxu0 %vm278_vm5, %v1157_v32  ;;  %v1475_v32 = vld [vmem:[%s8840_s6 + $0x38] sm:$0xff] }
 0x6d8   :  { %6767 = vmatpush3.msra.mxu0 %v183_v25 }
 0x6d9   :  { %7209 = vmatprep.subr.bf16.mxu0 %v7208_v43 }
 0x7aa   :  { %v6765_v33 = vpop.f32.mrb[8].mxu0 }
 0x7ab   :  { %v1236_v34 = vpop.f32.mrb[9].mxu0 }
 0x7ac   :  { %6768 = vmatprep.mubr.msk.f32.mxu0 %vm190_vm1, %v1236_v34  ;;  %v6224_v34 = vld [vmem:[%s8839_s5] ss:$0 sm:$0xff] }
 0x7ad   :  { %6769 = vmatmul.mubr.msk.f32.vlgmr.msra.gmra.mrb[4].mxu0 %vm190_vm1, %v6765_v33  ;;  %v7220_v33 = vpack.c.bf16 %v1475_v32, %v1474_v31 }
 0x7ae   :  { %7211 = vmatpush3.bf16.msra.mxu0 %v7208_v43  ;;  %v6233_v43 = vld [vmem:[%s8835_s1 + $0x38] sm:$0xff] }
 0x7af   :  { %7213 = vmatprep.subr.bf16.mxu0 %v7212_v4  ;;  %v7228_v3 = vpack.c.bf16 %v6233_v43, %v6232_v2 }
 0x7b2   :  { %7215 = vmatpush3.bf16.msra.mxu0 %v7212_v4 }
 0x7b3   :  { %7217 = vmatprep.subr.bf16.mxu0 %v7216_v7 }
 0x7b6   :  { %7219 = vmatpush3.bf16.msra.mxu0 %v7216_v7 }
 0x7b7   :  { %7221 = vmatprep.subr.bf16.mxu0 %v7220_v33 }
 0x7ba   :  { %7223 = vmatpush3.bf16.msra.mxu0 %v7220_v33 }
 0x880   :  { %v6770_v37 = vpop.f32.mrb[4].mxu0 }
 0x881   :  { %v1329_v38 = vadd.f32 %v6770_v37, %v7900_v1  ;;  %v1317_v39 = vpop.f32.mrb[5].mxu0 }
 0x882   :  { %v1328_v40 = vadd.f32 %v1317_v39, %v7895_v0 }
 0x883   :  { %v8079_v41 = vadd.f32 %v1333_v36, %v1329_v38 }
 0x884   :  { %v8081_v42 = vadd.f32 %v1333_v36, %v1328_v40 }
 0x885   :  { %v1339_v44 = vsel %vm48_vm0, %v8079_v41, 0.0 }
 0x886   :  { %1340 = vadd.xlane.f32.xlu1 %v1339_v44  ;;  %v1336_v47 = vsel %vm48_vm0, %v8081_v42, 0.0 }
 0x887   :  { %1337 = vadd.xlane.f32.xlu0 %v1336_v47  ;;  %v8145_v47 = vsub.s32 5, %v7923_v26 }
 0x913   :  { %v1341_v48 = vpop.xlane.xlu1 %1340 }
 0x914   :  { %v1343_v49 = vmul.f32 0.03125, %v1341_v48  ;;  %v1338_v50 = vpop.xlane.xlu0 %1337 }
 0x915   :  { %v1342_v51 = vmul.f32 0.03125, %v1338_v50 }
 0x916   :  { %v1345_v1 = vsub.f32 %v8079_v41, %v1343_v49  ;;  %v1563_v49 = vrot.slane %v7931_v29, %v8145_v47 }
 0x917   :  { %v1344_v0 = vsub.f32 %v8081_v42, %v1342_v51 }
 0x918   :  { %v1347_v55 = vmul.f32 %v1345_v1, %v1345_v1 }
 0x919   :  { %v1346_v52 = vmul.f32 %v1344_v0, %v1344_v0 }
 0x91a   :  { %v1351_v56 = vsel %vm48_vm0, %v1347_v55, 0.0 }
 0x91b   :  { %v1348_v54 = vsel %vm48_vm0, %v1346_v52, 0.0 }
 0x91c   :  { %1349 = vadd.xlane.f32.xlu0 %v1348_v54 }
 0x920   :  { %1352 = vadd.xlane.f32.xlu0 %v1351_v56 }
 0x9a9   :  { %v1350_v9 = vpop.xlane.xlu0 %1349 }
 0x9aa   :  { %v1354_v11 = vmul.f32 0.03125, %v1350_v9 }
 0x9ac   :  { %v1356_v12 = vadd.f32 1e-05, %v1354_v11 }
 0x9ad   :  { %v1353_v13 = vpop.xlane.xlu0 %1352 }
 0x9ae   :  { %7675 = vrsqrt.f32 %v1356_v12  ;;  %v1355_v14 = vmul.f32 0.03125, %v1353_v13  ;;  %v8178_v12 = vld [vmem:[%s8841_s7 + $0x8] sm:$0x3f] }
 0x9af   :  { %v1597_v13 = vrot.slane %v8178_v12, %v7926_v28 }
 0x9b0   :  { %v1357_v15 = vadd.f32 1e-05, %v1355_v14 }
 0x9b2   :  { %7677 = vrsqrt.f32 %v1357_v15 }
 0x9b8   :  { %v7676_v19 = vpop.eup %7675 }
 0x9b9   :  { %v1360_v20 = vmul.f32 %v7676_v19, %v1344_v0 }
 0x9bb   :  { %v1366_v22 = vmul.f32 %v1365_v18, %v1360_v20 }
 0x9bc   :  { %v7678_v23 = vpop.eup %7677 }
 0x9bd   :  { %v1361_v24 = vmul.f32 %v7678_v23, %v1345_v1  ;;  %v1372_v25 = vadd.f32 %v1371_v21, %v1366_v22 }
 0x9bf   :  { %v1367_v46 = vmul.f32 %v1365_v18, %v1361_v24  ;;  %6779 = vmatprep.mubr.msk.f32.mxu1 %vm48_vm0, %v1372_v25  ;;  %v1603_v18 = vrot.slane %v8178_v12, %v7934_v30  ;;  %v6235_v25 = vld [vmem:[%s8836_s2 + $0x1] ss:$0 sm:$0xff] }
 0x9c1   :  { %v1373_v27 = vadd.f32 %v1371_v21, %v1367_v46 }
 0x9c3   :  { %6780 = vmatmul.mubr.msk.f32.vlgmr.msra.gmra.mrb[10].mxu1 %vm48_vm0, %v1373_v27 }
 0x9c4   :  { %7227 = vmatpush3.bf16.msra.mxu1 %v7224_v63 }
 0x9c5   :  { %7229 = vmatprep.subr.bf16.mxu1 %v7228_v3 }
 0x9c8   :  { %7231 = vmatpush3.bf16.msra.mxu1 %v7228_v3 }
 0xa96   :  { %v6781_v36 = vpop.f32.mrb[10].mxu1 }
 0xa97   :  { %v1463_v37 = vadd.f32 %v6781_v36, %v6224_v34  ;;  %v1457_v38 = vpop.f32.mrb[11].mxu1 }
 0xa98   :  { %v1458_v39 = vadd.f32 %v6224_v34, %v1457_v38 }
 0xa99   :  { %v1467_v44 = vmax.f32 %v1463_v37, 0.0 }
 0xa9a   :  { %v1466_v40 = vmax.f32 %v1458_v39, 0.0 }
 0xa9c   :  { %6798 = vmatprep.mubr.msk.f32.mxu0 %vm1476_vm6, %v1466_v40 }
 0xa9d   :  { %6799 = vmatmul.mubr.msk.f32.vlgmr.msra.gmra.mrb[10].mxu0 %vm1476_vm6, %v1467_v44 }
 0xb70   :  { %v6800_v48 = vpop.f32.mrb[10].mxu0 }
 0xb71   :  { %v1549_v50 = vpop.f32.mrb[11].mxu0  ;;  %v1559_v51 = vadd.f32 %v6800_v48, %v8079_v41 }
 0xb72   :  { %v1558_v1 = vadd.f32 %v1549_v50, %v8081_v42 }
 0xb73   :  { %v8153_v52 = vadd.f32 %v1563_v49, %v1559_v51 }
 0xb74   :  { %v8151_v0 = vadd.f32 %v1563_v49, %v1558_v1 }
 0xb75   :  { %v1571_v26 = vsel %vm48_vm0, %v8153_v52, 0.0 }
 0xb76   :  { %v1568_v54 = vsel %vm48_vm0, %v8151_v0, 0.0 }
 0xb77   :  { %1569 = vadd.xlane.f32.xlu0 %v1568_v54 }
 0xb7b   :  { %1572 = vadd.xlane.f32.xlu0 %v1571_v26 }
 0xc04   :  { %v1570_v55 = vpop.xlane.xlu0 %1569 }
 0xc05   :  { %v1574_v56 = vmul.f32 0.03125, %v1570_v55 }
 0xc07   :  { %v1576_v29 = vsub.f32 %v8151_v0, %v1574_v56 }
 0xc08   :  { %v1573_v57 = vpop.xlane.xlu0 %1572 }
 0xc09   :  { %v1575_v41 = vmul.f32 0.03125, %v1573_v57  ;;  %v1578_v58 = vmul.f32 %v1576_v29, %v1576_v29 }
 0xc0b   :  { %v1577_v42 = vsub.f32 %v8153_v52, %v1575_v41  ;;  %v1580_v59 = vsel %vm48_vm0, %v1578_v58, 0.0 }
 0xc0c   :  { %1581 = vadd.xlane.f32.xlu0 %v1580_v59 }
 0xc0d   :  { %v1579_v60 = vmul.f32 %v1577_v42, %v1577_v42 }
 0xc0f   :  { %v1583_v61 = vsel %vm48_vm0, %v1579_v60, 0.0 }
 0xc10   :  { %1584 = vadd.xlane.f32.xlu1 %v1583_v61 }
 0xc99   :  { %v1582_v4 = vpop.xlane.xlu0 %1581 }
 0xc9a   :  { %v1586_v5 = vmul.f32 0.03125, %v1582_v4 }
 0xc9c   :  { %v1588_v6 = vadd.f32 1e-05, %v1586_v5 }
 0xc9d   :  { %v1585_v7 = vpop.xlane.xlu1 %1584 }
 0xc9e   :  { %7679 = vrsqrt.f32 %v1588_v6  ;;  %v1587_v9 = vmul.f32 0.03125, %v1585_v7 }
 0xca0   :  { %v1589_v11 = vadd.f32 1e-05, %v1587_v9 }
 0xca2   :  { %7681 = vrsqrt.f32 %v1589_v11 }
 0xca8   :  { %v7680_v14 = vpop.eup %7679 }
 0xca9   :  { %v1592_v15 = vmul.f32 %v7680_v14, %v1576_v29 }
 0xcab   :  { %v1598_v19 = vmul.f32 %v1597_v13, %v1592_v15 }
 0xcac   :  { %v7682_v20 = vpop.eup %7681 }
 0xcad   :  { %v1593_v21 = vmul.f32 %v7682_v20, %v1577_v42  ;;  %v1604_v22 = vadd.f32 %v1603_v18, %v1598_v19 }
 0xcaf   :  { %v1599_v23 = vmul.f32 %v1597_v13, %v1593_v21  ;;  %6809 = vmatprep.mubr.msk.f32.mxu1 %vm48_vm0, %v1604_v22 }
 0xcb1   :  { %v1605_v24 = vadd.f32 %v1603_v18, %v1599_v23 }
 0xcb3   :  { %6810 = vmatmul.mubr.msk.f32.vlgmr.msra.gmra.mrb[12].mxu1 %vm48_vm0, %v1605_v24 }
 0xd86   :  { %v6811_v46 = vpop.f32.mrb[12].mxu1 }
 0xd87   :  { %v8189_v27 = vadd.f32 %v6811_v46, %v6235_v25  ;;  %v1691_v31 = vpop.f32.mrb[13].mxu1 }
 0xd88   :  { %v8191_v32 = vadd.f32 %v6235_v25, %v1691_v31 }
 0xd8a   :  { %6816 = vmatprep.mubr.msk.f32.mxu1 %vm190_vm1, %v8191_v32  ;;  %v8197_v33 = vpack.i.bf16 %v8189_v27, %v8191_v32 }
 0xd8c   :  { %7525 = vrot.lane.b32.xlu1 %v8197_v33, %s7827_s24  ;;  %7520 = vrot.lane.b32.xlu0 %v8197_v33, %s7828_s25 }
 0xd90   :  { %1907 = vrot.lane.b32.xlu1 %v8191_v32, %s7829_s26  ;;  %7530 = vrot.lane.b32.xlu0 %v8197_v33, %s7830_s27 }
 0xd94   :  { %1909 = vrot.lane.b32.xlu1 %v8189_v27, %s7829_s26  ;;  %2275 = vrot.lane.b32.xlu0 %v8189_v27, %s7831_s28 }
 0xd98   :  { %2273 = vrot.lane.b32.xlu1 %v8191_v32, %s7831_s28 }
 0xdfe   :  { %v7526_v34 = vpop.permute.xlu1 %7525  ;;  %v7521_v36 = vpop.permute.xlu0 %7520 }
 0xdff   :  { %v7528_v37 = vunpack.i.h.bf16 %v7526_v34  ;;  %v7527_v38 = vunpack.i.l.bf16 %v7526_v34  ;;  %v7523_v39 = vunpack.i.h.bf16 %v7521_v36  ;;  %v7522_v40 = vunpack.i.l.bf16 %v7521_v36 }
 0xe01   :  { %v7232_v44 = vpack.c.bf16 %v7523_v39, %v7522_v40  ;;  %v7242_v48 = vpack.c.bf16 %v7528_v37, %v7527_v38 }
 0xe02   :  { %v7531_v49 = vpop.permute.xlu0 %7530  ;;  %v1908_v50 = vpop.permute.xlu1 %1907 }
 0xe03   :  { %7234 = vmatprep.subr.msk.bf16.mxu1 %vm7971_vm2, %v7232_v44  ;;  %v7533_v51 = vunpack.i.h.bf16 %v7531_v49  ;;  %v7532_v1 = vunpack.i.l.bf16 %v7531_v49 }
 0xe04   :  { %7237 = vmatpush3.bf16.xpose.msk.msra.mxu1 %vm7971_vm2, %v7232_v44 }
 0xe05   :  { %7244 = vmatprep.subr.msk.bf16.mxu1 %vm7971_vm2, %v7242_v48  ;;  %v7252_v54 = vpack.c.bf16 %v7533_v51, %v7532_v1 }
 0xe06   :  { %v1910_v26 = vpop.permute.xlu1 %1909  ;;  %v2276_v56 = vpop.permute.xlu0 %2275 }
 0xe0a   :  { %v2274_v55 = vpop.permute.xlu1 %2273 }
 0xe0b   :  { %6817 = vmatmul.mubr.msk.f32.vlgmr.msra.gmra.mrb[14].mxu1 %vm190_vm1, %v8189_v27 }
 0xe0c   :  { %7247 = vmatpush3.bf16.xpose.msk.msra.mxu1 %vm7971_vm2, %v7242_v48  ;;  %6830 = vmatprep.mubr.msk.f32.mxu1 %vm190_vm1, %v1908_v50 }
 0xe0d   :  { %7254 = vmatprep.subr.msk.bf16.mxu1 %vm7971_vm2, %v7252_v54 }
 0xe13   :  { %6831 = vmatmul.mubr.msk.f32.vlgmr.msra.gmra.mrb[16].mxu1 %vm190_vm1, %v1910_v26 }
 0xe14   :  { %7257 = vmatpush3.bf16.xpose.msk.msra.mxu1 %vm7971_vm2, %v7252_v54  ;;  %6854 = vmatprep.mubr.msk.f32.mxu1 %vm190_vm1, %v2274_v55 }
 0xe1b   :  { %6855 = vmatmul.mubr.msk.f32.vlgmr.msra.gmra.mrb[18].mxu1 %vm190_vm1, %v2276_v56 }
 0xede   :  { %v6818_v29 = vpop.f32.mrb[14].mxu1 }
 0xedf   :  { %v1795_v57 = vmul.f32 0.35355338, %v6818_v29  ;;  %v1785_v41 = vpop.f32.mrb[15].mxu1 }
 0xee0   :  { %v1794_v58 = vmul.f32 0.35355338, %v1785_v41 }
 0xee1   :  { %v1797_v42 = vadd.f32 %v1795_v57, %v7996_v8 }
 0xee2   :  { %v1796_v59 = vadd.f32 %v1794_v58, %v7998_v10 }
 0xee3   :  { %v1801_v60 = vsel %vm278_vm5, %v1797_v42, -inf }
 0xee4   :  { %1802 = vmax.xlane.f32.xlu0 %v1801_v60  ;;  %v1798_v61 = vsel %vm278_vm5, %v1796_v59, -inf }
 0xee5   :  { %1799 = vmax.xlane.f32.xlu1 %v1798_v61 }
 0xee6   :  { %v6832_v45 = vpop.f32.mrb[16].mxu1 }
 0xee7   :  { %v1989_v62 = vpop.f32.mrb[17].mxu1  ;;  %v1999_v63 = vmul.f32 0.35355338, %v6832_v45 }
 0xee8   :  { %v1998_v2 = vmul.f32 0.35355338, %v1989_v62 }
 0xee9   :  { %v2001_v4 = vadd.f32 %v1999_v63, %v7996_v8 }
 0xeea   :  { %v2000_v43 = vadd.f32 %v1998_v2, %v7998_v10 }
 0xeeb   :  { %v2005_v7 = vsel %vm278_vm5, %v2001_v4, -inf }
 0xeec   :  { %v2002_v3 = vsel %vm278_vm5, %v2000_v43, -inf }
 0xeed   :  { %2003 = vmax.xlane.f32.xlu0 %v2002_v3 }
 0xeee   :  { %v6856_v5 = vpop.f32.mrb[18].mxu1 }
 0xeef   :  { %v2355_v6 = vpop.f32.mrb[19].mxu1  ;;  %v2365_v48 = vmul.f32 0.35355338, %v6856_v5 }
 0xef0   :  { %v2364_v40 = vmul.f32 0.35355338, %v2355_v6 }
 0xef1   :  { %2006 = vmax.xlane.f32.xlu0 %v2005_v7  ;;  %v2367_v50 = vadd.f32 %v2365_v48, %v7996_v8 }
 0xef2   :  { %v2366_v44 = vadd.f32 %v2364_v40, %v7998_v10 }
 0xef3   :  { %v2371_v51 = vsel %vm278_vm5, %v2367_v50, -inf }
 0xef4   :  { %v2368_v49 = vsel %vm278_vm5, %v2366_v44, -inf }
 0xf71   :  { %v1803_v9 = vpop.xlane.xlu0 %1802 }
 0xf72   :  { %v1805_v11 = vsub.f32 %v1797_v42, %v1803_v9  ;;  %v1800_v13 = vpop.xlane.xlu1 %1799 }
 0xf73   :  { %v1804_v14 = vsub.f32 %v1796_v59, %v1800_v13 }
 0xf74   :  { %v1808_v15 = vmul.f32 1.442695, %v1805_v11 }
 0xf75   :  { %v1806_v18 = vmul.f32 1.442695, %v1804_v14 }
 0xf76   :  { %7683 = vpow2.f32 %v1808_v15 }
 0xf77   :  { %7685 = vpow2.f32 %v1806_v18 }
 0xf7a   :  { %v2004_v19 = vpop.xlane.xlu0 %2003 }
 0xf7b   :  { %v2008_v20 = vsub.f32 %v2000_v43, %v2004_v19 }
 0xf7d   :  { %v2010_v21 = vmul.f32 1.442695, %v2008_v20 }
 0xf7e   :  { %v2007_v22 = vpop.xlane.xlu0 %2006 }
 0xf7f   :  { %7687 = vpow2.f32 %v2010_v21  ;;  %v2009_v23 = vsub.f32 %v2001_v4, %v2007_v22 }
 0xf80   :  { %v7684_v24 = vpop.eup %7683 }
 0xf81   :  { %v7686_v25 = vpop.eup %7685  ;;  %v2012_v46 = vmul.f32 1.442695, %v2009_v23  ;;  %v1813_v31 = vsel %vm278_vm5, %v7684_v24, 0.0 }
 0xf82   :  { %1814 = vadd.xlane.f32.xlu0 %v1813_v31  ;;  %v1810_v34 = vsel %vm278_vm5, %v7686_v25, 0.0 }
 0xf83   :  { %7689 = vpow2.f32 %v2012_v46  ;;  %1811 = vadd.xlane.f32.xlu1 %v1810_v34 }
 0xf89   :  { %v7688_v36 = vpop.eup %7687 }
 0xf8a   :  { %v2014_v37 = vsel %vm278_vm5, %v7688_v36, 0.0 }
 0xf8b   :  { %2015 = vadd.xlane.f32.xlu1 %v2014_v37 }
 0xf8d   :  { %v7690_v38 = vpop.eup %7689 }
 0xf8e   :  { %v2017_v39 = vsel %vm278_vm5, %v7690_v38, 0.0 }
 0xf8f   :  { %2018 = vadd.xlane.f32.xlu0 %v2017_v39 }
 0xf9c   :  { %7535 = vrot.lane.b32.xlu1 %v8197_v33, %s7833_s29 }
 0xfa0   :  { %7545 = vrot.lane.b32.xlu1 %v8197_v33, %s7834_s30 }
 0xfa4   :  { %2560 = vrot.lane.b32.xlu1 %v8191_v32, %s7835_s10 }
 0xfa5   :  { %7540 = vrot.lane.b32.xlu0 %v8197_v33, %s7836_s11 }
 0xfa8   :  { %2562 = vrot.lane.b32.xlu1 %v8189_v27, %s7835_s10 }
 0xfc4   :  { %2369 = vmax.xlane.f32.xlu0 %v2368_v49 }
 0xfcc   :  { %2372 = vmax.xlane.f32.xlu1 %v2371_v51 }
0x100f   :  { %v1815_v32 = vpop.xlane.xlu0 %1814 }
0x1010   :  { %v1812_v1 = vpop.xlane.xlu1 %1811 }
0x1011   :  { %7691 = vrcp.f32 %v1812_v1 }
0x1012   :  { %7693 = vrcp.f32 %v1815_v32 }
0x1018   :  { %v2016_v54 = vpop.xlane.xlu1 %2015 }
0x1019   :  { %7695 = vrcp.f32 %v2016_v54 }
0x101b   :  { %v7692_v26 = vpop.eup %7691 }
0x101c   :  { %v2019_v27 = vpop.xlane.xlu0 %2018  ;;  %v7536_v55 = vpop.permute.xlu1 %7535  ;;  %v1817_v56 = vmul.f32 %v7692_v26, %v7686_v25  ;;  %v6238_v25 = vld [vmem:[%s8837_s3 + $0x20] sm:$0xff] }
0x101d   :  { %7697 = vrcp.f32 %v2019_v27  ;;  %v7538_v29 = vunpack.i.h.bf16 %v7536_v55  ;;  %v7537_v57 = vunpack.i.l.bf16 %v7536_v55  ;;  %v7694_v58 = vpop.eup %7693 }
0x101e   :  { %6823 = vmatprep.mubr.msk.f32.mxu0 %vm278_vm5, %v1817_v56  ;;  %v1819_v3 = vmul.f32 %v7694_v58, %v7684_v24  ;;  %v6239_v24 = vld [vmem:[%s8837_s3 + $0x28] sm:$0xff] }
0x101f   :  { %v7238_v41 = vpack.c.bf16 %v7538_v29, %v7537_v57 }
0x1020   :  { %v7541_v42 = vpop.permute.xlu0 %7540  ;;  %v7546_v59 = vpop.permute.xlu1 %7545 }
0x1021   :  { %v7543_v60 = vunpack.i.h.bf16 %v7541_v42  ;;  %v7542_v61 = vunpack.i.l.bf16 %v7541_v42  ;;  %v7548_v45 = vunpack.i.h.bf16 %v7546_v59  ;;  %v7547_v62 = vunpack.i.l.bf16 %v7546_v59  ;;  %7239 = vmatprep.subr.bf16.mxu0 %v7238_v41 }
0x1022   :  { %7241 = vmatpush3.bf16.msra.mxu0 %v7238_v41  ;;  %v6240_v41 = vld [vmem:[%s8837_s3 + $0x30] sm:$0xff] }
0x1023   :  { %v7696_v63 = vpop.eup %7695  ;;  %v7248_v2 = vpack.c.bf16 %v7543_v60, %v7542_v61  ;;  %v7262_v43 = vpack.c.bf16 %v7548_v45, %v7547_v62 }
0x1024   :  { %v2561_v4 = vpop.permute.xlu1 %2560  ;;  %v2021_v5 = vmul.f32 %v7696_v63, %v7688_v36 }
0x1025   :  { %6824 = vmatmul.mubr.msk.f32.vlgmr.msra.gmra.mrb[12].mxu0 %vm278_vm5, %v1819_v3  ;;  %7249 = vmatprep.subr.bf16.mxu0 %v7248_v2 }
0x1026   :  { %7264 = vmatprep.subr.msk.bf16.mxu1 %vm7971_vm2, %v7262_v43  ;;  %6873 = vmatprep.mubr.msk.f32.mxu1 %vm190_vm1, %v2561_v4 }
0x1027   :  { %v7698_v6 = vpop.eup %7697  ;;  %7251 = vmatpush3.bf16.msra.mxu0 %v7248_v2  ;;  %6837 = vmatprep.mubr.msk.f32.mxu0 %vm278_vm5, %v2021_v5 }
0x1028   :  { %7267 = vmatpush3.bf16.xpose.msk.msra.mxu1 %vm7971_vm2, %v7262_v43  ;;  %v2023_v7 = vmul.f32 %v7698_v6, %v7690_v38  ;;  %v2563_v9 = vpop.permute.xlu1 %2562  ;;  %6840 = vmatprep.subr.mxu0 %v6239_v24 }
0x102a   :  { %6838 = vmatmul.mubr.msk.f32.vlgmr.msra.gmra.mrb[14].mxu0 %vm278_vm5, %v2023_v7 }
0x102b   :  { %6841 = vmatpush3.msra.mxu0 %v6239_v24 }
0x102c   :  { %6845 = vmatprep.subr.mxu0 %v6238_v25 }
0x102f   :  { %6874 = vmatmul.mubr.msk.f32.vlgmr.msra.gmra.mrb[20].mxu1 %vm190_vm1, %v2563_v9 }
0x1051   :  { %v2370_v11 = vpop.xlane.xlu0 %2369 }
0x1052   :  { %v2374_v13 = vsub.f32 %v2366_v44, %v2370_v11 }
0x1054   :  { %v2376_v18 = vmul.f32 1.442695, %v2374_v13 }
0x1059   :  { %v2373_v14 = vpop.xlane.xlu1 %2372 }
0x105a   :  { %v2375_v15 = vsub.f32 %v2367_v50, %v2373_v14  ;;  %v6241_v14 = vld [vmem:[%s8837_s3 + $0x38] sm:$0xff] }
0x105c   :  { %v2378_v19 = vmul.f32 1.442695, %v2375_v15 }
0x105e   :  { %7699 = vpow2.f32 %v2378_v19 }
0x105f   :  { %7701 = vpow2.f32 %v2376_v18 }
0x1068   :  { %v7700_v20 = vpop.eup %7699 }
0x1069   :  { %v2383_v21 = vsel %vm278_vm5, %v7700_v20, 0.0  ;;  %v7702_v22 = vpop.eup %7701 }
0x106a   :  { %2384 = vadd.xlane.f32.xlu0 %v2383_v21  ;;  %v2380_v23 = vsel %vm278_vm5, %v7702_v22, 0.0 }
0x106e   :  { %2381 = vadd.xlane.f32.xlu0 %v2380_v23 }
0x1084   :  { %7550 = vrot.lane.b32.xlu0 %v8197_v33, %s7837_s15 }
0x10f7   :  { %v2385_v46 = vpop.xlane.xlu0 %2384 }
0x10f8   :  { %v6825_v31 = vpop.f32.mrb[12].mxu0 }
0x10f9   :  { %v1898_v34 = vpop.f32.mrb[13].mxu0 }
0x10fb   :  { %v2382_v36 = vpop.xlane.xlu0 %2381 }
0x10fc   :  { %7703 = vrcp.f32 %v2382_v36 }
0x10fd   :  { %7705 = vrcp.f32 %v2385_v46  ;;  %v6839_v37 = vpop.f32.mrb[14].mxu0 }
0x10fe   :  { %v2102_v38 = vpop.f32.mrb[15].mxu0 }
0x10ff   :  { %v7551_v39 = vpop.permute.xlu0 %7550  ;;  %6842 = vmatprep.mubr.msk.f32.mxu0 %vm190_vm1, %v2102_v38 }
0x1100   :  { %v7553_v40 = vunpack.i.h.bf16 %v7551_v39  ;;  %v7552_v44 = vunpack.i.l.bf16 %v7551_v39  ;;  %6843 = vmatmul.mubr.msk.f32.vlgmr.msra.gmra.mrb[16].mxu0 %vm190_vm1, %v6839_v37 }
0x1101   :  { %6847 = vmatprep.mubr.msk.f32.mxu0 %vm190_vm1, %v1898_v34  ;;  %6846 = vmatpush3.msra.mxu0 %v6238_v25 }
0x1102   :  { %v7258_v48 = vpack.c.bf16 %v7553_v40, %v7552_v44  ;;  %v6875_v49 = vpop.f32.mrb[20].mxu1 }
0x1103   :  { %v2642_v50 = vpop.f32.mrb[21].mxu1  ;;  %v2652_v51 = vmul.f32 0.35355338, %v6875_v49 }
0x1104   :  { %v2651_v1 = vmul.f32 0.35355338, %v2642_v50  ;;  %7259 = vmatprep.subr.bf16.mxu0 %v7258_v48 }
0x1105   :  { %v2654_v56 = vadd.f32 %v2652_v51, %v7996_v8 }
0x1106   :  { %v7704_v32 = vpop.eup %7703  ;;  %v2653_v54 = vadd.f32 %v2651_v1, %v7998_v10  ;;  %v6274_v1 = vld [vmem:[%s8838_s4 + $0x20] sm:$0xff] }
0x1107   :  { %v7706_v26 = vpop.eup %7705  ;;  %v2387_v27 = vmul.f32 %v7704_v32, %v7702_v22  ;;  %v2658_v57 = vsel %vm278_vm5, %v2654_v56, -inf  ;;  %v2852_v22 = vrot.slane %v8178_v12, %v8073_v35  ;;  %v6275_v32 = vld [vmem:[%s8838_s4 + $0x28] sm:$0xff] }
0x1108   :  { %v2655_v55 = vsel %vm278_vm5, %v2653_v54, -inf  ;;  %6848 = vmatmul.mubr.msk.f32.vlgmr.msra.gmra.mrb[16].mxu0 %vm190_vm1, %v6825_v31  ;;  %v2389_v29 = vmul.f32 %v7706_v26, %v7700_v20  ;;  %v6276_v26 = vld [vmem:[%s8838_s4 + $0x30] sm:$0xff] }
0x1109   :  { %2656 = vmax.xlane.f32.xlu1 %v2655_v55  ;;  %7261 = vmatpush3.bf16.msra.mxu0 %v7258_v48 }
0x110a   :  { %6861 = vmatprep.mubr.msk.f32.mxu0 %vm278_vm5, %v2387_v27  ;;  %6864 = vmatprep.subr.mxu0 %v6240_v41  ;;  %v6277_v27 = vld [vmem:[%s8838_s4 + $0x38] sm:$0xff] }
0x110b   :  { %v7276_v55 = vpack.c.bf16 %v6277_v27, %v6276_v26 }
0x110c   :  { %6862 = vmatmul.mubr.msk.f32.vlgmr.msra.gmra.mrb[18].mxu0 %vm278_vm5, %v2389_v29  ;;  %v6283_v29 = vld [vmem:[%s8840_s6 + $0x48] sm:$0xff] }
0x110d   :  { %2659 = vmax.xlane.f32.xlu1 %v2658_v57  ;;  %6865 = vmatpush3.msra.mxu0 %v6240_v41  ;;  %v6284_v57 = vld [vmem:[%s8840_s6 + $0x50] sm:$0xff] }
0x1196   :  { %v2657_v58 = vpop.xlane.xlu1 %2656 }
0x1197   :  { %v2661_v42 = vsub.f32 %v2653_v54, %v2657_v58  ;;  %v7272_v54 = vpack.c.bf16 %v6275_v32, %v6274_v1  ;;  %v6285_v58 = vld [vmem:[%s8840_s6 + $0x58] sm:$0xff] }
0x1199   :  { %v2663_v61 = vmul.f32 1.442695, %v2661_v42  ;;  %7273 = vmatprep.subr.bf16.mxu1 %v7272_v54  ;;  %v7284_v42 = vpack.c.bf16 %v6285_v58, %v6284_v57  ;;  %v6295_v57 = vld [vmem:[%s8835_s1 + $0x50] sm:$0xff] }
0x119a   :  { %v2660_v59 = vpop.xlane.xlu1 %2659  ;;  %7275 = vmatpush3.bf16.msra.mxu1 %v7272_v54 }
0x119b   :  { %v2662_v60 = vsub.f32 %v2654_v56, %v2660_v59  ;;  %7277 = vmatprep.subr.bf16.mxu1 %v7276_v55  ;;  %v6282_v56 = vld [vmem:[%s8840_s6 + $0x40] sm:$0xff] }
0x119c   :  { %v7280_v41 = vpack.c.bf16 %v6283_v29, %v6282_v56  ;;  %v6286_v59 = vld [vmem:[%s8840_s6 + $0x60] sm:$0xff]  ;;  %v6294_v56 = vld [vmem:[%s8835_s1 + $0x48] sm:$0xff] }
0x119d   :  { %v2665_v45 = vmul.f32 1.442695, %v2662_v60  ;;  %v6287_v60 = vld [vmem:[%s8840_s6 + $0x68] sm:$0xff] }
0x119e   :  { %7279 = vmatpush3.bf16.msra.mxu1 %v7276_v55  ;;  %v6293_v55 = vld [vmem:[%s8835_s1 + $0x40] sm:$0xff] }
0x119f   :  { %7707 = vpow2.f32 %v2665_v45  ;;  %v7296_v29 = vpack.c.bf16 %v6294_v56, %v6293_v55 }
0x11a0   :  { %7709 = vpow2.f32 %v2663_v61  ;;  %v7288_v61 = vpack.c.bf16 %v6287_v60, %v6286_v59 }
0x11a1   :  { %7297 = vmatprep.subr.bf16.mxu1 %v7296_v29 }
0x11a9   :  { %v7708_v62 = vpop.eup %7707 }
0x11aa   :  { %v2670_v63 = vsel %vm278_vm5, %v7708_v62, 0.0  ;;  %v7710_v2 = vpop.eup %7709 }
0x11ab   :  { %2671 = vadd.xlane.f32.xlu1 %v2670_v63  ;;  %v2667_v43 = vsel %vm278_vm5, %v7710_v2, 0.0 }
0x11af   :  { %2668 = vadd.xlane.f32.xlu1 %v2667_v43 }
0x11c0   :  { %7555 = vrot.lane.b32.xlu1 %v8197_v33, %s7838_s18 }
0x11df   :  { %v6863_v3 = vpop.f32.mrb[18].mxu0 }
0x11e0   :  { %v2468_v4 = vpop.f32.mrb[19].mxu0 }
0x11e1   :  { %6866 = vmatprep.mubr.msk.f32.mxu0 %vm190_vm1, %v2468_v4  ;;  %v2884_v4 = vrot.slane %v8178_v12, %v8122_v16 }
0x11e2   :  { %6867 = vmatmul.mubr.msk.f32.vlgmr.msra.gmra.mrb[16].mxu0 %vm190_vm1, %v6863_v3 }
0x1238   :  { %v2672_v5 = vpop.xlane.xlu1 %2671 }
0x1239   :  { %7711 = vrcp.f32 %v2672_v5 }
0x123c   :  { %v2669_v6 = vpop.xlane.xlu1 %2668 }
0x123d   :  { %7713 = vrcp.f32 %v2669_v6 }
0x1240   :  { %v7556_v7 = vpop.permute.xlu1 %7555 }
0x1241   :  { %v7558_v9 = vunpack.i.h.bf16 %v7556_v7  ;;  %v7557_v11 = vunpack.i.l.bf16 %v7556_v7  ;;  %v2890_v7 = vrot.slane %v8178_v12, %v8125_v17 }
0x1243   :  { %v7268_v13 = vpack.c.bf16 %v7558_v9, %v7557_v11  ;;  %v7712_v33 = vpop.eup %7711 }
0x1244   :  { %v2676_v19 = vmul.f32 %v7712_v33, %v7708_v62 }
0x1245   :  { %7269 = vmatprep.subr.bf16.mxu0 %v7268_v13 }
0x1246   :  { %7271 = vmatpush3.bf16.msra.mxu0 %v7268_v13 }
0x1247   :  { %v7714_v15 = vpop.eup %7713  ;;  %6883 = vmatprep.subr.mxu0 %v6241_v14 }
0x1248   :  { %v2674_v18 = vmul.f32 %v7714_v15, %v7710_v2 }
0x124a   :  { %6880 = vmatprep.mubr.msk.f32.mxu0 %vm278_vm5, %v2674_v18  ;;  %v6288_v18 = vld [vmem:[%s8840_s6 + $0x70] sm:$0xff] }
0x124b   :  { %6881 = vmatmul.mubr.msk.f32.vlgmr.msra.gmra.mrb[20].mxu0 %vm278_vm5, %v2676_v19  ;;  %v6289_v19 = vld [vmem:[%s8840_s6 + $0x78] sm:$0xff] }
0x124c   :  { %6884 = vmatpush3.msra.mxu0 %v6241_v14 }
0x124d   :  { %7281 = vmatprep.subr.bf16.mxu0 %v7280_v41 }
0x131e   :  { %v6882_v20 = vpop.f32.mrb[20].mxu0 }
0x131f   :  { %v2755_v21 = vpop.f32.mrb[21].mxu0 }
0x1320   :  { %6885 = vmatprep.mubr.msk.f32.mxu0 %vm190_vm1, %v2755_v21  ;;  %v6279_v21 = vld [vmem:[%s8839_s5 + $0x1] ss:$0 sm:$0xff] }
0x1321   :  { %6886 = vmatmul.mubr.msk.f32.vlgmr.msra.gmra.mrb[16].mxu0 %vm190_vm1, %v6882_v20  ;;  %v7292_v20 = vpack.c.bf16 %v6289_v19, %v6288_v18 }
0x1322   :  { %7283 = vmatpush3.bf16.msra.mxu0 %v7280_v41  ;;  %v6296_v41 = vld [vmem:[%s8835_s1 + $0x58] sm:$0xff] }
0x1323   :  { %7285 = vmatprep.subr.bf16.mxu0 %v7284_v42  ;;  %v7300_v58 = vpack.c.bf16 %v6296_v41, %v6295_v57 }
0x1326   :  { %7287 = vmatpush3.bf16.msra.mxu0 %v7284_v42 }
0x1327   :  { %7289 = vmatprep.subr.bf16.mxu0 %v7288_v61 }
0x132a   :  { %7291 = vmatpush3.bf16.msra.mxu0 %v7288_v61 }
0x132b   :  { %7293 = vmatprep.subr.bf16.mxu0 %v7292_v20 }
0x132e   :  { %7295 = vmatpush3.bf16.msra.mxu0 %v7292_v20 }
0x13f4   :  { %v6887_v23 = vpop.f32.mrb[16].mxu0 }
0x13f5   :  { %v2848_v24 = vadd.f32 %v6887_v23, %v8153_v52  ;;  %v2836_v25 = vpop.f32.mrb[17].mxu0 }
0x13f6   :  { %v2847_v46 = vadd.f32 %v2836_v25, %v8151_v0 }
0x13f7   :  { %v8307_v31 = vadd.f32 %v2852_v22, %v2848_v24 }
0x13f8   :  { %v8309_v34 = vadd.f32 %v2852_v22, %v2847_v46 }
0x13f9   :  { %v2858_v36 = vsel %vm48_vm0, %v8307_v31, 0.0 }
0x13fa   :  { %2859 = vadd.xlane.f32.xlu1 %v2858_v36  ;;  %v2855_v37 = vsel %vm48_vm0, %v8309_v34, 0.0 }
0x13fb   :  { %2856 = vadd.xlane.f32.xlu0 %v2855_v37 }
0x1487   :  { %v2860_v38 = vpop.xlane.xlu1 %2859 }
0x1488   :  { %v2862_v39 = vmul.f32 0.03125, %v2860_v38  ;;  %v2857_v40 = vpop.xlane.xlu0 %2856  ;;  %v3084_v38 = vrot.slane %v8178_v12, %v8145_v47 }
0x1489   :  { %v2861_v44 = vmul.f32 0.03125, %v2857_v40 }
0x148a   :  { %v2864_v52 = vsub.f32 %v8307_v31, %v2862_v39 }
0x148b   :  { %v2863_v0 = vsub.f32 %v8309_v34, %v2861_v44 }
0x148c   :  { %v2866_v50 = vmul.f32 %v2864_v52, %v2864_v52 }
0x148d   :  { %v2865_v48 = vmul.f32 %v2863_v0, %v2863_v0 }
0x148e   :  { %v2870_v51 = vsel %vm48_vm0, %v2866_v50, 0.0 }
0x148f   :  { %v2867_v49 = vsel %vm48_vm0, %v2865_v48, 0.0 }
0x1490   :  { %2868 = vadd.xlane.f32.xlu0 %v2867_v49 }
0x1494   :  { %2871 = vadd.xlane.f32.xlu0 %v2870_v51 }
0x151d   :  { %v2869_v45 = vpop.xlane.xlu0 %2868 }
0x151e   :  { %v2873_v62 = vmul.f32 0.03125, %v2869_v45 }
0x1520   :  { %v2875_v63 = vadd.f32 1e-05, %v2873_v62 }
0x1521   :  { %v2872_v2 = vpop.xlane.xlu0 %2871 }
0x1522   :  { %7715 = vrsqrt.f32 %v2875_v63  ;;  %v2874_v43 = vmul.f32 0.03125, %v2872_v2  ;;  %v8397_v63 = vld [vmem:[%s8841_s7 + $0x10] sm:$0x3f] }
0x1523   :  { %v3118_v2 = vrot.slane %v8397_v63, %v7926_v28 }
0x1524   :  { %v2876_v3 = vadd.f32 1e-05, %v2874_v43 }
0x1526   :  { %7717 = vrsqrt.f32 %v2876_v3 }
0x152c   :  { %v7716_v5 = vpop.eup %7715 }
0x152d   :  { %v2879_v6 = vmul.f32 %v7716_v5, %v2863_v0 }
0x152f   :  { %v2885_v9 = vmul.f32 %v2884_v4, %v2879_v6 }
0x1530   :  { %v7718_v11 = vpop.eup %7717 }
0x1531   :  { %v2880_v13 = vmul.f32 %v7718_v11, %v2864_v52  ;;  %v2891_v14 = vadd.f32 %v2890_v7, %v2885_v9 }
0x1533   :  { %v2886_v33 = vmul.f32 %v2884_v4, %v2880_v13  ;;  %6896 = vmatprep.mubr.msk.f32.mxu1 %vm48_vm0, %v2891_v14  ;;  %v3124_v4 = vrot.slane %v8397_v63, %v7934_v30  ;;  %v6298_v14 = vld [vmem:[%s8836_s2 + $0x2] ss:$0 sm:$0xff] }
0x1535   :  { %v2892_v15 = vadd.f32 %v2890_v7, %v2886_v33 }
0x1537   :  { %6897 = vmatmul.mubr.msk.f32.vlgmr.msra.gmra.mrb[22].mxu1 %vm48_vm0, %v2892_v15 }
0x1538   :  { %7299 = vmatpush3.bf16.msra.mxu1 %v7296_v29 }
0x1539   :  { %7301 = vmatprep.subr.bf16.mxu1 %v7300_v58 }
0x153c   :  { %7303 = vmatpush3.bf16.msra.mxu1 %v7300_v58 }
0x160a   :  { %v6898_v22 = vpop.f32.mrb[22].mxu1 }
0x160b   :  { %v2984_v23 = vadd.f32 %v6898_v22, %v6279_v21  ;;  %v2978_v24 = vpop.f32.mrb[23].mxu1 }
0x160c   :  { %v2979_v25 = vadd.f32 %v6279_v21, %v2978_v24 }
0x160d   :  { %v2988_v36 = vmax.f32 %v2984_v23, 0.0 }
0x160e   :  { %v2987_v46 = vmax.f32 %v2979_v25, 0.0 }
0x1610   :  { %6915 = vmatprep.mubr.msk.f32.mxu0 %vm1476_vm6, %v2987_v46 }
0x1611   :  { %6916 = vmatmul.mubr.msk.f32.vlgmr.msra.gmra.mrb[22].mxu0 %vm1476_vm6, %v2988_v36 }
0x16e4   :  { %v6917_v37 = vpop.f32.mrb[22].mxu0 }
0x16e5   :  { %v3070_v39 = vpop.f32.mrb[23].mxu0  ;;  %v3080_v40 = vadd.f32 %v6917_v37, %v8307_v31 }
0x16e6   :  { %v3079_v44 = vadd.f32 %v3070_v39, %v8309_v34 }
0x16e7   :  { %v8372_v0 = vadd.f32 %v3084_v38, %v3080_v40 }
0x16e8   :  { %v8370_v52 = vadd.f32 %v3084_v38, %v3079_v44 }
0x16e9   :  { %v3092_v49 = vsel %vm48_vm0, %v8372_v0, 0.0 }
0x16ea   :  { %v3089_v48 = vsel %vm48_vm0, %v8370_v52, 0.0 }
0x16eb   :  { %3090 = vadd.xlane.f32.xlu0 %v3089_v48 }
0x16ef   :  { %3093 = vadd.xlane.f32.xlu0 %v3092_v49 }
0x1778   :  { %v3091_v50 = vpop.xlane.xlu0 %3090 }
0x1779   :  { %v3095_v51 = vmul.f32 0.03125, %v3091_v50 }
0x177b   :  { %v3097_v12 = vsub.f32 %v8370_v52, %v3095_v51 }
0x177c   :  { %v3094_v1 = vpop.xlane.xlu0 %3093 }
0x177d   :  { %v3096_v31 = vmul.f32 0.03125, %v3094_v1  ;;  %v3099_v32 = vmul.f32 %v3097_v12, %v3097_v12 }
0x177f   :  { %v3098_v34 = vsub.f32 %v8372_v0, %v3096_v31  ;;  %v3101_v54 = vsel %vm48_vm0, %v3099_v32, 0.0 }
0x1780   :  { %3102 = vadd.xlane.f32.xlu0 %v3101_v54 }
0x1781   :  { %v3100_v26 = vmul.f32 %v3098_v34, %v3098_v34 }
0x1783   :  { %v3104_v27 = vsel %vm48_vm0, %v3100_v26, 0.0 }
0x1784   :  { %3105 = vadd.xlane.f32.xlu1 %v3104_v27 }
0x180d   :  { %v3103_v42 = vpop.xlane.xlu0 %3102 }
0x180e   :  { %v3107_v59 = vmul.f32 0.03125, %v3103_v42 }
0x1810   :  { %v3109_v60 = vadd.f32 1e-05, %v3107_v59 }
0x1811   :  { %v3106_v61 = vpop.xlane.xlu1 %3105 }
0x1812   :  { %7719 = vrsqrt.f32 %v3109_v60  ;;  %v3108_v45 = vmul.f32 0.03125, %v3106_v61 }
0x1814   :  { %v3110_v62 = vadd.f32 1e-05, %v3108_v45 }
0x1816   :  { %7721 = vrsqrt.f32 %v3110_v62 }
0x181c   :  { %v7720_v43 = vpop.eup %7719 }
0x181d   :  { %v3113_v3 = vmul.f32 %v7720_v43, %v3097_v12 }
0x181f   :  { %v3119_v5 = vmul.f32 %v3118_v2, %v3113_v3 }
0x1820   :  { %v7722_v6 = vpop.eup %7721 }
0x1821   :  { %v3114_v7 = vmul.f32 %v7722_v6, %v3098_v34  ;;  %v3125_v9 = vadd.f32 %v3124_v4, %v3119_v5 }
0x1823   :  { %v3120_v11 = vmul.f32 %v3118_v2, %v3114_v7  ;;  %6926 = vmatprep.mubr.msk.f32.mxu1 %vm48_vm0, %v3125_v9 }
0x1825   :  { %v3126_v13 = vadd.f32 %v3124_v4, %v3120_v11 }
0x1827   :  { %6927 = vmatmul.mubr.msk.f32.vlgmr.msra.gmra.mrb[24].mxu1 %vm48_vm0, %v3126_v13 }
0x18fa   :  { %v6928_v33 = vpop.f32.mrb[24].mxu1 }
0x18fb   :  { %v8408_v15 = vadd.f32 %v6928_v33, %v6298_v14  ;;  %v3212_v18 = vpop.f32.mrb[25].mxu1 }
0x18fc   :  { %v8410_v19 = vadd.f32 %v6298_v14, %v3212_v18 }
0x18fe   :  { %6933 = vmatprep.mubr.msk.f32.mxu1 %vm190_vm1, %v8410_v19  ;;  %v8416_v20 = vpack.i.bf16 %v8408_v15, %v8410_v19 }
0x1900   :  { %7565 = vrot.lane.b32.xlu1 %v8416_v20, %s7827_s24  ;;  %7560 = vrot.lane.b32.xlu0 %v8416_v20, %s7828_s25 }
0x1904   :  { %3428 = vrot.lane.b32.xlu1 %v8410_v19, %s7829_s26  ;;  %7570 = vrot.lane.b32.xlu0 %v8416_v20, %s7830_s27 }
0x1908   :  { %3430 = vrot.lane.b32.xlu1 %v8408_v15, %s7829_s26  ;;  %3796 = vrot.lane.b32.xlu0 %v8408_v15, %s7831_s28 }
0x190c   :  { %3794 = vrot.lane.b32.xlu1 %v8410_v19, %s7831_s28 }
0x1972   :  { %v7566_v21 = vpop.permute.xlu1 %7565  ;;  %v7561_v22 = vpop.permute.xlu0 %7560 }
0x1973   :  { %v7568_v23 = vunpack.i.h.bf16 %v7566_v21  ;;  %v7567_v24 = vunpack.i.l.bf16 %v7566_v21  ;;  %v7563_v25 = vunpack.i.h.bf16 %v7561_v22  ;;  %v7562_v46 = vunpack.i.l.bf16 %v7561_v22 }
0x1975   :  { %v7304_v36 = vpack.c.bf16 %v7563_v25, %v7562_v46  ;;  %v7314_v37 = vpack.c.bf16 %v7568_v23, %v7567_v24 }
0x1976   :  { %v7571_v38 = vpop.permute.xlu0 %7570  ;;  %v3429_v39 = vpop.permute.xlu1 %3428 }
0x1977   :  { %7306 = vmatprep.subr.msk.bf16.mxu1 %vm7971_vm2, %v7304_v36  ;;  %v7573_v40 = vunpack.i.h.bf16 %v7571_v38  ;;  %v7572_v44 = vunpack.i.l.bf16 %v7571_v38 }
0x1978   :  { %7309 = vmatpush3.bf16.xpose.msk.msra.mxu1 %vm7971_vm2, %v7304_v36 }
0x1979   :  { %7316 = vmatprep.subr.msk.bf16.mxu1 %vm7971_vm2, %v7314_v37  ;;  %v7324_v48 = vpack.c.bf16 %v7573_v40, %v7572_v44 }
0x197a   :  { %v3431_v49 = vpop.permute.xlu1 %3430  ;;  %v3797_v51 = vpop.permute.xlu0 %3796 }
0x197e   :  { %v3795_v50 = vpop.permute.xlu1 %3794 }
0x197f   :  { %6934 = vmatmul.mubr.msk.f32.vlgmr.msra.gmra.mrb[26].mxu1 %vm190_vm1, %v8408_v15 }
0x1980   :  { %7319 = vmatpush3.bf16.xpose.msk.msra.mxu1 %vm7971_vm2, %v7314_v37  ;;  %6947 = vmatprep.mubr.msk.f32.mxu1 %vm190_vm1, %v3429_v39 }
0x1981   :  { %7326 = vmatprep.subr.msk.bf16.mxu1 %vm7971_vm2, %v7324_v48 }
0x1987   :  { %6948 = vmatmul.mubr.msk.f32.vlgmr.msra.gmra.mrb[28].mxu1 %vm190_vm1, %v3431_v49 }
0x1988   :  { %7329 = vmatpush3.bf16.xpose.msk.msra.mxu1 %vm7971_vm2, %v7324_v48  ;;  %6971 = vmatprep.mubr.msk.f32.mxu1 %vm190_vm1, %v3795_v50 }
0x198f   :  { %6972 = vmatmul.mubr.msk.f32.vlgmr.msra.gmra.mrb[30].mxu1 %vm190_vm1, %v3797_v51 }
0x1a52   :  { %v6935_v12 = vpop.f32.mrb[26].mxu1 }
0x1a53   :  { %v3316_v1 = vmul.f32 0.35355338, %v6935_v12  ;;  %v3306_v31 = vpop.f32.mrb[27].mxu1 }
0x1a54   :  { %v3315_v32 = vmul.f32 0.35355338, %v3306_v31 }
0x1a55   :  { %v3318_v34 = vadd.f32 %v3316_v1, %v7996_v8 }
0x1a56   :  { %v3317_v54 = vadd.f32 %v3315_v32, %v7998_v10 }
0x1a57   :  { %v3322_v26 = vsel %vm278_vm5, %v3318_v34, -inf }
0x1a58   :  { %3323 = vmax.xlane.f32.xlu0 %v3322_v26  ;;  %v3319_v27 = vsel %vm278_vm5, %v3317_v54, -inf }
0x1a59   :  { %3320 = vmax.xlane.f32.xlu1 %v3319_v27 }
0x1a5a   :  { %v6949_v55 = vpop.f32.mrb[28].mxu1 }
0x1a5b   :  { %v3510_v56 = vpop.f32.mrb[29].mxu1  ;;  %v3520_v29 = vmul.f32 0.35355338, %v6949_v55 }
0x1a5c   :  { %v3519_v57 = vmul.f32 0.35355338, %v3510_v56 }
0x1a5d   :  { %v3522_v42 = vadd.f32 %v3520_v29, %v7996_v8 }
0x1a5e   :  { %v3521_v41 = vadd.f32 %v3519_v57, %v7998_v10 }
0x1a5f   :  { %v3526_v61 = vsel %vm278_vm5, %v3522_v42, -inf }
0x1a60   :  { %v3523_v58 = vsel %vm278_vm5, %v3521_v41, -inf }
0x1a61   :  { %3524 = vmax.xlane.f32.xlu0 %v3523_v58 }
0x1a62   :  { %v6973_v59 = vpop.f32.mrb[30].mxu1 }
0x1a63   :  { %v3876_v60 = vpop.f32.mrb[31].mxu1  ;;  %v3886_v37 = vmul.f32 0.35355338, %v6973_v59 }
0x1a64   :  { %v3885_v46 = vmul.f32 0.35355338, %v3876_v60 }
0x1a65   :  { %3527 = vmax.xlane.f32.xlu0 %v3526_v61  ;;  %v3888_v39 = vadd.f32 %v3886_v37, %v7996_v8 }
0x1a66   :  { %v3887_v36 = vadd.f32 %v3885_v46, %v7998_v10 }
0x1a67   :  { %v3892_v40 = vsel %vm278_vm5, %v3888_v39, -inf }
0x1a68   :  { %v3889_v38 = vsel %vm278_vm5, %v3887_v36, -inf }
0x1ae5   :  { %v3324_v45 = vpop.xlane.xlu0 %3323 }
0x1ae6   :  { %v3326_v62 = vsub.f32 %v3318_v34, %v3324_v45  ;;  %v3321_v2 = vpop.xlane.xlu1 %3320 }
0x1ae7   :  { %v3325_v43 = vsub.f32 %v3317_v54, %v3321_v2 }
0x1ae8   :  { %v3329_v3 = vmul.f32 1.442695, %v3326_v62 }
0x1ae9   :  { %v3327_v4 = vmul.f32 1.442695, %v3325_v43 }
0x1aea   :  { %7723 = vpow2.f32 %v3329_v3 }
0x1aeb   :  { %7725 = vpow2.f32 %v3327_v4 }
0x1aee   :  { %v3525_v5 = vpop.xlane.xlu0 %3524 }
0x1aef   :  { %v3529_v6 = vsub.f32 %v3521_v41, %v3525_v5 }
0x1af1   :  { %v3531_v7 = vmul.f32 1.442695, %v3529_v6 }
0x1af2   :  { %v3528_v9 = vpop.xlane.xlu0 %3527 }
0x1af3   :  { %7727 = vpow2.f32 %v3531_v7  ;;  %v3530_v11 = vsub.f32 %v3522_v42, %v3528_v9 }
0x1af4   :  { %v7724_v13 = vpop.eup %7723 }
0x1af5   :  { %v7726_v14 = vpop.eup %7725  ;;  %v3533_v33 = vmul.f32 1.442695, %v3530_v11  ;;  %v3334_v18 = vsel %vm278_vm5, %v7724_v13, 0.0 }
0x1af6   :  { %3335 = vadd.xlane.f32.xlu0 %v3334_v18  ;;  %v3331_v21 = vsel %vm278_vm5, %v7726_v14, 0.0 }
0x1af7   :  { %7729 = vpow2.f32 %v3533_v33  ;;  %3332 = vadd.xlane.f32.xlu1 %v3331_v21 }
0x1afd   :  { %v7728_v22 = vpop.eup %7727 }
0x1afe   :  { %v3535_v23 = vsel %vm278_vm5, %v7728_v22, 0.0 }
0x1aff   :  { %3536 = vadd.xlane.f32.xlu1 %v3535_v23 }
0x1b01   :  { %v7730_v24 = vpop.eup %7729 }
0x1b02   :  { %v3538_v25 = vsel %vm278_vm5, %v7730_v24, 0.0 }
0x1b03   :  { %3539 = vadd.xlane.f32.xlu0 %v3538_v25 }
0x1b10   :  { %7575 = vrot.lane.b32.xlu1 %v8416_v20, %s7833_s29 }
0x1b14   :  { %7585 = vrot.lane.b32.xlu1 %v8416_v20, %s7834_s30 }
0x1b18   :  { %4081 = vrot.lane.b32.xlu1 %v8410_v19, %s7835_s10 }
0x1b19   :  { %7580 = vrot.lane.b32.xlu0 %v8416_v20, %s7836_s11 }
0x1b1c   :  { %4083 = vrot.lane.b32.xlu1 %v8408_v15, %s7835_s10 }
0x1b38   :  { %3890 = vmax.xlane.f32.xlu0 %v3889_v38 }
0x1b40   :  { %3893 = vmax.xlane.f32.xlu1 %v3892_v40 }
0x1b83   :  { %v3336_v19 = vpop.xlane.xlu0 %3335 }
0x1b84   :  { %v3333_v44 = vpop.xlane.xlu1 %3332 }
0x1b85   :  { %7731 = vrcp.f32 %v3333_v44 }
0x1b86   :  { %7733 = vrcp.f32 %v3336_v19 }
0x1b8c   :  { %v3537_v48 = vpop.xlane.xlu1 %3536 }
0x1b8d   :  { %7735 = vrcp.f32 %v3537_v48 }
0x1b8f   :  { %v7732_v49 = vpop.eup %7731 }
0x1b90   :  { %v3540_v15 = vpop.xlane.xlu0 %3539  ;;  %v7576_v50 = vpop.permute.xlu1 %7575  ;;  %v3338_v51 = vmul.f32 %v7732_v49, %v7726_v14  ;;  %v6301_v14 = vld [vmem:[%s8837_s3 + $0x40] sm:$0xff] }
0x1b91   :  { %7737 = vrcp.f32 %v3540_v15  ;;  %v7578_v12 = vunpack.i.h.bf16 %v7576_v50  ;;  %v7577_v1 = vunpack.i.l.bf16 %v7576_v50  ;;  %v7734_v32 = vpop.eup %7733 }
0x1b92   :  { %6940 = vmatprep.mubr.msk.f32.mxu0 %vm278_vm5, %v3338_v51  ;;  %v3340_v57 = vmul.f32 %v7734_v32, %v7724_v13  ;;  %v6302_v13 = vld [vmem:[%s8837_s3 + $0x48] sm:$0xff] }
0x1b93   :  { %v7310_v31 = vpack.c.bf16 %v7578_v12, %v7577_v1 }
0x1b94   :  { %v7581_v34 = vpop.permute.xlu0 %7580  ;;  %v7586_v54 = vpop.permute.xlu1 %7585 }
0x1b95   :  { %v7583_v26 = vunpack.i.h.bf16 %v7581_v34  ;;  %v7582_v27 = vunpack.i.l.bf16 %v7581_v34  ;;  %v7588_v55 = vunpack.i.h.bf16 %v7586_v54  ;;  %v7587_v56 = vunpack.i.l.bf16 %v7586_v54  ;;  %7311 = vmatprep.subr.bf16.mxu0 %v7310_v31 }
0x1b96   :  { %7313 = vmatpush3.bf16.msra.mxu0 %v7310_v31  ;;  %v6303_v31 = vld [vmem:[%s8837_s3 + $0x50] sm:$0xff] }
0x1b97   :  { %v7736_v29 = vpop.eup %7735  ;;  %v7320_v41 = vpack.c.bf16 %v7583_v26, %v7582_v27  ;;  %v7334_v58 = vpack.c.bf16 %v7588_v55, %v7587_v56 }
0x1b98   :  { %v4082_v42 = vpop.permute.xlu1 %4081  ;;  %v3542_v59 = vmul.f32 %v7736_v29, %v7728_v22 }
0x1b99   :  { %6941 = vmatmul.mubr.msk.f32.vlgmr.msra.gmra.mrb[24].mxu0 %vm278_vm5, %v3340_v57  ;;  %7321 = vmatprep.subr.bf16.mxu0 %v7320_v41 }
0x1b9a   :  { %7336 = vmatprep.subr.msk.bf16.mxu1 %vm7971_vm2, %v7334_v58  ;;  %6990 = vmatprep.mubr.msk.f32.mxu1 %vm190_vm1, %v4082_v42 }
0x1b9b   :  { %v7738_v60 = vpop.eup %7737  ;;  %7323 = vmatpush3.bf16.msra.mxu0 %v7320_v41  ;;  %6954 = vmatprep.mubr.msk.f32.mxu0 %vm278_vm5, %v3542_v59 }
0x1b9c   :  { %v3544_v61 = vmul.f32 %v7738_v60, %v7730_v24  ;;  %7339 = vmatpush3.bf16.xpose.msk.msra.mxu1 %vm7971_vm2, %v7334_v58  ;;  %v4084_v45 = vpop.permute.xlu1 %4083  ;;  %6957 = vmatprep.subr.mxu0 %v6302_v13 }
0x1b9e   :  { %6955 = vmatmul.mubr.msk.f32.vlgmr.msra.gmra.mrb[26].mxu0 %vm278_vm5, %v3544_v61 }
0x1b9f   :  { %6958 = vmatpush3.msra.mxu0 %v6302_v13 }
0x1ba0   :  { %6962 = vmatprep.subr.mxu0 %v6301_v14 }
0x1ba3   :  { %6991 = vmatmul.mubr.msk.f32.vlgmr.msra.gmra.mrb[32].mxu1 %vm190_vm1, %v4084_v45 }
0x1bc5   :  { %v3891_v62 = vpop.xlane.xlu0 %3890 }
0x1bc6   :  { %v3895_v2 = vsub.f32 %v3887_v36, %v3891_v62 }
0x1bc8   :  { %v3897_v4 = vmul.f32 1.442695, %v3895_v2 }
0x1bcd   :  { %v3894_v43 = vpop.xlane.xlu1 %3893 }
0x1bce   :  { %v3896_v3 = vsub.f32 %v3888_v39, %v3894_v43  ;;  %v6304_v43 = vld [vmem:[%s8837_s3 + $0x58] sm:$0xff] }
0x1bd0   :  { %v3899_v5 = vmul.f32 1.442695, %v3896_v3 }
0x1bd2   :  { %7739 = vpow2.f32 %v3899_v5 }
0x1bd3   :  { %7741 = vpow2.f32 %v3897_v4 }
0x1bdc   :  { %v7740_v6 = vpop.eup %7739 }
0x1bdd   :  { %v3904_v7 = vsel %vm278_vm5, %v7740_v6, 0.0  ;;  %v7742_v9 = vpop.eup %7741 }
0x1bde   :  { %3905 = vadd.xlane.f32.xlu0 %v3904_v7  ;;  %v3901_v11 = vsel %vm278_vm5, %v7742_v9, 0.0 }
0x1be2   :  { %3902 = vadd.xlane.f32.xlu0 %v3901_v11 }
0x1bf8   :  { %7590 = vrot.lane.b32.xlu0 %v8416_v20, %s7837_s15 }
0x1c6b   :  { %v3906_v33 = vpop.xlane.xlu0 %3905 }
0x1c6c   :  { %v6942_v18 = vpop.f32.mrb[24].mxu0 }
0x1c6d   :  { %v3419_v21 = vpop.f32.mrb[25].mxu0 }
0x1c6f   :  { %v3903_v22 = vpop.xlane.xlu0 %3902 }
0x1c70   :  { %7743 = vrcp.f32 %v3903_v22 }
0x1c71   :  { %7745 = vrcp.f32 %v3906_v33  ;;  %v6956_v23 = vpop.f32.mrb[26].mxu0 }
0x1c72   :  { %v3623_v24 = vpop.f32.mrb[27].mxu0 }
0x1c73   :  { %v7591_v25 = vpop.permute.xlu0 %7590  ;;  %6959 = vmatprep.mubr.msk.f32.mxu0 %vm190_vm1, %v3623_v24 }
0x1c74   :  { %v7593_v46 = vunpack.i.h.bf16 %v7591_v25  ;;  %v7592_v36 = vunpack.i.l.bf16 %v7591_v25  ;;  %6960 = vmatmul.mubr.msk.f32.vlgmr.msra.gmra.mrb[28].mxu0 %vm190_vm1, %v6956_v23 }
0x1c75   :  { %6964 = vmatprep.mubr.msk.f32.mxu0 %vm190_vm1, %v3419_v21  ;;  %6963 = vmatpush3.msra.mxu0 %v6301_v14 }
0x1c76   :  { %v7330_v37 = vpack.c.bf16 %v7593_v46, %v7592_v36  ;;  %v6992_v38 = vpop.f32.mrb[32].mxu1 }
0x1c77   :  { %v4163_v39 = vpop.f32.mrb[33].mxu1  ;;  %v4173_v40 = vmul.f32 0.35355338, %v6992_v38 }
0x1c78   :  { %v4172_v44 = vmul.f32 0.35355338, %v4163_v39  ;;  %7331 = vmatprep.subr.bf16.mxu0 %v7330_v37 }
0x1c79   :  { %v4175_v50 = vadd.f32 %v4173_v40, %v7996_v8 }
0x1c7a   :  { %v7744_v19 = vpop.eup %7743  ;;  %v4174_v48 = vadd.f32 %v4172_v44, %v7998_v10 }
0x1c7b   :  { %v7746_v49 = vpop.eup %7745  ;;  %v3908_v15 = vmul.f32 %v7744_v19, %v7742_v9  ;;  %v4179_v1 = vsel %vm278_vm5, %v4175_v50, -inf  ;;  %v4373_v9 = vrot.slane %v8397_v63, %v8073_v35 }
0x1c7c   :  { %v4176_v51 = vsel %vm278_vm5, %v4174_v48, -inf  ;;  %6965 = vmatmul.mubr.msk.f32.vlgmr.msra.gmra.mrb[28].mxu0 %vm190_vm1, %v6942_v18  ;;  %v3910_v12 = vmul.f32 %v7746_v49, %v7740_v6  ;;  %v6338_v49 = vld [vmem:[%s8838_s4 + $0x48] sm:$0xff] }
0x1c7d   :  { %4177 = vmax.xlane.f32.xlu1 %v4176_v51  ;;  %7333 = vmatpush3.bf16.msra.mxu0 %v7330_v37  ;;  %v6340_v51 = vld [vmem:[%s8838_s4 + $0x58] sm:$0xff] }
0x1c7e   :  { %6978 = vmatprep.mubr.msk.f32.mxu0 %vm278_vm5, %v3908_v15  ;;  %6981 = vmatprep.subr.mxu0 %v6303_v31 }
0x1c80   :  { %6979 = vmatmul.mubr.msk.f32.vlgmr.msra.gmra.mrb[30].mxu0 %vm278_vm5, %v3910_v12 }
0x1c81   :  { %4180 = vmax.xlane.f32.xlu1 %v4179_v1  ;;  %6982 = vmatpush3.msra.mxu0 %v6303_v31  ;;  %v6345_v1 = vld [vmem:[%s8840_s6 + $0x80] sm:$0xff]  ;;  %v6346_v31 = vld [vmem:[%s8840_s6 + $0x88] sm:$0xff] }
0x1d0a   :  { %v4178_v32 = vpop.xlane.xlu1 %4177 }
0x1d0b   :  { %v4182_v34 = vsub.f32 %v4174_v48, %v4178_v32  ;;  %v6337_v48 = vld [vmem:[%s8838_s4 + $0x40] sm:$0xff]  ;;  %v6347_v32 = vld [vmem:[%s8840_s6 + $0x90] sm:$0xff] }
0x1d0c   :  { %v7344_v15 = vpack.c.bf16 %v6338_v49, %v6337_v48 }
0x1d0d   :  { %v4184_v27 = vmul.f32 1.442695, %v4182_v34  ;;  %v7352_v34 = vpack.c.bf16 %v6346_v31, %v6345_v1  ;;  %v6356_v31 = vld [vmem:[%s8835_s1 + $0x60] sm:$0xff] }
0x1d0e   :  { %v4181_v54 = vpop.xlane.xlu1 %4180  ;;  %7345 = vmatprep.subr.bf16.mxu1 %v7344_v15 }
0x1d0f   :  { %v4183_v26 = vsub.f32 %v4175_v50, %v4181_v54  ;;  %7347 = vmatpush3.bf16.msra.mxu1 %v7344_v15  ;;  %v6339_v50 = vld [vmem:[%s8838_s4 + $0x50] sm:$0xff]  ;;  %v6348_v54 = vld [vmem:[%s8840_s6 + $0x98] sm:$0xff] }
0x1d10   :  { %v7348_v12 = vpack.c.bf16 %v6340_v51, %v6339_v50 }
0x1d11   :  { %v4186_v55 = vmul.f32 1.442695, %v4183_v26  ;;  %v7356_v26 = vpack.c.bf16 %v6348_v54, %v6347_v32  ;;  %v6357_v32 = vld [vmem:[%s8835_s1 + $0x68] sm:$0xff]  ;;  %v6358_v54 = vld [vmem:[%s8835_s1 + $0x70] sm:$0xff] }
0x1d12   :  { %7349 = vmatprep.subr.bf16.mxu1 %v7348_v12 }
0x1d13   :  { %7747 = vpow2.f32 %v4186_v55  ;;  %7351 = vmatpush3.bf16.msra.mxu1 %v7348_v12  ;;  %v6350_v55 = vld [vmem:[%s8840_s6 + $0xa8] sm:$0xff] }
0x1d14   :  { %7749 = vpow2.f32 %v4184_v27  ;;  %v6349_v27 = vld [vmem:[%s8840_s6 + $0xa0] sm:$0xff] }
0x1d1d   :  { %v7748_v56 = vpop.eup %7747 }
0x1d1e   :  { %v4191_v29 = vsel %vm278_vm5, %v7748_v56, 0.0  ;;  %v7750_v57 = vpop.eup %7749 }
0x1d1f   :  { %4192 = vadd.xlane.f32.xlu1 %v4191_v29  ;;  %v4188_v41 = vsel %vm278_vm5, %v7750_v57, 0.0 }
0x1d23   :  { %4189 = vadd.xlane.f32.xlu1 %v4188_v41 }
0x1d34   :  { %7595 = vrot.lane.b32.xlu1 %v8416_v20, %s7838_s18 }
0x1d53   :  { %v6980_v58 = vpop.f32.mrb[30].mxu0 }
0x1d54   :  { %v3989_v42 = vpop.f32.mrb[31].mxu0 }
0x1d55   :  { %6983 = vmatprep.mubr.msk.f32.mxu0 %vm190_vm1, %v3989_v42 }
0x1d56   :  { %6984 = vmatmul.mubr.msk.f32.vlgmr.msra.gmra.mrb[28].mxu0 %vm190_vm1, %v6980_v58 }
0x1dac   :  { %v4193_v59 = vpop.xlane.xlu1 %4192 }
0x1dad   :  { %7751 = vrcp.f32 %v4193_v59 }
0x1db0   :  { %v4190_v60 = vpop.xlane.xlu1 %4189 }
0x1db1   :  { %7753 = vrcp.f32 %v4190_v60  ;;  %v4405_v60 = vrot.slane %v8397_v63, %v8122_v16 }
0x1db4   :  { %v7596_v61 = vpop.permute.xlu1 %7595 }
0x1db5   :  { %v7598_v45 = vunpack.i.h.bf16 %v7596_v61  ;;  %v7597_v62 = vunpack.i.l.bf16 %v7596_v61 }
0x1db7   :  { %v7340_v2 = vpack.c.bf16 %v7598_v45, %v7597_v62  ;;  %v7752_v20 = vpop.eup %7751  ;;  %v4411_v62 = vrot.slane %v8397_v63, %v8125_v17 }
0x1db8   :  { %v4197_v5 = vmul.f32 %v7752_v20, %v7748_v56  ;;  %v7360_v56 = vpack.c.bf16 %v6350_v55, %v6349_v27 }
0x1db9   :  { %7341 = vmatprep.subr.bf16.mxu0 %v7340_v2 }
0x1dba   :  { %7343 = vmatpush3.bf16.msra.mxu0 %v7340_v2 }
0x1dbb   :  { %v7754_v3 = vpop.eup %7753  ;;  %7000 = vmatprep.subr.mxu0 %v6304_v43 }
0x1dbc   :  { %v4195_v4 = vmul.f32 %v7754_v3, %v7750_v57 }
0x1dbe   :  { %6997 = vmatprep.mubr.msk.f32.mxu0 %vm278_vm5, %v4195_v4 }
0x1dbf   :  { %6998 = vmatmul.mubr.msk.f32.vlgmr.msra.gmra.mrb[32].mxu0 %vm278_vm5, %v4197_v5 }
0x1dc0   :  { %7001 = vmatpush3.msra.mxu0 %v6304_v43 }
0x1dc1   :  { %7353 = vmatprep.subr.bf16.mxu0 %v7352_v34 }
0x1e92   :  { %v6999_v6 = vpop.f32.mrb[32].mxu0 }
0x1e93   :  { %v4276_v7 = vpop.f32.mrb[33].mxu0 }
0x1e94   :  { %7002 = vmatprep.mubr.msk.f32.mxu0 %vm190_vm1, %v4276_v7  ;;  %v6352_v7 = vld [vmem:[%s8840_s6 + $0xb8] sm:$0xff] }
0x1e95   :  { %7003 = vmatmul.mubr.msk.f32.vlgmr.msra.gmra.mrb[28].mxu0 %vm190_vm1, %v6999_v6  ;;  %v6351_v6 = vld [vmem:[%s8840_s6 + $0xb0] sm:$0xff] }
0x1e96   :  { %7355 = vmatpush3.bf16.msra.mxu0 %v7352_v34  ;;  %v7368_v34 = vpack.c.bf16 %v6357_v32, %v6356_v31 }
0x1e97   :  { %7357 = vmatprep.subr.bf16.mxu0 %v7356_v26 }
0x1e98   :  { %7369 = vmatprep.subr.bf16.mxu1 %v7368_v34 }
0x1e9a   :  { %7359 = vmatpush3.bf16.msra.mxu0 %v7356_v26  ;;  %v6359_v26 = vld [vmem:[%s8835_s1 + $0x78] sm:$0xff] }
0x1e9b   :  { %7361 = vmatprep.subr.bf16.mxu0 %v7360_v56  ;;  %v7372_v27 = vpack.c.bf16 %v6359_v26, %v6358_v54 }
0x1e9e   :  { %7363 = vmatpush3.bf16.msra.mxu0 %v7360_v56 }
0x1f68   :  { %v7004_v11 = vpop.f32.mrb[28].mxu0 }
0x1f69   :  { %v4369_v13 = vadd.f32 %v7004_v11, %v8372_v0  ;;  %v4357_v14 = vpop.f32.mrb[29].mxu0  ;;  %v6342_v11 = vld [vmem:[%s8839_s5 + $0x2] ss:$0 sm:$0xff] }
0x1f6a   :  { %v4368_v33 = vadd.f32 %v4357_v14, %v8370_v52 }
0x1f6b   :  { %v8526_v18 = vadd.f32 %v4373_v9, %v4369_v13 }
0x1f6c   :  { %v8528_v21 = vadd.f32 %v4373_v9, %v4368_v33  ;;  %v7364_v9 = vpack.c.bf16 %v6352_v7, %v6351_v6 }
0x1f6d   :  { %v4379_v22 = vsel %vm48_vm0, %v8526_v18, 0.0 }
0x1f6e   :  { %4380 = vadd.xlane.f32.xlu1 %v4379_v22  ;;  %v4376_v23 = vsel %vm48_vm0, %v8528_v21, 0.0  ;;  %7365 = vmatprep.subr.bf16.mxu0 %v7364_v9 }
0x1f6f   :  { %4377 = vadd.xlane.f32.xlu0 %v4376_v23  ;;  %7367 = vmatpush3.bf16.msra.mxu0 %v7364_v9 }
0x1ffb   :  { %v4381_v24 = vpop.xlane.xlu1 %4380 }
0x1ffc   :  { %v4383_v25 = vmul.f32 0.03125, %v4381_v24  ;;  %v4378_v46 = vpop.xlane.xlu0 %4377 }
0x1ffd   :  { %v4382_v36 = vmul.f32 0.03125, %v4378_v46  ;;  %v4605_v46 = vrot.slane %v8397_v63, %v8145_v47 }
0x1ffe   :  { %v4385_v37 = vsub.f32 %v8526_v18, %v4383_v25 }
0x1fff   :  { %v4384_v38 = vsub.f32 %v8528_v21, %v4382_v36 }
0x2000   :  { %v4387_v44 = vmul.f32 %v4385_v37, %v4385_v37 }
0x2001   :  { %v4386_v39 = vmul.f32 %v4384_v38, %v4384_v38 }
0x2002   :  { %v4391_v19 = vsel %vm48_vm0, %v4387_v44, 0.0 }
0x2003   :  { %v4388_v40 = vsel %vm48_vm0, %v4386_v39, 0.0 }
0x2004   :  { %4389 = vadd.xlane.f32.xlu0 %v4388_v40 }
0x2008   :  { %4392 = vadd.xlane.f32.xlu0 %v4391_v19 }
0x2091   :  { %v4390_v29 = vpop.xlane.xlu0 %4389 }
0x2092   :  { %v4394_v57 = vmul.f32 0.03125, %v4390_v29 }
0x2094   :  { %v4396_v41 = vadd.f32 1e-05, %v4394_v57 }
0x2095   :  { %v4393_v58 = vpop.xlane.xlu0 %4392 }
0x2096   :  { %7755 = vrsqrt.f32 %v4396_v41  ;;  %v4395_v42 = vmul.f32 0.03125, %v4393_v58 }
0x2098   :  { %v4397_v59 = vadd.f32 1e-05, %v4395_v42  ;;  %v8618_v42 = vld [vmem:[%s8841_s7 + $0x18] sm:$0x3f] }
0x209a   :  { %7757 = vrsqrt.f32 %v4397_v59  ;;  %v4641_v59 = vrot.slane %v8618_v42, %v7926_v28 }
0x20a0   :  { %v7756_v61 = vpop.eup %7755 }
0x20a1   :  { %v4400_v45 = vmul.f32 %v7756_v61, %v4384_v38 }
0x20a3   :  { %v4406_v2 = vmul.f32 %v4405_v60, %v4400_v45  ;;  %v4647_v45 = vrot.slane %v8618_v42, %v7934_v30 }
0x20a4   :  { %v7758_v43 = vpop.eup %7757 }
0x20a5   :  { %v4401_v20 = vmul.f32 %v7758_v43, %v4385_v37  ;;  %v4412_v3 = vadd.f32 %v4411_v62, %v4406_v2 }
0x20a7   :  { %v4407_v4 = vmul.f32 %v4405_v60, %v4401_v20  ;;  %7013 = vmatprep.mubr.msk.f32.mxu1 %vm48_vm0, %v4412_v3 }
0x20a9   :  { %v4413_v5 = vadd.f32 %v4411_v62, %v4407_v4 }
0x20ab   :  { %7014 = vmatmul.mubr.msk.f32.vlgmr.msra.gmra.mrb[34].mxu1 %vm48_vm0, %v4413_v5  ;;  %v6361_v5 = vld [vmem:[%s8836_s2 + $0x3] ss:$0 sm:$0xff] }
0x20ac   :  { %7371 = vmatpush3.bf16.msra.mxu1 %v7368_v34 }
0x20ad   :  { %7373 = vmatprep.subr.bf16.mxu1 %v7372_v27 }
0x20b0   :  { %7375 = vmatpush3.bf16.msra.mxu1 %v7372_v27 }
0x217e   :  { %v7015_v13 = vpop.f32.mrb[34].mxu1 }
0x217f   :  { %v4505_v14 = vadd.f32 %v7015_v13, %v6342_v11  ;;  %v4499_v33 = vpop.f32.mrb[35].mxu1 }
0x2180   :  { %v4500_v22 = vadd.f32 %v6342_v11, %v4499_v33 }
0x2181   :  { %v4509_v24 = vmax.f32 %v4505_v14, 0.0 }
0x2182   :  { %v4508_v23 = vmax.f32 %v4500_v22, 0.0 }
0x2184   :  { %7032 = vmatprep.mubr.msk.f32.mxu0 %vm1476_vm6, %v4508_v23 }
0x2185   :  { %7033 = vmatmul.mubr.msk.f32.vlgmr.msra.gmra.mrb[34].mxu0 %vm1476_vm6, %v4509_v24 }
0x2258   :  { %v7034_v25 = vpop.f32.mrb[34].mxu0 }
0x2259   :  { %v4601_v36 = vadd.f32 %v7034_v25, %v8526_v18  ;;  %v4591_v37 = vpop.f32.mrb[35].mxu0 }
0x225a   :  { %v4600_v38 = vadd.f32 %v4591_v37, %v8528_v21 }
0x225b   :  { %v4607_v39 = vadd.f32 %v4605_v46, %v4601_v36 }
0x225c   :  { %v4606_v40 = vadd.f32 %v4605_v46, %v4600_v38 }
0x225d   :  { %v8593_v19 = vadd.f32 %v4607_v39, %v8372_v0 }
0x225e   :  { %v8590_v44 = vadd.f32 %v4606_v40, %v8370_v52 }
0x225f   :  { %v4615_v63 = vsel %vm48_vm0, %v8593_v19, 0.0 }
0x2260   :  { %v4612_v48 = vsel %vm48_vm0, %v8590_v44, 0.0 }
0x2261   :  { %4613 = vadd.xlane.f32.xlu0 %v4612_v48 }
0x2265   :  { %4616 = vadd.xlane.f32.xlu0 %v4615_v63 }
0x22ee   :  { %v4614_v18 = vpop.xlane.xlu0 %4613 }
0x22ef   :  { %v4618_v49 = vmul.f32 0.03125, %v4614_v18 }
0x22f1   :  { %v4620_v21 = vsub.f32 %v8590_v44, %v4618_v49 }
0x22f2   :  { %v4617_v15 = vpop.xlane.xlu0 %4616 }
0x22f3   :  { %v4619_v50 = vmul.f32 0.03125, %v4617_v15  ;;  %v4622_v51 = vmul.f32 %v4620_v21, %v4620_v21 }
0x22f5   :  { %v4621_v52 = vsub.f32 %v8593_v19, %v4619_v50  ;;  %v4624_v0 = vsel %vm48_vm0, %v4622_v51, 0.0 }
0x22f6   :  { %4625 = vadd.xlane.f32.xlu0 %v4624_v0 }
0x22f7   :  { %v4623_v12 = vmul.f32 %v4621_v52, %v4621_v52 }
0x22f9   :  { %v4627_v1 = vsel %vm48_vm0, %v4623_v12, 0.0 }
0x22fa   :  { %4628 = vadd.xlane.f32.xlu1 %v4627_v1 }
0x2383   :  { %v4626_v55 = vpop.xlane.xlu0 %4625 }
0x2384   :  { %v4630_v56 = vmul.f32 0.03125, %v4626_v55 }
0x2386   :  { %v4632_v29 = vadd.f32 1e-05, %v4630_v56 }
0x2387   :  { %v4629_v57 = vpop.xlane.xlu1 %4628 }
0x2388   :  { %7759 = vrsqrt.f32 %v4632_v29  ;;  %v4631_v41 = vmul.f32 0.03125, %v4629_v57 }
0x238a   :  { %v4633_v58 = vadd.f32 1e-05, %v4631_v41 }
0x238c   :  { %7761 = vrsqrt.f32 %v4633_v58 }
0x2392   :  { %v7760_v60 = vpop.eup %7759 }
0x2393   :  { %v4636_v61 = vmul.f32 %v7760_v60, %v4620_v21 }
0x2395   :  { %v4642_v62 = vmul.f32 %v4641_v59, %v4636_v61 }
0x2396   :  { %v7762_v2 = vpop.eup %7761 }
0x2397   :  { %v4637_v43 = vmul.f32 %v7762_v2, %v4621_v52  ;;  %v4648_v20 = vadd.f32 %v4647_v45, %v4642_v62 }
0x2399   :  { %v4643_v3 = vmul.f32 %v4641_v59, %v4637_v43  ;;  %7043 = vmatprep.mubr.msk.f32.mxu1 %vm48_vm0, %v4648_v20 }
0x239b   :  { %v4649_v4 = vadd.f32 %v4647_v45, %v4643_v3 }
0x239d   :  { %7044 = vmatmul.mubr.msk.f32.vlgmr.msra.gmra.mrb[36].mxu1 %vm48_vm0, %v4649_v4 }
0x2470   :  { %v7045_v28 = vpop.f32.mrb[36].mxu1 }
0x2471   :  { %v8629_v6 = vadd.f32 %v7045_v28, %v6361_v5  ;;  %v4735_v7 = vpop.f32.mrb[37].mxu1 }
0x2472   :  { %v8631_v9 = vadd.f32 %v6361_v5, %v4735_v7 }
0x2474   :  { %7050 = vmatprep.mubr.msk.f32.mxu1 %vm190_vm1, %v8631_v9  ;;  %v8637_v30 = vpack.i.bf16 %v8629_v6, %v8631_v9 }
0x2476   :  { %7605 = vrot.lane.b32.xlu1 %v8637_v30, %s7827_s24  ;;  %7600 = vrot.lane.b32.xlu0 %v8637_v30, %s7828_s25 }
0x247a   :  { %4951 = vrot.lane.b32.xlu1 %v8631_v9, %s7829_s26  ;;  %7610 = vrot.lane.b32.xlu0 %v8637_v30, %s7830_s27 }
0x247e   :  { %4953 = vrot.lane.b32.xlu1 %v8629_v6, %s7829_s26  ;;  %5319 = vrot.lane.b32.xlu0 %v8629_v6, %s7831_s28 }
0x2482   :  { %5317 = vrot.lane.b32.xlu1 %v8631_v9, %s7831_s28 }
0x24e8   :  { %v7606_v11 = vpop.permute.xlu1 %7605  ;;  %v7601_v13 = vpop.permute.xlu0 %7600 }
0x24e9   :  { %v7608_v14 = vunpack.i.h.bf16 %v7606_v11  ;;  %v7607_v33 = vunpack.i.l.bf16 %v7606_v11  ;;  %v7603_v22 = vunpack.i.h.bf16 %v7601_v13  ;;  %v7602_v23 = vunpack.i.l.bf16 %v7601_v13 }
0x24eb   :  { %v7376_v24 = vpack.c.bf16 %v7603_v22, %v7602_v23  ;;  %v7386_v25 = vpack.c.bf16 %v7608_v14, %v7607_v33 }
0x24ec   :  { %v7611_v46 = vpop.permute.xlu0 %7610  ;;  %v4952_v36 = vpop.permute.xlu1 %4951 }
0x24ed   :  { %7378 = vmatprep.subr.msk.bf16.mxu1 %vm7971_vm2, %v7376_v24  ;;  %v7613_v37 = vunpack.i.h.bf16 %v7611_v46  ;;  %v7612_v38 = vunpack.i.l.bf16 %v7611_v46 }
0x24ee   :  { %7381 = vmatpush3.bf16.xpose.msk.msra.mxu1 %vm7971_vm2, %v7376_v24 }
0x24ef   :  { %7388 = vmatprep.subr.msk.bf16.mxu1 %vm7971_vm2, %v7386_v25  ;;  %v7396_v39 = vpack.c.bf16 %v7613_v37, %v7612_v38 }
0x24f0   :  { %v4954_v40 = vpop.permute.xlu1 %4953  ;;  %v5320_v63 = vpop.permute.xlu0 %5319 }
0x24f4   :  { %v5318_v48 = vpop.permute.xlu1 %5317 }
0x24f5   :  { %7051 = vmatmul.mubr.msk.f32.vlgmr.msra.gmra.mrb[38].mxu1 %vm190_vm1, %v8629_v6 }
0x24f6   :  { %7391 = vmatpush3.bf16.xpose.msk.msra.mxu1 %vm7971_vm2, %v7386_v25  ;;  %7064 = vmatprep.mubr.msk.f32.mxu1 %vm190_vm1, %v4952_v36 }
0x24f7   :  { %7398 = vmatprep.subr.msk.bf16.mxu1 %vm7971_vm2, %v7396_v39 }
0x24fd   :  { %7065 = vmatmul.mubr.msk.f32.vlgmr.msra.gmra.mrb[40].mxu1 %vm190_vm1, %v4954_v40 }
0x24fe   :  { %7401 = vmatpush3.bf16.xpose.msk.msra.mxu1 %vm7971_vm2, %v7396_v39  ;;  %7088 = vmatprep.mubr.msk.f32.mxu1 %vm190_vm1, %v5318_v48 }
0x2505   :  { %7089 = vmatmul.mubr.msk.f32.vlgmr.msra.gmra.mrb[42].mxu1 %vm190_vm1, %v5320_v63 }
0x25c8   :  { %v7052_v18 = vpop.f32.mrb[38].mxu1 }
0x25c9   :  { %v4839_v49 = vmul.f32 0.35355338, %v7052_v18  ;;  %v4829_v21 = vpop.f32.mrb[39].mxu1 }
0x25ca   :  { %v4838_v15 = vmul.f32 0.35355338, %v4829_v21 }
0x25cb   :  { %v4841_v50 = vadd.f32 %v4839_v49, %v7996_v8 }
0x25cc   :  { %v4840_v51 = vadd.f32 %v4838_v15, %v7998_v10 }
0x25cd   :  { %v4845_v52 = vsel %vm278_vm5, %v4841_v50, -inf }
0x25ce   :  { %4846 = vmax.xlane.f32.xlu0 %v4845_v52  ;;  %v4842_v0 = vsel %vm278_vm5, %v4840_v51, -inf }
0x25cf   :  { %4843 = vmax.xlane.f32.xlu1 %v4842_v0 }
0x25d0   :  { %v7066_v12 = vpop.f32.mrb[40].mxu1 }
0x25d1   :  { %v5033_v1 = vpop.f32.mrb[41].mxu1  ;;  %v5043_v31 = vmul.f32 0.35355338, %v7066_v12 }
0x25d2   :  { %v5042_v32 = vmul.f32 0.35355338, %v5033_v1 }
0x25d3   :  { %v5045_v54 = vadd.f32 %v5043_v31, %v7996_v8 }
0x25d4   :  { %v5044_v34 = vadd.f32 %v5042_v32, %v7998_v10 }
0x25d5   :  { %v5049_v56 = vsel %vm278_vm5, %v5045_v54, -inf }
0x25d6   :  { %v5046_v26 = vsel %vm278_vm5, %v5044_v34, -inf }
0x25d7   :  { %5047 = vmax.xlane.f32.xlu0 %v5046_v26 }
0x25d8   :  { %v7090_v27 = vpop.f32.mrb[42].mxu1 }
0x25d9   :  { %v5399_v55 = vpop.f32.mrb[43].mxu1  ;;  %v5409_v23 = vmul.f32 0.35355338, %v7090_v27 }
0x25da   :  { %v5408_v33 = vmul.f32 0.35355338, %v5399_v55 }
0x25db   :  { %5050 = vmax.xlane.f32.xlu0 %v5049_v56  ;;  %v5411_v25 = vadd.f32 %v5409_v23, %v7996_v8 }
0x25dc   :  { %v5410_v22 = vadd.f32 %v5408_v33, %v7998_v10 }
0x25dd   :  { %v5415_v46 = vsel %vm278_vm5, %v5411_v25, -inf }
0x25de   :  { %v5412_v24 = vsel %vm278_vm5, %v5410_v22, -inf }
0x265b   :  { %v4847_v29 = vpop.xlane.xlu0 %4846 }
0x265c   :  { %v4849_v57 = vsub.f32 %v4841_v50, %v4847_v29  ;;  %v4844_v41 = vpop.xlane.xlu1 %4843 }
0x265d   :  { %v4848_v58 = vsub.f32 %v4840_v51, %v4844_v41 }
0x265e   :  { %v4852_v59 = vmul.f32 1.442695, %v4849_v57 }
0x265f   :  { %v4850_v60 = vmul.f32 1.442695, %v4848_v58 }
0x2660   :  { %7763 = vpow2.f32 %v4852_v59 }
0x2661   :  { %7765 = vpow2.f32 %v4850_v60 }
0x2664   :  { %v5048_v61 = vpop.xlane.xlu0 %5047 }
0x2665   :  { %v5052_v45 = vsub.f32 %v5044_v34, %v5048_v61 }
0x2667   :  { %v5054_v62 = vmul.f32 1.442695, %v5052_v45 }
0x2668   :  { %v5051_v2 = vpop.xlane.xlu0 %5050 }
0x2669   :  { %7767 = vpow2.f32 %v5054_v62  ;;  %v5053_v43 = vsub.f32 %v5045_v54, %v5051_v2  ;;  %v6365_v62 = vld [vmem:[%s8837_s3 + $0x68] sm:$0xff]  ;;  %v6364_v2 = vld [vmem:[%s8837_s3 + $0x60] sm:$0xff] }
0x266a   :  { %v7764_v20 = vpop.eup %7763 }
0x266b   :  { %v7766_v3 = vpop.eup %7765  ;;  %v5056_v4 = vmul.f32 1.442695, %v5053_v43  ;;  %v4857_v5 = vsel %vm278_vm5, %v7764_v20, 0.0 }
0x266c   :  { %4858 = vadd.xlane.f32.xlu0 %v4857_v5  ;;  %v4854_v28 = vsel %vm278_vm5, %v7766_v3, 0.0 }
0x266d   :  { %7769 = vpow2.f32 %v5056_v4  ;;  %4855 = vadd.xlane.f32.xlu1 %v4854_v28 }
0x2673   :  { %v7768_v7 = vpop.eup %7767 }
0x2674   :  { %v5058_v11 = vsel %vm278_vm5, %v7768_v7, 0.0 }
0x2675   :  { %5059 = vadd.xlane.f32.xlu1 %v5058_v11 }
0x2677   :  { %v7770_v13 = vpop.eup %7769 }
0x2678   :  { %v5061_v14 = vsel %vm278_vm5, %v7770_v13, 0.0 }
0x2679   :  { %5062 = vadd.xlane.f32.xlu0 %v5061_v14 }
0x2686   :  { %7615 = vrot.lane.b32.xlu1 %v8637_v30, %s7833_s29 }
0x268a   :  { %7625 = vrot.lane.b32.xlu1 %v8637_v30, %s7834_s30 }
0x268e   :  { %5604 = vrot.lane.b32.xlu1 %v8631_v9, %s7835_s10 }
0x268f   :  { %7620 = vrot.lane.b32.xlu0 %v8637_v30, %s7836_s11 }
0x2692   :  { %5606 = vrot.lane.b32.xlu1 %v8629_v6, %s7835_s10  ;;  %s7839_s10 = smov [#allocation2]  }
0x2693   :  { %s6178_s11 = sshll.u32 %s7839_s10, 4  ;;  %s6179_s11 = int_to_ptr.vmem [resolvable:$true] %s6178_s11 }
0x2694   :  { %p7808_p1 = scmp.lt.s32.totalorder %s6179_s11, %s6179_s11 }
0x26ae   :  { %5413 = vmax.xlane.f32.xlu0 %v5412_v24 }
0x26b6   :  { %5416 = vmax.xlane.f32.xlu1 %v5415_v46 }
0x26f9   :  { %v4859_v9 = vpop.xlane.xlu0 %4858 }
0x26fa   :  { %v4856_v36 = vpop.xlane.xlu1 %4855 }
0x26fb   :  { %7771 = vrcp.f32 %v4856_v36 }
0x26fc   :  { %7773 = vrcp.f32 %v4859_v9 }
0x2702   :  { %v5060_v37 = vpop.xlane.xlu1 %5059 }
0x2703   :  { %7775 = vrcp.f32 %v5060_v37 }
0x2705   :  { %v7772_v38 = vpop.eup %7771 }
0x2706   :  { %v5063_v6 = vpop.xlane.xlu0 %5062  ;;  %v7616_v39 = vpop.permute.xlu1 %7615  ;;  %v4861_v40 = vmul.f32 %v7772_v38, %v7766_v3 }
0x2707   :  { %7777 = vrcp.f32 %v5063_v6  ;;  %v7618_v48 = vunpack.i.h.bf16 %v7616_v39  ;;  %v7617_v63 = vunpack.i.l.bf16 %v7616_v39  ;;  %v7774_v49 = vpop.eup %7773 }
0x2708   :  { %7057 = vmatprep.mubr.msk.f32.mxu0 %vm278_vm5, %v4861_v40  ;;  %v4863_v1 = vmul.f32 %v7774_v49, %v7764_v20 }
0x2709   :  { %v7382_v18 = vpack.c.bf16 %v7618_v48, %v7617_v63 }
0x270a   :  { %v7621_v21 = vpop.permute.xlu0 %7620  ;;  %v7626_v15 = vpop.permute.xlu1 %7625 }
0x270b   :  { %v7623_v50 = vunpack.i.h.bf16 %v7621_v21  ;;  %v7622_v51 = vunpack.i.l.bf16 %v7621_v21  ;;  %v7628_v52 = vunpack.i.h.bf16 %v7626_v15  ;;  %v7627_v0 = vunpack.i.l.bf16 %v7626_v15  ;;  %7383 = vmatprep.subr.bf16.mxu0 %v7382_v18 }
0x270c   :  { %7385 = vmatpush3.bf16.msra.mxu0 %v7382_v18 }
0x270d   :  { %v7776_v12 = vpop.eup %7775  ;;  %v7392_v31 = vpack.c.bf16 %v7623_v50, %v7622_v51  ;;  %v7406_v32 = vpack.c.bf16 %v7628_v52, %v7627_v0 }
0x270e   :  { %v5605_v34 = vpop.permute.xlu1 %5604  ;;  %v5065_v54 = vmul.f32 %v7776_v12, %v7768_v7 }
0x270f   :  { %7058 = vmatmul.mubr.msk.f32.vlgmr.msra.gmra.mrb[36].mxu0 %vm278_vm5, %v4863_v1  ;;  %7393 = vmatprep.subr.bf16.mxu0 %v7392_v31 }
0x2710   :  { %7408 = vmatprep.subr.msk.bf16.mxu1 %vm7971_vm2, %v7406_v32  ;;  %7107 = vmatprep.mubr.msk.f32.mxu1 %vm190_vm1, %v5605_v34 }
0x2711   :  { %v7778_v26 = vpop.eup %7777  ;;  %7395 = vmatpush3.bf16.msra.mxu0 %v7392_v31  ;;  %7071 = vmatprep.mubr.msk.f32.mxu0 %vm278_vm5, %v5065_v54 }
0x2712   :  { %v5067_v27 = vmul.f32 %v7778_v26, %v7770_v13  ;;  %7411 = vmatpush3.bf16.xpose.msk.msra.mxu1 %vm7971_vm2, %v7406_v32  ;;  %v5607_v55 = vpop.permute.xlu1 %5606  ;;  %7074 = vmatprep.subr.mxu0 %v6365_v62  ;;  %v6367_v26 = vld [vmem:[%s8837_s3 + $0x78] sm:$0xff] }
0x2714   :  { %7072 = vmatmul.mubr.msk.f32.vlgmr.msra.gmra.mrb[38].mxu0 %vm278_vm5, %v5067_v27 }
0x2715   :  { %7075 = vmatpush3.msra.mxu0 %v6365_v62 }
0x2716   :  { %7079 = vmatprep.subr.mxu0 %v6364_v2 }
0x2719   :  { %7108 = vmatmul.mubr.msk.f32.vlgmr.msra.gmra.mrb[44].mxu1 %vm190_vm1, %v5607_v55 }
0x273b   :  { %v5414_v56 = vpop.xlane.xlu0 %5413 }
0x273c   :  { %v5418_v29 = vsub.f32 %v5410_v22, %v5414_v56 }
0x273e   :  { %v5420_v58 = vmul.f32 1.442695, %v5418_v29 }
0x2743   :  { %v5417_v57 = vpop.xlane.xlu1 %5416 }
0x2744   :  { %v5419_v41 = vsub.f32 %v5411_v25, %v5417_v57 }
0x2746   :  { %v5422_v59 = vmul.f32 1.442695, %v5419_v41  ;;  %v5896_v41 = vrot.slane %v8618_v42, %v8073_v35 }
0x2748   :  { %7779 = vpow2.f32 %v5422_v59 }
0x2749   :  { %7781 = vpow2.f32 %v5420_v58 }
0x2752   :  { %v7780_v60 = vpop.eup %7779 }
0x2753   :  { %v5427_v61 = vsel %vm278_vm5, %v7780_v60, 0.0  ;;  %v7782_v45 = vpop.eup %7781 }
0x2754   :  { %5428 = vadd.xlane.f32.xlu0 %v5427_v61  ;;  %v5424_v53 = vsel %vm278_vm5, %v7782_v45, 0.0 }
0x2758   :  { %5425 = vadd.xlane.f32.xlu0 %v5424_v53 }
0x276e   :  { %7630 = vrot.lane.b32.xlu0 %v8637_v30, %s7837_s15  ;;  %s7803_s15 = scalar_lea.vmem %s6179_s11, 256 }
0x276f   :  { %p7804_p0 = scmp.ne.s32.totalorder %s6179_s11, %s7803_s15  ;;  %p7809_p2 = scmp.lt.s32.totalorder %s7803_s15, %s7803_s15 }
0x2771   :  { %p7810_p3 = por %p7809_p2, %p7808_p1 }
0x2773   :  { %p7811_p4 = pnand %p7810_p3, %p7804_p0 }
0x27e1   :  { %v5429_v43 = vpop.xlane.xlu0 %5428 }
0x27e2   :  { %v7059_v20 = vpop.f32.mrb[36].mxu0 }
0x27e3   :  { %v4942_v3 = vpop.f32.mrb[37].mxu0 }
0x27e5   :  { %v5426_v4 = vpop.xlane.xlu0 %5425 }
0x27e6   :  { %7783 = vrcp.f32 %v5426_v4 }
0x27e7   :  { %7785 = vrcp.f32 %v5429_v43  ;;  %v7073_v5 = vpop.f32.mrb[38].mxu0 }
0x27e8   :  { %v5146_v28 = vpop.f32.mrb[39].mxu0 }
0x27e9   :  { %v7631_v7 = vpop.permute.xlu0 %7630  ;;  %7076 = vmatprep.mubr.msk.f32.mxu0 %vm190_vm1, %v5146_v28 }
0x27ea   :  { %v7633_v11 = vunpack.i.h.bf16 %v7631_v7  ;;  %v7632_v13 = vunpack.i.l.bf16 %v7631_v7  ;;  %7077 = vmatmul.mubr.msk.f32.vlgmr.msra.gmra.mrb[40].mxu0 %vm190_vm1, %v7073_v5 }
0x27eb   :  { %7081 = vmatprep.mubr.msk.f32.mxu0 %vm190_vm1, %v4942_v3  ;;  %7080 = vmatpush3.msra.mxu0 %v6364_v2 }
0x27ec   :  { %v7402_v14 = vpack.c.bf16 %v7633_v11, %v7632_v13  ;;  %v7109_v33 = vpop.f32.mrb[44].mxu1  ;;  %v6400_v11 = vld [vmem:[%s8838_s4 + $0x60] sm:$0xff]  ;;  %v6401_v13 = vld [vmem:[%s8838_s4 + $0x68] sm:$0xff] }
0x27ed   :  { %v5686_v22 = vpop.f32.mrb[45].mxu1  ;;  %v5696_v23 = vmul.f32 0.35355338, %v7109_v33  ;;  %v6402_v33 = vld [vmem:[%s8838_s4 + $0x70] sm:$0xff] }
0x27ee   :  { %v5695_v24 = vmul.f32 0.35355338, %v5686_v22  ;;  %7403 = vmatprep.subr.bf16.mxu0 %v7402_v14  ;;  %v6403_v22 = vld [vmem:[%s8838_s4 + $0x78] sm:$0xff] }
0x27ef   :  { %v5698_v37 = vadd.f32 %v5696_v23, %v7996_v8  ;;  %v7420_v23 = vpack.c.bf16 %v6403_v22, %v6402_v33  ;;  %v6418_v33 = vld [vmem:[%s8842_s8] ss:$0 sm:$0xff] }
0x27f0   :  { %v7784_v25 = vpop.eup %7783  ;;  %v5697_v46 = vadd.f32 %v5695_v24, %v7998_v10  ;;  %v6366_v10 = vld [vmem:[%s8837_s3 + $0x70] sm:$0xff]  ;;  %v6408_v24 = vld [vmem:[%s8840_s6 + $0xc0] sm:$0xff] }
0x27f1   :  { %v7786_v36 = vpop.eup %7785  ;;  %v5431_v9 = vmul.f32 %v7784_v25, %v7782_v45  ;;  %v5702_v39 = vsel %vm278_vm5, %v5698_v37, -inf  ;;  %v6409_v25 = vld [vmem:[%s8840_s6 + $0xc8] sm:$0xff] }
0x27f2   :  { %v5699_v38 = vsel %vm278_vm5, %v5697_v46, -inf  ;;  %7082 = vmatmul.mubr.msk.f32.vlgmr.msra.gmra.mrb[40].mxu0 %vm190_vm1, %v7059_v20  ;;  %v5433_v6 = vmul.f32 %v7786_v36, %v7780_v60  ;;  %v7424_v36 = vpack.c.bf16 %v6409_v25, %v6408_v24 }
0x27f3   :  { %5700 = vmax.xlane.f32.xlu1 %v5699_v38  ;;  %7405 = vmatpush3.bf16.msra.mxu0 %v7402_v14  ;;  %v7416_v14 = vpack.c.bf16 %v6401_v13, %v6400_v11  ;;  %v6412_v38 = vld [vmem:[%s8840_s6 + $0xe0] sm:$0xff] }
0x27f4   :  { %7095 = vmatprep.mubr.msk.f32.mxu0 %vm278_vm5, %v5431_v9  ;;  %7098 = vmatprep.subr.mxu0 %v6366_v10  ;;  %v6411_v9 = vld [vmem:[%s8840_s6 + $0xd8] sm:$0xff] }
0x27f5   :  { %7417 = vmatprep.subr.bf16.mxu1 %v7416_v14 }
0x27f6   :  { %7096 = vmatmul.mubr.msk.f32.vlgmr.msra.gmra.mrb[42].mxu0 %vm278_vm5, %v5433_v6  ;;  %7419 = vmatpush3.bf16.msra.mxu1 %v7416_v14  ;;  %v6413_v6 = vld [vmem:[%s8840_s6 + $0xe8] sm:$0xff] }
0x27f7   :  { %5703 = vmax.xlane.f32.xlu1 %v5702_v39  ;;  %7099 = vmatpush3.msra.mxu0 %v6366_v10  ;;  %v7432_v39 = vpack.c.bf16 %v6413_v6, %v6412_v38 }
0x27f8   :  { %7421 = vmatprep.subr.bf16.mxu1 %v7420_v23 }
0x27fa   :  { %7423 = vmatpush3.bf16.msra.mxu1 %v7420_v23  ;;  %v6419_v23 = vld [vmem:[%s8842_s8 + $0x1] ss:$0 sm:$0xff] }
0x2880   :  { %v5701_v8 = vpop.xlane.xlu1 %5700 }
0x2881   :  { %v5705_v40 = vsub.f32 %v5697_v46, %v5701_v8  ;;  %v6410_v46 = vld [vmem:[%s8840_s6 + $0xd0] sm:$0xff] }
0x2883   :  { %v5707_v18 = vmul.f32 1.442695, %v5705_v40 }
0x2884   :  { %v5704_v48 = vpop.xlane.xlu1 %5703 }
0x2885   :  { %v5706_v63 = vsub.f32 %v5698_v37, %v5704_v48  ;;  %v7428_v37 = vpack.c.bf16 %v6411_v9, %v6410_v46 }
0x2887   :  { %v5709_v49 = vmul.f32 1.442695, %v5706_v63 }
0x2889   :  { %7787 = vpow2.f32 %v5709_v49  ;;  %v5928_v49 = vrot.slane %v8618_v42, %v8122_v16  ;;  %v6415_v16 = vld [vmem:[%s8840_s6 + $0xf8] sm:$0xff] }
0x288a   :  { %7789 = vpow2.f32 %v5707_v18 }
0x2893   :  { %v7788_v21 = vpop.eup %7787 }
0x2894   :  { %v5714_v15 = vsel %vm278_vm5, %v7788_v21, 0.0  ;;  %v7790_v50 = vpop.eup %7789 }
0x2895   :  { %5715 = vadd.xlane.f32.xlu1 %v5714_v15  ;;  %v5711_v51 = vsel %vm278_vm5, %v7790_v50, 0.0 }
0x2899   :  { %5712 = vadd.xlane.f32.xlu1 %v5711_v51 }
0x28aa   :  { %7635 = vrot.lane.b32.xlu1 %v8637_v30, %s7838_s18 }
0x28c9   :  { %v7097_v52 = vpop.f32.mrb[42].mxu0 }
0x28ca   :  { %v5512_v0 = vpop.f32.mrb[43].mxu0 }
0x28cb   :  { %7100 = vmatprep.mubr.msk.f32.mxu0 %vm190_vm1, %v5512_v0 }
0x28cc   :  { %7101 = vmatmul.mubr.msk.f32.vlgmr.msra.gmra.mrb[40].mxu0 %vm190_vm1, %v7097_v52 }
0x2922   :  { %v5716_v12 = vpop.xlane.xlu1 %5715 }
0x2923   :  { %7791 = vrcp.f32 %v5716_v12 }
0x2926   :  { %v5713_v1 = vpop.xlane.xlu1 %5712 }
0x2927   :  { %7793 = vrcp.f32 %v5713_v1 }
0x292a   :  { %v7636_v31 = vpop.permute.xlu1 %7635 }
0x292b   :  { %v7638_v32 = vunpack.i.h.bf16 %v7636_v31  ;;  %v7637_v34 = vunpack.i.l.bf16 %v7636_v31 }
0x292d   :  { %v7412_v54 = vpack.c.bf16 %v7638_v32, %v7637_v34  ;;  %v7792_v30 = vpop.eup %7791  ;;  %v6414_v32 = vld [vmem:[%s8840_s6 + $0xf0] sm:$0xff] }
0x292e   :  { %v5720_v56 = vmul.f32 %v7792_v30, %v7788_v21  ;;  %v7436_v34 = vpack.c.bf16 %v6415_v16, %v6414_v32 }
0x292f   :  { %7413 = vmatprep.subr.bf16.mxu0 %v7412_v54 }
0x2930   :  { %7415 = vmatpush3.bf16.msra.mxu0 %v7412_v54 }
0x2931   :  { %v7794_v27 = vpop.eup %7793  ;;  %7117 = vmatprep.subr.mxu0 %v6367_v26 }
0x2932   :  { %v5718_v55 = vmul.f32 %v7794_v27, %v7790_v50  ;;  %v5934_v50 = vrot.slane %v8618_v42, %v8125_v17  ;;  %v6405_v17 = vld [vmem:[%s8839_s5 + $0x3] ss:$0 sm:$0xff] }
0x2934   :  { %7114 = vmatprep.mubr.msk.f32.mxu0 %vm278_vm5, %v5718_v55 }
0x2935   :  { %7115 = vmatmul.mubr.msk.f32.vlgmr.msra.gmra.mrb[44].mxu0 %vm278_vm5, %v5720_v56 }
0x2936   :  { %7118 = vmatpush3.msra.mxu0 %v6367_v26 }
0x2937   :  { %7425 = vmatprep.subr.bf16.mxu0 %v7424_v36 }
0x2a08   :  { %v7116_v29 = vpop.f32.mrb[44].mxu0 }
0x2a09   :  { %v5799_v57 = vpop.f32.mrb[45].mxu0 }
0x2a0a   :  { %7119 = vmatprep.mubr.msk.f32.mxu0 %vm190_vm1, %v5799_v57  ;;  %v6128_v57 = vrot.slane %v8618_v42, %v8145_v47 }
0x2a0b   :  { %7120 = vmatmul.mubr.msk.f32.vlgmr.msra.gmra.mrb[40].mxu0 %vm190_vm1, %v7116_v29 }
0x2a0c   :  { %7427 = vmatpush3.bf16.msra.mxu0 %v7424_v36 }
0x2a0d   :  { %7429 = vmatprep.subr.bf16.mxu0 %v7428_v37 }
0x2a10   :  { %7431 = vmatpush3.bf16.msra.mxu0 %v7428_v37 }
0x2a11   :  { %7433 = vmatprep.subr.bf16.mxu0 %v7432_v39 }
0x2a14   :  { %7435 = vmatpush3.bf16.msra.mxu0 %v7432_v39 }
0x2a15   :  { %7437 = vmatprep.subr.bf16.mxu0 %v7436_v34 }
0x2a18   :  { %7439 = vmatpush3.bf16.msra.mxu0 %v7436_v34 }
0x2ade   :  { %v7121_v58 = vpop.f32.mrb[40].mxu0 }
0x2adf   :  { %v5892_v59 = vadd.f32 %v7121_v58, %v8593_v19  ;;  %v5880_v60 = vpop.f32.mrb[41].mxu0 }
0x2ae0   :  { %v5891_v61 = vadd.f32 %v5880_v60, %v8590_v44 }
0x2ae1   :  { %v8747_v45 = vadd.f32 %v5896_v41, %v5892_v59 }
0x2ae2   :  { %v8749_v53 = vadd.f32 %v5896_v41, %v5891_v61 }
0x2ae3   :  { %v5902_v62 = vsel %vm48_vm0, %v8747_v45, 0.0 }
0x2ae4   :  { %5903 = vadd.xlane.f32.xlu1 %v5902_v62  ;;  %v5899_v2 = vsel %vm48_vm0, %v8749_v53, 0.0 }
0x2ae5   :  { %5900 = vadd.xlane.f32.xlu0 %v5899_v2 }
0x2b71   :  { %v5904_v43 = vpop.xlane.xlu1 %5903 }
0x2b72   :  { %v5906_v35 = vmul.f32 0.03125, %v5904_v43  ;;  %v5901_v20 = vpop.xlane.xlu0 %5900 }
0x2b73   :  { %v5905_v3 = vmul.f32 0.03125, %v5901_v20 }
0x2b74   :  { %v5908_v19 = vsub.f32 %v8747_v45, %v5906_v35 }
0x2b75   :  { %v5907_v44 = vsub.f32 %v8749_v53, %v5905_v3 }
0x2b76   :  { %v5910_v28 = vmul.f32 %v5908_v19, %v5908_v19 }
0x2b77   :  { %v5909_v4 = vmul.f32 %v5907_v44, %v5907_v44 }
0x2b78   :  { %v5914_v7 = vsel %vm48_vm0, %v5910_v28, 0.0 }
0x2b79   :  { %v5911_v5 = vsel %vm48_vm0, %v5909_v4, 0.0 }
0x2b7a   :  { %5912 = vadd.xlane.f32.xlu0 %v5911_v5 }
0x2b7e   :  { %5915 = vadd.xlane.f32.xlu0 %v5914_v7 }
0x2c07   :  { %v5913_v10 = vpop.xlane.xlu0 %5912 }
0x2c08   :  { %v5917_v8 = vmul.f32 0.03125, %v5913_v10 }
0x2c0a   :  { %v5919_v40 = vadd.f32 1e-05, %v5917_v8 }
0x2c0b   :  { %v5916_v48 = vpop.xlane.xlu0 %5915 }
0x2c0c   :  { %7795 = vrsqrt.f32 %v5919_v40  ;;  %v5918_v63 = vmul.f32 0.03125, %v5916_v48 }
0x2c0e   :  { %v5920_v18 = vadd.f32 1e-05, %v5918_v63 }
0x2c10   :  { %7797 = vrsqrt.f32 %v5920_v18 }
0x2c16   :  { %v7796_v21 = vpop.eup %7795 }
0x2c17   :  { %v5923_v15 = vmul.f32 %v7796_v21, %v5907_v44 }
0x2c19   :  { %v5929_v51 = vmul.f32 %v5928_v49, %v5923_v15 }
0x2c1a   :  { %v7798_v52 = vpop.eup %7797 }
0x2c1b   :  { %v5924_v0 = vmul.f32 %v7798_v52, %v5908_v19  ;;  %v5935_v12 = vadd.f32 %v5934_v50, %v5929_v51 }
0x2c1d   :  { %v5930_v1 = vmul.f32 %v5928_v49, %v5924_v0  ;;  %7130 = vmatprep.mubr.msk.f32.mxu1 %vm48_vm0, %v5935_v12 }
0x2c1f   :  { %v5936_v31 = vadd.f32 %v5934_v50, %v5930_v1 }
0x2c21   :  { %7131 = vmatmul.mubr.msk.f32.vlgmr.msra.gmra.mrb[46].mxu1 %vm48_vm0, %v5936_v31 }
0x2cf4   :  { %v7132_v54 = vpop.f32.mrb[46].mxu1 }
0x2cf5   :  { %v6028_v26 = vadd.f32 %v7132_v54, %v6405_v17  ;;  %v6022_v30 = vpop.f32.mrb[47].mxu1 }
0x2cf6   :  { %v6023_v27 = vadd.f32 %v6405_v17, %v6022_v30 }
0x2cf7   :  { %v6032_v56 = vmax.f32 %v6028_v26, 0.0 }
0x2cf8   :  { %v6031_v55 = vmax.f32 %v6023_v27, 0.0 }
0x2cfa   :  { %7149 = vmatprep.mubr.msk.f32.mxu0 %vm1476_vm6, %v6031_v55 }
0x2cfb   :  { %7150 = vmatmul.mubr.msk.f32.vlgmr.msra.gmra.mrb[46].mxu0 %vm1476_vm6, %v6032_v56 }
0x2dce   :  { %v7151_v29 = vpop.f32.mrb[46].mxu0 }
0x2dcf   :  { %v6114_v41 = vpop.f32.mrb[47].mxu0  ;;  %v6124_v58 = vadd.f32 %v7151_v29, %v8747_v45 }
0x2dd0   :  { %v6123_v59 = vadd.f32 %v6114_v41, %v8749_v53 }
0x2dd1   :  { %v6130_v61 = vadd.f32 %v6128_v57, %v6124_v58 }
0x2dd2   :  { %v6129_v60 = vadd.f32 %v6128_v57, %v6123_v59 }
0x2dd3   :  { %v6136_v2 = vsel %vm48_vm0, %v6130_v61, 0.0 }
0x2dd4   :  { %v6133_v62 = vsel %vm48_vm0, %v6129_v60, 0.0 }
0x2dd5   :  { %6134 = vadd.xlane.f32.xlu0 %v6133_v62 }
0x2dd9   :  { %6137 = vadd.xlane.f32.xlu0 %v6136_v2 }
0x2e62   :  { %v6135_v43 = vpop.xlane.xlu0 %6134 }
0x2e63   :  { %v6139_v35 = vmul.f32 0.03125, %v6135_v43 }
0x2e65   :  { %v6141_v20 = vsub.f32 %v6129_v60, %v6139_v35 }
0x2e66   :  { %v6138_v3 = vpop.xlane.xlu0 %6137 }
0x2e67   :  { %v6140_v19 = vmul.f32 0.03125, %v6138_v3  ;;  %v6143_v44 = vmul.f32 %v6141_v20, %v6141_v20 }
0x2e69   :  { %v6142_v47 = vsub.f32 %v6130_v61, %v6140_v19  ;;  %v6145_v42 = vsel %vm48_vm0, %v6143_v44, 0.0 }
0x2e6a   :  { %6146 = vadd.xlane.f32.xlu0 %v6145_v42 }
0x2e6b   :  { %v6144_v45 = vmul.f32 %v6142_v47, %v6142_v47 }
0x2e6d   :  { %v6148_v53 = vsel %vm48_vm0, %v6144_v45, 0.0 }
0x2e6e   :  { %6149 = vadd.xlane.f32.xlu1 %v6148_v53 }
0x2ef7   :  { %v6147_v4 = vpop.xlane.xlu0 %6146 }
0x2ef8   :  { %v6151_v5 = vmul.f32 0.03125, %v6147_v4 }
0x2efa   :  { %v6153_v28 = vadd.f32 1e-05, %v6151_v5 }
0x2efb   :  { %v6150_v7 = vpop.xlane.xlu1 %6149 }
0x2efc   :  { %7799 = vrsqrt.f32 %v6153_v28  ;;  %v6152_v11 = vmul.f32 0.03125, %v6150_v7 }
0x2efe   :  { %v6154_v13 = vadd.f32 1e-05, %v6152_v11 }
0x2f00   :  { %7801 = vrsqrt.f32 %v6154_v13 }
0x2f06   :  { %v7800_v14 = vpop.eup %7799 }
0x2f07   :  { %v6157_v22 = vmul.f32 %v7800_v14, %v6141_v20 }
0x2f09   :  { %v6163_v24 = vmul.f32 %v6418_v33, %v6157_v22 }
0x2f0a   :  { %v7802_v25 = vpop.eup %7801 }
0x2f0b   :  { %v6158_v46 = vmul.f32 %v7802_v25, %v6142_v47  ;;  %v6169_v36 = vadd.f32 %v6419_v23, %v6163_v24 }
0x2f0d   :  { %v6164_v9 = vmul.f32 %v6418_v33, %v6158_v46  ;;  %6171 = vst.msk [vmem:[#allocation2] sm:$0xff] %vm48_vm0, %v6169_v36 }
0x2f0f   :  { %v6170_v37 = vadd.f32 %v6419_v23, %v6164_v9 }
0x2f11   :  { %6172 = vst.msk [vmem:[#allocation2 + $0x8] sm:$0xff] %vm48_vm0, %v6170_v37 }
0x2f12   :  { %7814 = shalt.err (!%p7811_p4)
}
0x2f13   :  { %s7815_s16 = scalar_lea.hbm %s8843_s9, 256 }
0x2f14   :  { %p7816_p5 = scmp.ne.s32.totalorder %s8843_s9, %s7815_s16  ;;  %p7819_p6 = scmp.lt.u32.totalorder %s7815_s16, %s8843_s9 }
0x2f16   :  { %p7821_p7 = pnand %p7819_p6, %p7816_p5 }
0x2f18   :  { %7824 = shalt.err (!%p7821_p7)
}
0x2f19   :  { %s7840_s22 = smov 128   ;;  %s7841_s23 = smov 8  }
0x2f1a   :  { %6184 = dma.vmem_to_hbm [thread:$0]  %s6179_s11, 256, %s8843_s9, [#allocation3], %s7840_s22, %s7840_s22, %s7841_s23  }
0x2f1b   :  { %7825 = dma.done.wait [#allocation3], 256  }
0x2f1c   :  { %7826 = vsyncadd [#allocation3], 4294967040 }
0x2f1d   :  { %6188 = vsyncpa [#allocation3], 1 }

</bundles_post_ra>
